<compile_context>
chip_gen: v7x
topology: tpu7x:2x2x1
jax: 0.10.0
libtpu: 0.0.40
codegen_flags: <defaults>
</compile_context>

<pallas_src>
import functools

import jax
import jax.numpy as jnp
from jax.experimental import pallas as pl
from jax.experimental.pallas import tpu as pltpu

LANES = 128           # vreg lane width; Cout padded to this for dense stores
MAX_TM = 2048         # cap rows/step: double-buffered tiles stay << scoped VMEM


def _cdiv(a, b):
    return -(-a // b)


def _round_up(a, b):
    return _cdiv(a, b) * b


def _choose_tm(m, max_tm=MAX_TM, min_steps=2):
    """Rows per grid step: big tiles, but >= 2 steps for megacore sharding."""
    steps = max(min_steps, _cdiv(m, max_tm))
    tm = _round_up(_cdiv(m, steps), 128)
    return min(tm, _round_up(m, 8))


# ---------------------------------------------------------------------------
# Pallas kernels
# ---------------------------------------------------------------------------
def _conv_mm_kernel(p_ref, w_ref, b_ref, o_ref, *, relu):
    """(TM, K)bf16 @ (K, 128)bf16 + bias (+ReLU); f32 accumulate."""
    acc = jnp.dot(p_ref[...], w_ref[...], preferred_element_type=jnp.float32)
    acc = acc + b_ref[...]                       # (1, 128) broadcasts over rows
    if relu:
        acc = jnp.maximum(acc, 0.0)
    o_ref[...] = acc.astype(o_ref.dtype)


def _conv12_fused_kernel(p_ref, w1_ref, b1_ref, w2_ref, b2_ref, o_ref):
    """conv1 (+bias+ReLU) then fused 1x1x1 conv2 (+bias+ReLU) on one tile."""
    a = jnp.dot(p_ref[...], w1_ref[...], preferred_element_type=jnp.float32)
    a = jnp.maximum(a + b1_ref[...], 0.0)
    # conv2 is a pure channel-mix; its padded (128,128) weight sits resident
    # in VMEM, so this second dot is essentially free on the MXU.
    a = jnp.dot(a.astype(jnp.bfloat16), w2_ref[...],
                preferred_element_type=jnp.float32)
    a = jnp.maximum(a + b2_ref[...], 0.0)
    o_ref[...] = a.astype(o_ref.dtype)


# ---------------------------------------------------------------------------
# pallas_call wrappers
# ---------------------------------------------------------------------------
def _conv_mm(patches, w_pad, b_pad, relu, out_dtype):
    m, k = patches.shape
    tm = _choose_tm(m)
    return pl.pallas_call(
        functools.partial(_conv_mm_kernel, relu=relu),
        out_shape=jax.ShapeDtypeStruct((m, LANES), out_dtype),
        grid=(_cdiv(m, tm),),                     # ragged last block is masked
        in_specs=[
            pl.BlockSpec((tm, k), lambda i: (i, 0)),       # patch tile
            pl.BlockSpec((k, LANES), lambda i: (0, 0)),    # resident weight
            pl.BlockSpec((1, LANES), lambda i: (0, 0)),    # bias row
        ],
        out_specs=pl.BlockSpec((tm, LANES), lambda i: (i, 0)),
        compiler_params=pltpu.CompilerParams(
            dimension_semantics=("parallel",)),
    )(patches, w_pad, b_pad)


def _conv12_fused(patches, w1_pad, b1_pad, w2_pad, b2_pad):
    m, k = patches.shape
    tm = _choose_tm(m)
    return pl.pallas_call(
        _conv12_fused_kernel,
        out_shape=jax.ShapeDtypeStruct((m, LANES), jnp.bfloat16),
        grid=(_cdiv(m, tm),),
        in_specs=[
            pl.BlockSpec((tm, k), lambda i: (i, 0)),
            pl.BlockSpec((k, LANES), lambda i: (0, 0)),
            pl.BlockSpec((1, LANES), lambda i: (0, 0)),
            pl.BlockSpec((LANES, LANES), lambda i: (0, 0)),
            pl.BlockSpec((1, LANES), lambda i: (0, 0)),
        ],
        out_specs=pl.BlockSpec((tm, LANES), lambda i: (i, 0)),
        compiler_params=pltpu.CompilerParams(
            dimension_semantics=("parallel",)),
    )(patches, w1_pad, b1_pad, w2_pad, b2_pad)


# ---------------------------------------------------------------------------
# im2col + weight packing (plain-JAX glue, fused under jit)
# ---------------------------------------------------------------------------
def _im2col_3d(x_ndhwc, ksz):
    n, d, h, w, c = x_ndhwc.shape
    do, ho, wo = d - ksz + 1, h - ksz + 1, w - ksz + 1
    cols = []
    for a in range(ksz):
        for b in range(ksz):
            for cc in range(ksz):
                cols.append(x_ndhwc[:, a:a + do, b:b + ho, cc:cc + wo, :])
    patches = cols[0] if len(cols) == 1 else jnp.concatenate(cols, axis=-1)
    return patches.reshape(n * do * ho * wo, ksz ** 3 * c), (n, do, ho, wo)


def _prep_weight(w_oidhw, bias, k_pad=None):
    """PyTorch (Co,Ci,kd,kh,kw) -> (K[, padded], 128) bf16 + (1, 128) f32 bias."""
    co, ci, kd, kh, kw = w_oidhw.shape
    k = kd * kh * kw * ci
    w2d = jnp.transpose(w_oidhw, (2, 3, 4, 1, 0)).reshape(k, co)
    kp = k if k_pad is None else k_pad
    w_pad = jnp.zeros((kp, LANES), jnp.bfloat16).at[:k, :co].set(
        w2d.astype(jnp.bfloat16))
    b_pad = jnp.zeros((1, LANES), jnp.float32).at[0, :co].set(
        bias.astype(jnp.float32))
    return w_pad, b_pad


# ---------------------------------------------------------------------------
# SRCNN module
# ---------------------------------------------------------------------------
class SRCNNPallas:
    def __init__(self, kernel1, kernel2, kernel3, key):
        def init_conv(k, cout, cin, ksz):
            kw_, kb_ = jax.random.split(k)
            fan_in = cin * ksz * ksz * ksz
            bound = 1.0 / (fan_in ** 0.5)          # PyTorch default uniform init
            w = jax.random.uniform(kw_, (cout, cin, ksz, ksz, ksz),
                                   jnp.float32, -bound, bound)
            b = jax.random.uniform(kb_, (cout,), jnp.float32, -bound, bound)
            return w, b

        k1, k2, k3 = jax.random.split(key, 3)
        self.k1, self.k2, self.k3 = kernel1, kernel2, kernel3
        self.c_mid, self.c_out = 32, 3
        self.w1, self.b1 = init_conv(k1, 32, 3, kernel1)
        self.w2, self.b2 = init_conv(k2, 32, 32, kernel2)
        self.w3, self.b3 = init_conv(k3, 3, 32, kernel3)

        self._fuse_conv2 = (kernel2 == 1)
        # Pack once: Cout padded to 128 lanes, bf16 operands, f32 bias.
        self.w1p, self.b1p = _prep_weight(self.w1, self.b1)
        self.w2p, self.b2p = _prep_weight(
            self.w2, self.b2, k_pad=LANES if self._fuse_conv2 else None)
        self.w3p, self.b3p = _prep_weight(self.w3, self.b3)
        self._fwd = jax.jit(self._forward)

    def _forward(self, x_ncdhw):
        # NCDHW -> NDHWC; bf16 operands for the MXU (f32 accumulate in-kernel).
        x = jnp.transpose(x_ncdhw, (0, 2, 3, 4, 1)).astype(jnp.bfloat16)

        # conv1 (+ReLU), with the 1x1x1 conv2 (+ReLU) fused into the same kernel.
        # ReLU kernels store bf16 (half the intermediate HBM traffic; the next
        # layer consumed bf16 anyway).
        p1, (n, d, h, w) = _im2col_3d(x, self.k1)
        if self._fuse_conv2:
            y = _conv12_fused(p1, self.w1p, self.b1p, self.w2p, self.b2p)
            y = y[:, :self.c_mid].reshape(n, d, h, w, self.c_mid)
        else:
            y = _conv_mm(p1, self.w1p, self.b1p, relu=True,
                         out_dtype=jnp.bfloat16)
            y = y[:, :self.c_mid].reshape(n, d, h, w, self.c_mid)
            p2, (n, d, h, w) = _im2col_3d(y, self.k2)
            y = _conv_mm(p2, self.w2p, self.b2p, relu=True,
                         out_dtype=jnp.bfloat16)
            y = y[:, :self.c_mid].reshape(n, d, h, w, self.c_mid)

        # conv3 (no activation), f32 output for last-layer precision.
        # TODO(synk): in-kernel implicit-GEMM im2col (keep NDHWC block resident
        # in VMEM, accumulate 27 static-offset dots) would remove the XLA-side
        # 27x patch expansion; minor at these sizes so kept as XLA glue.
        p3, (n, d, h, w) = _im2col_3d(y, self.k3)
        z = _conv_mm(p3, self.w3p, self.b3p, relu=False, out_dtype=jnp.float32)
        z = z[:, :self.c_out].reshape(n, d, h, w, self.c_out)
        return jnp.transpose(z, (0, 4, 1, 2, 3))      # NDHWC -> NCDHW (f32)

    def __call__(self, x_ncdhw):
        return self._fwd(x_ncdhw)


# ---------------------------------------------------------------------------
# Main
# ---------------------------------------------------------------------------
if __name__ == "__main__":
    key = jax.random.PRNGKey(0)
    kx, kp = jax.random.split(key)

    # Small NCDHW input consistent with Conv3d(3, ...) modules.
    x = jax.random.normal(kx, (2, 3, 8, 16, 16), jnp.float32)

    model = SRCNNPallas(kernel1=3, kernel2=1, kernel3=3, key=kp)
    out = jax.block_until_ready(model(x))

    # Pure-JAX f32 reference (lax conv, NCDHW / OIDHW, VALID) for sanity.
    def ref_conv(xr, w, b):
        y = jax.lax.conv_general_dilated(
            xr, w, (1, 1, 1), "VALID",
            dimension_numbers=("NCDHW", "OIDHW", "NCDHW"))
        return y + b.reshape(1, -1, 1, 1, 1)

    r = jnp.maximum(ref_conv(x, model.w1, model.b1), 0.0)
    r = jnp.maximum(ref_conv(r, model.w2, model.b2), 0.0)
    r = ref_conv(r, model.w3, model.b3)

    assert out.shape == r.shape, (out.shape, r.shape)
    # bf16 matmul operands/activations with f32 accumulation: loose tolerance.
    assert jnp.allclose(out, r, atol=3e-2, rtol=3e-2)
    print("KERNEL_OK")
</pallas_src>

<mosaic_0001>
module attributes {stable_mosaic.version = 11 : i64} {
  func.func @_conv12_fused_kernel(%arg0: i32, %arg1: memref<1280x81xbf16, #tpu.memory_space<vmem>>, %arg2: memref<81x128xbf16, #tpu.memory_space<vmem>>, %arg3: memref<1x128xf32, #tpu.memory_space<vmem>>, %arg4: memref<128x128xbf16, #tpu.memory_space<vmem>>, %arg5: memref<1x128xf32, #tpu.memory_space<vmem>>, %arg6: memref<1280x128xbf16, #tpu.memory_space<vmem>>) attributes {dimension_semantics = [#tpu.dimension_semantics<parallel>], iteration_bounds = array<i64: 2>, scalar_prefetch = 0 : i64, scratch_operands = 0 : i64, tpu.core_type = #tpu.core_type<tc>, window_params = [{transform_indices = @transform_0, window_bounds = array<i64: 1280, 81>}, {pipeline_mode = #tpu.pipeline_mode<synchronous>, transform_indices = @transform_1, window_bounds = array<i64: 81, 128>}, {pipeline_mode = #tpu.pipeline_mode<synchronous>, transform_indices = @transform_2, window_bounds = array<i64: 1, 128>}, {pipeline_mode = #tpu.pipeline_mode<synchronous>, transform_indices = @transform_3, window_bounds = array<i64: 128, 128>}, {pipeline_mode = #tpu.pipeline_mode<synchronous>, transform_indices = @transform_4, window_bounds = array<i64: 1, 128>}, {transform_indices = @transform_5, window_bounds = array<i64: 1280, 128>}]} {
    %c0 = arith.constant 0 : index
    %c0_0 = arith.constant 0 : index
    %0 = vector.load %arg1[%c0, %c0_0] : memref<1280x81xbf16, #tpu.memory_space<vmem>>, vector<1280x81xbf16>
    %c0_1 = arith.constant 0 : index
    %c0_2 = arith.constant 0 : index
    %1 = vector.load %arg2[%c0_1, %c0_2] : memref<81x128xbf16, #tpu.memory_space<vmem>>, vector<81x128xbf16>
    %cst = arith.constant dense<0.000000e+00> : vector<1280x128xf32>
    %2 = tpu.matmul %0, %1, %cst {dimension_numbers = #tpu.dot_dimension_numbers<[1], [0], [0], [1], [0, 0, 1, 1], [], []>} : vector<1280x81xbf16>, vector<81x128xbf16>, vector<1280x128xf32> -> vector<1280x128xf32>
    %c0_3 = arith.constant 0 : index
    %c0_4 = arith.constant 0 : index
    %3 = vector.load %arg3[%c0_3, %c0_4] : memref<1x128xf32, #tpu.memory_space<vmem>>, vector<1x128xf32>
    %4 = vector.broadcast %3 : vector<1x128xf32> to vector<1280x128xf32>
    %5 = arith.addf %2, %4 : vector<1280x128xf32>
    %cst_5 = arith.constant 0.000000e+00 : f32
    %6 = vector.broadcast %cst_5 : f32 to vector<1280x128xf32>
    %7 = arith.maximumf %5, %6 : vector<1280x128xf32>
    %8 = arith.truncf %7 : vector<1280x128xf32> to vector<1280x128xbf16>
    %c0_6 = arith.constant 0 : index
    %c0_7 = arith.constant 0 : index
    %9 = vector.load %arg4[%c0_6, %c0_7] : memref<128x128xbf16, #tpu.memory_space<vmem>>, vector<128x128xbf16>
    %cst_8 = arith.constant dense<0.000000e+00> : vector<1280x128xf32>
    %10 = tpu.matmul %8, %9, %cst_8 {dimension_numbers = #tpu.dot_dimension_numbers<[1], [0], [0], [1], [0, 0, 1, 1], [], []>} : vector<1280x128xbf16>, vector<128x128xbf16>, vector<1280x128xf32> -> vector<1280x128xf32>
    %c0_9 = arith.constant 0 : index
    %c0_10 = arith.constant 0 : index
    %11 = vector.load %arg5[%c0_9, %c0_10] : memref<1x128xf32, #tpu.memory_space<vmem>>, vector<1x128xf32>
    %12 = vector.broadcast %11 : vector<1x128xf32> to vector<1280x128xf32>
    %13 = arith.addf %10, %12 : vector<1280x128xf32>
    %cst_11 = arith.constant 0.000000e+00 : f32
    %14 = vector.broadcast %cst_11 : f32 to vector<1280x128xf32>
    %15 = arith.maximumf %13, %14 : vector<1280x128xf32>
    %16 = arith.truncf %15 : vector<1280x128xf32> to vector<1280x128xbf16>
    %c0_12 = arith.constant 0 : index
    %c0_13 = arith.constant 0 : index
    %17 = vector.load %arg6[%c0_12, %c0_13] : memref<1280x128xbf16, #tpu.memory_space<vmem>>, vector<1280x128xbf16>
    tpu.vector_store %arg6[%c0_12, %c0_13], %16 {strides = array<i32>} : memref<1280x128xbf16, #tpu.memory_space<vmem>>, vector<1280x128xbf16>,
    return
  }
  func.func @transform_0(%arg0: i32) -> (i32, i32) {
    %c0_i32 = arith.constant 0 : i32
    %c0_i32_0 = arith.constant 0 : i32
    return %arg0, %c0_i32 : i32, i32
  }
  func.func @transform_1(%arg0: i32) -> (i32, i32) {
    %c0_i32 = arith.constant 0 : i32
    %c0_i32_0 = arith.constant 0 : i32
    %c0_i32_1 = arith.constant 0 : i32
    return %c0_i32, %c0_i32_0 : i32, i32
  }
  func.func @transform_2(%arg0: i32) -> (i32, i32) {
    %c0_i32 = arith.constant 0 : i32
    %c0_i32_0 = arith.constant 0 : i32
    %c0_i32_1 = arith.constant 0 : i32
    return %c0_i32, %c0_i32_0 : i32, i32
  }
  func.func @transform_3(%arg0: i32) -> (i32, i32) {
    %c0_i32 = arith.constant 0 : i32
    %c0_i32_0 = arith.constant 0 : i32
    %c0_i32_1 = arith.constant 0 : i32
    return %c0_i32, %c0_i32_0 : i32, i32
  }
  func.func @transform_4(%arg0: i32) -> (i32, i32) {
    %c0_i32 = arith.constant 0 : i32
    %c0_i32_0 = arith.constant 0 : i32
    %c0_i32_1 = arith.constant 0 : i32
    return %c0_i32, %c0_i32_0 : i32, i32
  }
  func.func @transform_5(%arg0: i32) -> (i32, i32) {
    %c0_i32 = arith.constant 0 : i32
    %c0_i32_0 = arith.constant 0 : i32
    return %arg0, %c0_i32 : i32, i32
  }
}

module attributes {stable_mosaic.version = 11 : i64} {
  func.func @_conv_mm_kernel(%arg0: i32, %arg1: memref<640x864xbf16, #tpu.memory_space<vmem>>, %arg2: memref<864x128xbf16, #tpu.memory_space<vmem>>, %arg3: memref<1x128xf32, #tpu.memory_space<vmem>>, %arg4: memref<640x128xf32, #tpu.memory_space<vmem>>) attributes {dimension_semantics = [#tpu.dimension_semantics<parallel>], iteration_bounds = array<i64: 2>, scalar_prefetch = 0 : i64, scratch_operands = 0 : i64, tpu.core_type = #tpu.core_type<tc>, window_params = [{transform_indices = @transform_0, window_bounds = array<i64: 640, 864>}, {pipeline_mode = #tpu.pipeline_mode<synchronous>, transform_indices = @transform_1, window_bounds = array<i64: 864, 128>}, {pipeline_mode = #tpu.pipeline_mode<synchronous>, transform_indices = @transform_2, window_bounds = array<i64: 1, 128>}, {transform_indices = @transform_3, window_bounds = array<i64: 640, 128>}]} {
    %c0 = arith.constant 0 : index
    %c0_0 = arith.constant 0 : index
    %0 = vector.load %arg1[%c0, %c0_0] : memref<640x864xbf16, #tpu.memory_space<vmem>>, vector<640x864xbf16>
    %c0_1 = arith.constant 0 : index
    %c0_2 = arith.constant 0 : index
    %1 = vector.load %arg2[%c0_1, %c0_2] : memref<864x128xbf16, #tpu.memory_space<vmem>>, vector<864x128xbf16>
    %cst = arith.constant dense<0.000000e+00> : vector<640x128xf32>
    %2 = tpu.matmul %0, %1, %cst {dimension_numbers = #tpu.dot_dimension_numbers<[1], [0], [0], [1], [0, 0, 1, 1], [], []>} : vector<640x864xbf16>, vector<864x128xbf16>, vector<640x128xf32> -> vector<640x128xf32>
    %c0_3 = arith.constant 0 : index
    %c0_4 = arith.constant 0 : index
    %3 = vector.load %arg3[%c0_3, %c0_4] : memref<1x128xf32, #tpu.memory_space<vmem>>, vector<1x128xf32>
    %4 = vector.broadcast %3 : vector<1x128xf32> to vector<640x128xf32>
    %5 = arith.addf %2, %4 : vector<640x128xf32>
    %c0_5 = arith.constant 0 : index
    %c0_6 = arith.constant 0 : index
    %6 = vector.load %arg4[%c0_5, %c0_6] : memref<640x128xf32, #tpu.memory_space<vmem>>, vector<640x128xf32>
    tpu.vector_store %arg4[%c0_5, %c0_6], %5 {strides = array<i32>} : memref<640x128xf32, #tpu.memory_space<vmem>>, vector<640x128xf32>,
    return
  }
  func.func @transform_0(%arg0: i32) -> (i32, i32) {
    %c0_i32 = arith.constant 0 : i32
    %c0_i32_0 = arith.constant 0 : i32
    return %arg0, %c0_i32 : i32, i32
  }
  func.func @transform_1(%arg0: i32) -> (i32, i32) {
    %c0_i32 = arith.constant 0 : i32
    %c0_i32_0 = arith.constant 0 : i32
    %c0_i32_1 = arith.constant 0 : i32
    return %c0_i32, %c0_i32_0 : i32, i32
  }
  func.func @transform_2(%arg0: i32) -> (i32, i32) {
    %c0_i32 = arith.constant 0 : i32
    %c0_i32_0 = arith.constant 0 : i32
    %c0_i32_1 = arith.constant 0 : i32
    return %c0_i32, %c0_i32_0 : i32, i32
  }
  func.func @transform_3(%arg0: i32) -> (i32, i32) {
    %c0_i32 = arith.constant 0 : i32
    %c0_i32_0 = arith.constant 0 : i32
    return %arg0, %c0_i32 : i32, i32
  }
}

</mosaic_0001>

<bundles_post_ra>
// kernel: _forward.2
= control target key start
LH: loop header
LB: loop body
LE: loop exit
PB: predicated region body
PF: predicated region fallthrough
CT: control target
= control target key end

     0   :  { %s6013_s18 = smov 0   ;;  %s6015_s19 = smov 0   ;;  %s6876_s0 = inlined_call_operand.vmem [shape: bf16[2352,81], index: 0, kind: input, shape index: {}]   ;;  %s6877_s1 = inlined_call_operand.vmem [shape: bf16[81,128], index: 1, kind: input, shape index: {}]   ;;  %s6878_s2 = inlined_call_operand.vmem [shape: f32[1,128], index: 2, kind: input, shape index: {}]   ;;  %s6879_s3 = inlined_call_operand.vmem [shape: bf16[128,128], index: 3, kind: input, shape index: {}]   ;;  %s6880_s4 = inlined_call_operand.vmem [shape: f32[1,128], index: 4, kind: input, shape index: {}]   ;;  %s6881_s5 = inlined_call_operand.vmem [shape: bf16[2352,128], index: 5, kind: output, shape index: {}]  }
   0x1   :  { %s6017_s20 = smov 0  }
   0x2 LB: > { %s6026_s21 = sadd.s32 4294967295, %s5948_s20   ;;  %s6028_s22 = sadd.s32 1, %s5948_s20   ;;  %s5948_s20 = sphi %s6017_s20, %s6888_s20   ;;  %s5944_s19 = sphi %s6015_s19, %s6887_s19   ;;  %s5940_s18 = sphi %s6013_s18, %s6886_s18  }
   0x3   : > { %s129_s23 = ssub.s32 %s5948_s20, %s6028_s22  ;;  %s132_s24 = sadd.s32 1, %s5944_s19 }
   0x4   : > { %p130_p0 = scmp.eq.s32.totalorder %s129_s23, 0  ;;  %p142_p1 = scmp.ne.s32.totalorder %s5944_s19, %s5940_s18 }
   0x5   : > { %p143_p2 = scmp.eq.s32.totalorder %s6026_s21, 1  ;;  %p4191_p3 = scmp.ge.s32.totalorder %s5948_s20, 1 }
   0x6   : > { %s6036_s25 = scalar_select %p130_p0, %s5944_s19, %s132_s24  }
   0x7   : > { %p6038_p4 = por %p143_p2, %p142_p1  ;;  %p196_p5 = scmp.lt.s32.totalorder %s5948_s20, 3 }
   0x9   : > { %p197_p6 = pnand %p4191_p3, %p196_p5 }
   0xa   : > { %v5798_v0 = vld [vmem:[%s6877_s1] sm:$0xff] (!%p197_p6)   ;;  %v5799_v1 = vld [vmem:[%s6877_s1 + $0x8] sm:$0xff] (!%p197_p6)   ;;  %s6049_s6 = smul.u32 (!%p197_p6), 160, %s6026_s21  ;;  %v5800_v2 = vld [vmem:[%s6877_s1 + $0x10] sm:$0xff] (!%p197_p6)   ;;  %vm1099_vm0 = vcmask (!%p197_p6), 1040384   ;;  %vm858_vm1 = vcmask (!%p197_p6), 662528  }
   0xb   : > { %200 = sbr.rel (%p197_p6) target bundleno = 882 (0x372), region = 40  ;;  %5360 = vmatprep.subr.bf16.mxu0 (!%p197_p6), %v5798_v0  ;;  %v5801_v3 = vld [vmem:[%s6877_s1 + $0x18] sm:$0xff] (!%p197_p6)   ;;  %v5803_v4 = vld [vmem:[%s6877_s1 + $0x28] ss:$0 sps:$4 sm:$0x11] (!%p197_p6)   ;;  %v5802_v6 = vld [vmem:[%s6877_s1 + $0x20] sm:$0xff] (!%p197_p6)  }
   0xc   : > { %5361 = vmatpush3.bf16.msra.mxu0 (!%p197_p6), %v5798_v0  ;;  %p232_p7 = scmp.lt.s32.totalorder (!%p197_p6), %s6049_s6, 293  ;;  %v5982_v7 = vmov (!%p197_p6), 0   ;;  %v5852_v26 = vld [vmem:[%s6879_s3] sm:$0xff] (!%p197_p6)   ;;  %v5855_v29 = vld [vmem:[%s6879_s3 + $0x8] sm:$0xff] (!%p197_p6)   ;;  %v5856_v30 = vld [vmem:[%s6879_s3 + $0x10] sm:$0xff] (!%p197_p6)   ;;  %s224_s28 = sand.u32 (!%p197_p6), 1, %s5940_s18  }
   0xd   : > { %5362 = vmatprep.subr.bf16.mxu0 (!%p197_p6), %v5799_v1  ;;  %v1101_v8 = vsel (!%p197_p6), %vm1099_vm0, 65535, %v5982_v7  ;;  %5532 = vmatprep.subr.bf16.mxu1 (!%p197_p6), %v5852_v26  ;;  %v5859_v33 = vld [vmem:[%s6879_s3 + $0x18] sm:$0xff] (!%p197_p6)   ;;  %v5860_v34 = vld [vmem:[%s6879_s3 + $0x20] sm:$0xff] (!%p197_p6)   ;;  %v5863_v37 = vld [vmem:[%s6879_s3 + $0x28] sm:$0xff] (!%p197_p6)   ;;  %s5708_s29 = smul.u32 (!%p197_p6), 640, %s224_s28 }
   0xe   : > { %v1103_v9 = vand.u32 (!%p197_p6), %v5803_v4, %v1101_v8  ;;  %5533 = vmatpush3.bf16.msra.mxu1 (!%p197_p6), %v5852_v26  ;;  %v5864_v39 = vld [vmem:[%s6879_s3 + $0x30] sm:$0xff] (!%p197_p6)   ;;  %v5867_v41 = vld [vmem:[%s6879_s3 + $0x38] sm:$0xff] (!%p197_p6)   ;;  %v6206_v8 = vld [vmem:[%s6878_s2] ss:$0 sm:$0xff] (!%p197_p6) }
   0xf   : > { %5534 = vmatprep.subr.bf16.mxu1 (!%p197_p6), %v5855_v29  ;;  %s6390_s7 = scalar_lea.vmem (!%p197_p6), [#allocation2], %s5708_s29  }
  0x10   : > { %5363 = vmatpush3.bf16.msra.mxu0 (!%p197_p6), %v5799_v1 }
  0x11   : > { %5364 = vmatprep.subr.bf16.mxu0 (!%p197_p6), %v5800_v2 }
  0x12   : > { %s233_s11 = scalar_select %p232_p7, %s6049_s6, 293  ;;  %5535 = vmatpush3.bf16.msra.mxu1 %v5855_v29 }
  0x13   : > { %5536 = vmatprep.subr.bf16.mxu1 %v5856_v30  ;;  %s3730_s10 = ssub.s32 (%p6038_p4), 294, %s6049_s6 }
  0x14   : > { %s4192_s12 = sshll.u32 %s233_s11, 2  ;;  %5365 = vmatpush3.bf16.msra.mxu0 %v5800_v2  ;;  %s4704_s11 = smul.u32 (%p6038_p4), 640, %s6026_s21 }
  0x15   : > { %s6065_s17 = scalar_lea.vmem %s6876_s0, %s4192_s12  ;;  %5366 = vmatprep.subr.bf16.mxu0 %v5801_v3  ;;  %p3731_p8 = scmp.lt.s32.totalorder (%p6038_p4), %s3730_s10, 160 }
  0x16   : > { %v5804_v5 = vld [vmem:[%s6065_s17] sm:$0xff]   ;;  %v5805_v10 = vld [vmem:[%s6065_s17 + $0x8] sm:$0xff]   ;;  %v5806_v11 = vld [vmem:[%s6065_s17 + $0x10] sm:$0xff]   ;;  %5537 = vmatpush3.bf16.msra.mxu1 %v5856_v30  ;;  %s6684_s14 = scalar_lea.vmem (%p6038_p4), %s6881_s5, %s4704_s11  }
  0x17   : > { %5372 = vmatprep.mubr.msk.bf16.mxu0 %vm858_vm1, %v5804_v5  ;;  %v5807_v12 = vld [vmem:[%s6065_s17 + $0x18] sm:$0xff]   ;;  %v5808_v13 = vld [vmem:[%s6065_s17 + $0x20] sm:$0xff]   ;;  %v5809_v14 = vld [vmem:[%s6065_s17 + $0x28] sm:$0xff]   ;;  %5538 = vmatprep.subr.bf16.mxu1 %v5859_v33 }
  0x18   : > { %5367 = vmatpush3.bf16.msra.mxu0 %v5801_v3  ;;  %v5810_v15 = vld [vmem:[%s6065_s17 + $0x30] sm:$0xff]   ;;  %v5811_v16 = vld [vmem:[%s6065_s17 + $0x38] sm:$0xff]   ;;  %v5812_v17 = vld [vmem:[%s6065_s17 + $0x40] sm:$0xff]  }
  0x19   : > { %5368 = vmatprep.subr.bf16.mxu0 %v5802_v6  ;;  %v5813_v18 = vld [vmem:[%s6065_s17 + $0x48] sm:$0xff]   ;;  %v5814_v19 = vld [vmem:[%s6065_s17 + $0x50] sm:$0xff]   ;;  %v5815_v20 = vld [vmem:[%s6065_s17 + $0x58] sm:$0xff]  }
  0x1a   : > { %v5816_v21 = vld [vmem:[%s6065_s17 + $0x60] sm:$0xff]   ;;  %v5817_v22 = vld [vmem:[%s6065_s17 + $0x68] sm:$0xff]   ;;  %v5818_v23 = vld [vmem:[%s6065_s17 + $0x70] sm:$0xff]   ;;  %5539 = vmatpush3.bf16.msra.mxu1 %v5859_v33 }
  0x1b   : > { %v5819_v24 = vld [vmem:[%s6065_s17 + $0x78] sm:$0xff]   ;;  %v5820_v25 = vld [vmem:[%s6065_s17 + $0x80] sm:$0xff]   ;;  %v5821_v27 = vld [vmem:[%s6065_s17 + $0x88] sm:$0xff]   ;;  %5540 = vmatprep.subr.bf16.mxu1 %v5860_v34 }
  0x1c   : > { %5369 = vmatpush3.bf16.msra.mxu0 %v5802_v6  ;;  %v5822_v28 = vld [vmem:[%s6065_s17 + $0x90] sm:$0xff]   ;;  %v5823_v31 = vld [vmem:[%s6065_s17 + $0x98] sm:$0xff]   ;;  %v5824_v32 = vld [vmem:[%s6065_s17 + $0xa0] sm:$0xff]  }
  0x1d   : > { %5370 = vmatprep.subr.bf16.mxu0 %v1103_v9  ;;  %v5825_v35 = vld [vmem:[%s6065_s17 + $0xa8] sm:$0xff]   ;;  %v5826_v36 = vld [vmem:[%s6065_s17 + $0xb0] sm:$0xff]   ;;  %v5827_v38 = vld [vmem:[%s6065_s17 + $0xb8] sm:$0xff]  }
  0x1e   : > { %5541 = vmatpush3.bf16.msra.mxu1 %v5860_v34  ;;  %v5828_v40 = vld [vmem:[%s6065_s17 + $0xc0] sm:$0xff]   ;;  %v5829_v42 = vld [vmem:[%s6065_s17 + $0xc8] sm:$0xff]   ;;  %v5830_v43 = vld [vmem:[%s6065_s17 + $0xd0] sm:$0xff]  }
  0x1f   : > { %5542 = vmatprep.subr.bf16.mxu1 %v5863_v37  ;;  %v5831_v44 = vld [vmem:[%s6065_s17 + $0xd8] sm:$0xff]   ;;  %v5832_v45 = vld [vmem:[%s6065_s17 + $0xe0] sm:$0xff]   ;;  %v5833_v46 = vld [vmem:[%s6065_s17 + $0xe8] sm:$0xff]  }
  0x20   : > { %5371 = vmatpush3.bf16.msra.mxu0 %v1103_v9  ;;  %v5834_v47 = vld [vmem:[%s6065_s17 + $0xf0] sm:$0xff]   ;;  %v5835_v48 = vld [vmem:[%s6065_s17 + $0xf8] sm:$0xff]   ;;  %v5836_v49 = vld [vmem:[%s6065_s17 + $0x100] sm:$0xff]  }
  0x21   : > { %v5837_v50 = vld [vmem:[%s6065_s17 + $0x108] sm:$0xff]   ;;  %v5838_v51 = vld [vmem:[%s6065_s17 + $0x110] sm:$0xff]   ;;  %v5839_v52 = vld [vmem:[%s6065_s17 + $0x118] sm:$0xff]  }
  0x22   : > { %5543 = vmatpush3.bf16.msra.mxu1 %v5863_v37  ;;  %v5840_v53 = vld [vmem:[%s6065_s17 + $0x120] sm:$0xff]   ;;  %v5841_v54 = vld [vmem:[%s6065_s17 + $0x128] sm:$0xff]   ;;  %v5842_v55 = vld [vmem:[%s6065_s17 + $0x130] sm:$0xff]  }
  0x23   : > { %5373 = vmatmul.mubr.msk.bf16.vlgmr.msra.gmra.mrb[0].mxu0 %vm858_vm1, %v5805_v10  ;;  %5544 = vmatprep.subr.bf16.mxu1 %v5864_v39  ;;  %v5843_v56 = vld [vmem:[%s6065_s17 + $0x138] sm:$0xff]   ;;  %v5844_v57 = vld [vmem:[%s6065_s17 + $0x140] sm:$0xff]   ;;  %v5845_v58 = vld [vmem:[%s6065_s17 + $0x148] sm:$0xff]  }
  0x24   : > { %5376 = vmatprep.mubr.msk.bf16.mxu0 %vm858_vm1, %v5806_v11  ;;  %v5846_v59 = vld [vmem:[%s6065_s17 + $0x150] sm:$0xff]   ;;  %v5847_v60 = vld [vmem:[%s6065_s17 + $0x158] sm:$0xff]   ;;  %v5848_v61 = vld [vmem:[%s6065_s17 + $0x160] sm:$0xff]  }
  0x25   : > { %v5849_v62 = vld [vmem:[%s6065_s17 + $0x168] sm:$0xff]   ;;  %v5850_v63 = vld [vmem:[%s6065_s17 + $0x170] sm:$0xff]   ;;  %v5851_v0 = vld [vmem:[%s6065_s17 + $0x178] sm:$0xff]  }
  0x26   : > { %5545 = vmatpush3.bf16.msra.mxu1 %v5864_v39  ;;  %v5853_v1 = vld [vmem:[%s6065_s17 + $0x180] sm:$0xff]   ;;  %v5854_v2 = vld [vmem:[%s6065_s17 + $0x188] sm:$0xff]   ;;  %v5857_v3 = vld [vmem:[%s6065_s17 + $0x190] sm:$0xff]  }
  0x27   : > { %5546 = vmatprep.subr.bf16.mxu1 %v5867_v41  ;;  %v5858_v4 = vld [vmem:[%s6065_s17 + $0x198] sm:$0xff]   ;;  %v5861_v5 = vld [vmem:[%s6065_s17 + $0x1a0] sm:$0xff]   ;;  %v5862_v6 = vld [vmem:[%s6065_s17 + $0x1a8] sm:$0xff]  }
  0x28   : > { %v5865_v7 = vld [vmem:[%s6065_s17 + $0x1b0] sm:$0xff]  }
  0x2a   : > { %5547 = vmatpush3.bf16.msra.mxu1 %v5867_v41 }
  0x2b   : > { %5377 = vmatmul.mubr.msk.bf16.gmra.mrb[4].mxu0 %vm858_vm1, %v5807_v12  ;;  %v5866_v12 = vld [vmem:[%s6065_s17 + $0x1b8] sm:$0xff]  }
  0x2c   : > { %5380 = vmatprep.mubr.msk.bf16.mxu0 %vm858_vm1, %v5808_v13 }
  0x33   : > { %5381 = vmatmul.mubr.msk.bf16.gmra.mrb[8].mxu0 %vm858_vm1, %v5809_v14 }
  0x34   : > { %5384 = vmatprep.mubr.msk.bf16.mxu0 %vm858_vm1, %v5810_v15  ;;  %v5868_v15 = vld [vmem:[%s6065_s17 + $0x1c0] sm:$0xff]  }
  0x3b   : > { %5385 = vmatmul.mubr.msk.bf16.gmra.mrb[12].mxu0 %vm858_vm1, %v5811_v16 }
  0x3c   : > { %5388 = vmatprep.mubr.msk.bf16.mxu0 %vm858_vm1, %v5812_v17 }
  0x43   : > { %5389 = vmatmul.mubr.msk.bf16.gmra.mrb[16].mxu0 %vm858_vm1, %v5813_v18 }
  0x44   : > { %5392 = vmatprep.mubr.msk.bf16.mxu0 %vm858_vm1, %v5814_v19 }
  0x4b   : > { %5393 = vmatmul.mubr.msk.bf16.gmra.mrb[20].mxu0 %vm858_vm1, %v5815_v20 }
  0x4c   : > { %5396 = vmatprep.mubr.msk.bf16.mxu0 %vm858_vm1, %v5816_v21 }
  0x53   : > { %5397 = vmatmul.mubr.msk.bf16.gmra.mrb[24].mxu0 %vm858_vm1, %v5817_v22 }
  0x54   : > { %5400 = vmatprep.mubr.msk.bf16.mxu0 %vm858_vm1, %v5818_v23 }
  0x5b   : > { %5401 = vmatmul.mubr.msk.bf16.gmra.mrb[28].mxu0 %vm858_vm1, %v5819_v24 }
  0x5c   : > { %5404 = vmatprep.mubr.msk.bf16.mxu0 %vm858_vm1, %v5820_v25 }
  0x63   : > { %5405 = vmatmul.mubr.msk.bf16.gmra.mrb[32].mxu0 %vm858_vm1, %v5821_v27 }
  0x64   : > { %5408 = vmatprep.mubr.msk.bf16.mxu0 %vm858_vm1, %v5822_v28  ;;  %v5869_v28 = vld [vmem:[%s6065_s17 + $0x1c8] sm:$0xff]  }
  0x6b   : > { %5409 = vmatmul.mubr.msk.bf16.gmra.mrb[36].mxu0 %vm858_vm1, %v5823_v31  ;;  %v5870_v31 = vld [vmem:[%s6065_s17 + $0x1d0] sm:$0xff]  }
  0x6c   : > { %5412 = vmatprep.mubr.msk.bf16.mxu0 %vm858_vm1, %v5824_v32 }
  0x73   : > { %5413 = vmatmul.mubr.msk.bf16.gmra.mrb[40].mxu0 %vm858_vm1, %v5825_v35 }
  0x74   : > { %5416 = vmatprep.mubr.msk.bf16.mxu0 %vm858_vm1, %v5826_v36 }
  0x7b   : > { %5417 = vmatmul.mubr.msk.bf16.gmra.mrb[44].mxu0 %vm858_vm1, %v5827_v38 }
  0x7c   : > { %5420 = vmatprep.mubr.msk.bf16.mxu0 %vm858_vm1, %v5828_v40 }
  0x83   : > { %5421 = vmatmul.mubr.msk.bf16.gmra.mrb[48].mxu0 %vm858_vm1, %v5829_v42 }
  0x84   : > { %5424 = vmatprep.mubr.msk.bf16.mxu0 %vm858_vm1, %v5830_v43 }
  0x8b   : > { %5425 = vmatmul.mubr.msk.bf16.gmra.mrb[52].mxu0 %vm858_vm1, %v5831_v44  ;;  %v5871_v44 = vld [vmem:[%s6065_s17 + $0x1d8] sm:$0xff]  }
  0x8c   : > { %5428 = vmatprep.mubr.msk.bf16.mxu0 %vm858_vm1, %v5832_v45 }
  0x93   : > { %5429 = vmatmul.mubr.msk.bf16.gmra.mrb[56].mxu0 %vm858_vm1, %v5833_v46 }
  0x94   : > { %5432 = vmatprep.mubr.msk.bf16.mxu0 %vm858_vm1, %v5834_v47  ;;  %v5872_v47 = vld [vmem:[%s6065_s17 + $0x1e0] sm:$0xff]  }
  0x9b   : > { %5433 = vmatmul.mubr.msk.bf16.gmra.mrb[60].mxu0 %vm858_vm1, %v5835_v48 }
  0x9c   : > { %5436 = vmatprep.mubr.msk.bf16.mxu0 %vm858_vm1, %v5836_v49 }
  0xa3   : > { %5437 = vmatmul.mubr.msk.bf16.gmra.mrb[64].mxu0 %vm858_vm1, %v5837_v50 }
  0xa4   : > { %5440 = vmatprep.mubr.msk.bf16.mxu0 %vm858_vm1, %v5838_v51 }
  0xab   : > { %5441 = vmatmul.mubr.msk.bf16.gmra.mrb[68].mxu0 %vm858_vm1, %v5839_v52 }
  0xac   : > { %5444 = vmatprep.mubr.msk.bf16.mxu0 %vm858_vm1, %v5840_v53 }
  0xb3   : > { %5445 = vmatmul.mubr.msk.bf16.gmra.mrb[72].mxu0 %vm858_vm1, %v5841_v54 }
  0xb4   : > { %5448 = vmatprep.mubr.msk.bf16.mxu0 %vm858_vm1, %v5842_v55 }
  0xbb   : > { %5449 = vmatmul.mubr.msk.bf16.gmra.mrb[76].mxu0 %vm858_vm1, %v5843_v56 }
  0xbc   : > { %5452 = vmatprep.mubr.msk.bf16.mxu0 %vm858_vm1, %v5844_v57 }
  0xc3   : > { %5453 = vmatmul.mubr.msk.bf16.gmra.mrb[80].mxu0 %vm858_vm1, %v5845_v58 }
  0xc4   : > { %5456 = vmatprep.mubr.msk.bf16.mxu0 %vm858_vm1, %v5846_v59 }
  0xcb   : > { %5457 = vmatmul.mubr.msk.bf16.gmra.mrb[84].mxu0 %vm858_vm1, %v5847_v60  ;;  %v5873_v60 = vld [vmem:[%s6065_s17 + $0x1e8] sm:$0xff]  }
  0xcc   : > { %5460 = vmatprep.mubr.msk.bf16.mxu0 %vm858_vm1, %v5848_v61 }
  0xd3   : > { %5461 = vmatmul.mubr.msk.bf16.gmra.mrb[88].mxu0 %vm858_vm1, %v5849_v62 }
  0xd4   : > { %5464 = vmatprep.mubr.msk.bf16.mxu0 %vm858_vm1, %v5850_v63  ;;  %v5874_v63 = vld [vmem:[%s6065_s17 + $0x1f0] sm:$0xff]  }
  0xdb   : > { %5465 = vmatmul.mubr.msk.bf16.gmra.mrb[92].mxu0 %vm858_vm1, %v5851_v0 }
  0xdc   : > { %5468 = vmatprep.mubr.msk.bf16.mxu0 %vm858_vm1, %v5853_v1 }
  0xe3   : > { %5469 = vmatmul.mubr.msk.bf16.gmra.mrb[96].mxu0 %vm858_vm1, %v5854_v2 }
  0xe4   : > { %5472 = vmatprep.mubr.msk.bf16.mxu0 %vm858_vm1, %v5857_v3 }
  0xeb   : > { %5473 = vmatmul.mubr.msk.bf16.gmra.mrb[100].mxu0 %vm858_vm1, %v5858_v4 }
  0xec   : > { %5476 = vmatprep.mubr.msk.bf16.mxu0 %vm858_vm1, %v5861_v5 }
  0xf3   : > { %5477 = vmatmul.mubr.msk.bf16.gmra.mrb[104].mxu0 %vm858_vm1, %v5862_v6 }
  0xf4   : > { %5480 = vmatprep.mubr.msk.bf16.mxu0 %vm858_vm1, %v5865_v7 }
  0xf6   : > { %v5374_v9 = vpop.f32.mrb[0].mxu0 }
  0xf7   : > { %v1148_v10 = vadd.f32 %v5374_v9, %v6206_v8  ;;  %v1139_v11 = vpop.f32.mrb[1].mxu0 }
  0xf8   : > { %v1140_v13 = vadd.f32 %v6206_v8, %v1139_v11  ;;  %v5375_v14 = vpop.f32.mrb[2].mxu0 }
  0xf9   : > { %v1151_v16 = vadd.f32 %v5375_v14, %v6206_v8  ;;  %v1142_v17 = vpop.f32.mrb[3].mxu0  ;;  %v1780_v19 = vmax.f32 %v1148_v10, 0.0 }
  0xfa   : > { %v1143_v18 = vadd.f32 %v6206_v8, %v1142_v17  ;;  %v1778_v21 = vmax.f32 %v1140_v13, 0.0  ;;  %v5875_v13 = vld [vmem:[%s6065_s17 + $0x1f8] sm:$0xff]  }
  0xfb   : > { %v1781_v20 = vmax.f32 %v1151_v16, 0.0  ;;  %5481 = vmatmul.mubr.msk.bf16.gmra.mrb[108].mxu0 %vm858_vm1, %v5866_v12  ;;  %v5876_v16 = vld [vmem:[%s6065_s17 + $0x200] sm:$0xff]  }
  0xfc   : > { %v1779_v22 = vmax.f32 %v1143_v18, 0.0  ;;  %5484 = vmatprep.mubr.msk.bf16.mxu0 %vm858_vm1, %v5868_v15 }
  0xfd   : > { %v1939_v23 = vpack.c.bf16 %v1781_v20, %v1780_v19 }
  0xfe   : > { %v5378_v24 = vpop.f32.mrb[4].mxu0  ;;  %v1938_v25 = vpack.c.bf16 %v1779_v22, %v1778_v21 }
  0xff   : > { %v1164_v26 = vadd.f32 %v5378_v24, %v6206_v8  ;;  %v1155_v27 = vpop.f32.mrb[5].mxu0 }
 0x100   : > { %v1156_v29 = vadd.f32 %v6206_v8, %v1155_v27  ;;  %v5379_v30 = vpop.f32.mrb[6].mxu0  ;;  %5548 = vmatprep.mubr.bf16.mxu1 %v1938_v25 }
 0x101   : > { %v1167_v32 = vadd.f32 %v5379_v30, %v6206_v8  ;;  %v1158_v33 = vpop.f32.mrb[7].mxu0  ;;  %5549 = vmatmul.mubr.bf16.vlgmr.msra.gmra.mrb[0].mxu1 %v1939_v23  ;;  %v1784_v35 = vmax.f32 %v1164_v26, 0.0 }
 0x102   : > { %v1159_v34 = vadd.f32 %v6206_v8, %v1158_v33  ;;  %v1782_v37 = vmax.f32 %v1156_v29, 0.0  ;;  %v5877_v29 = vld [vmem:[%s6065_s17 + $0x208] sm:$0xff]  }
 0x103   : > { %v1785_v36 = vmax.f32 %v1167_v32, 0.0  ;;  %5485 = vmatmul.mubr.msk.bf16.gmra.mrb[112].mxu0 %vm858_vm1, %v5869_v28  ;;  %v5878_v32 = vld [vmem:[%s6065_s17 + $0x210] sm:$0xff]  }
 0x104   : > { %v1783_v38 = vmax.f32 %v1159_v34, 0.0  ;;  %5488 = vmatprep.mubr.msk.bf16.mxu0 %vm858_vm1, %v5870_v31 }
 0x105   : > { %v1941_v39 = vpack.c.bf16 %v1785_v36, %v1784_v35 }
 0x106   : > { %v1940_v40 = vpack.c.bf16 %v1783_v38, %v1782_v37  ;;  %v5382_v41 = vpop.f32.mrb[8].mxu0 }
 0x107   : > { %v1180_v42 = vadd.f32 %v5382_v41, %v6206_v8  ;;  %v1171_v43 = vpop.f32.mrb[9].mxu0 }
 0x108   : > { %v1172_v45 = vadd.f32 %v6206_v8, %v1171_v43  ;;  %v5383_v46 = vpop.f32.mrb[10].mxu0  ;;  %5552 = vmatprep.mubr.bf16.mxu1 %v1940_v40 }
 0x109   : > { %v1183_v48 = vadd.f32 %v5383_v46, %v6206_v8  ;;  %v1174_v49 = vpop.f32.mrb[11].mxu0  ;;  %5553 = vmatmul.mubr.bf16.gmra.mrb[4].mxu1 %v1941_v39  ;;  %v1788_v51 = vmax.f32 %v1180_v42, 0.0 }
 0x10a   : > { %v1175_v50 = vadd.f32 %v6206_v8, %v1174_v49  ;;  %v1786_v53 = vmax.f32 %v1172_v45, 0.0  ;;  %v5879_v45 = vld [vmem:[%s6065_s17 + $0x218] sm:$0xff]  }
 0x10b   : > { %v1789_v52 = vmax.f32 %v1183_v48, 0.0  ;;  %5489 = vmatmul.mubr.msk.bf16.gmra.mrb[116].mxu0 %vm858_vm1, %v5871_v44  ;;  %v5880_v48 = vld [vmem:[%s6065_s17 + $0x220] sm:$0xff]  }
 0x10c   : > { %v1787_v54 = vmax.f32 %v1175_v50, 0.0  ;;  %5492 = vmatprep.mubr.msk.bf16.mxu0 %vm858_vm1, %v5872_v47 }
 0x10d   : > { %v1943_v55 = vpack.c.bf16 %v1789_v52, %v1788_v51 }
 0x10e   : > { %v1942_v56 = vpack.c.bf16 %v1787_v54, %v1786_v53  ;;  %v5386_v57 = vpop.f32.mrb[12].mxu0 }
 0x10f   : > { %v1196_v58 = vadd.f32 %v5386_v57, %v6206_v8  ;;  %v1187_v59 = vpop.f32.mrb[13].mxu0 }
 0x110   : > { %v1188_v61 = vadd.f32 %v6206_v8, %v1187_v59  ;;  %v5387_v62 = vpop.f32.mrb[14].mxu0  ;;  %5556 = vmatprep.mubr.bf16.mxu1 %v1942_v56 }
 0x111   : > { %v1199_v0 = vadd.f32 %v5387_v62, %v6206_v8  ;;  %v1190_v1 = vpop.f32.mrb[15].mxu0  ;;  %5557 = vmatmul.mubr.bf16.gmra.mrb[8].mxu1 %v1943_v55  ;;  %v1792_v3 = vmax.f32 %v1196_v58, 0.0 }
 0x112   : > { %v1191_v2 = vadd.f32 %v6206_v8, %v1190_v1  ;;  %v1790_v5 = vmax.f32 %v1188_v61, 0.0  ;;  %v5881_v61 = vld [vmem:[%s6065_s17 + $0x228] sm:$0xff]  }
 0x113   : > { %v1793_v4 = vmax.f32 %v1199_v0, 0.0  ;;  %5493 = vmatmul.mubr.msk.bf16.gmra.mrb[120].mxu0 %vm858_vm1, %v5873_v60  ;;  %v5882_v0 = vld [vmem:[%s6065_s17 + $0x230] sm:$0xff]  }
 0x114   : > { %v1791_v6 = vmax.f32 %v1191_v2, 0.0  ;;  %5496 = vmatprep.mubr.msk.bf16.mxu0 %vm858_vm1, %v5874_v63 }
 0x115   : > { %v1945_v7 = vpack.c.bf16 %v1793_v4, %v1792_v3 }
 0x116   : > { %v1944_v9 = vpack.c.bf16 %v1791_v6, %v1790_v5  ;;  %v5390_v10 = vpop.f32.mrb[16].mxu0 }
 0x117   : > { %v1212_v11 = vadd.f32 %v5390_v10, %v6206_v8  ;;  %v1203_v12 = vpop.f32.mrb[17].mxu0 }
 0x118   : > { %v1204_v14 = vadd.f32 %v6206_v8, %v1203_v12  ;;  %v5391_v15 = vpop.f32.mrb[18].mxu0  ;;  %5560 = vmatprep.mubr.bf16.mxu1 %v1944_v9 }
 0x119   : > { %v1215_v17 = vadd.f32 %v5391_v15, %v6206_v8  ;;  %v1206_v18 = vpop.f32.mrb[19].mxu0  ;;  %5561 = vmatmul.mubr.bf16.gmra.mrb[12].mxu1 %v1945_v7  ;;  %v1796_v20 = vmax.f32 %v1212_v11, 0.0 }
 0x11a   : > { %v1207_v19 = vadd.f32 %v6206_v8, %v1206_v18  ;;  %v1794_v22 = vmax.f32 %v1204_v14, 0.0  ;;  %v5883_v14 = vld [vmem:[%s6065_s17 + $0x238] sm:$0xff]  }
 0x11b   : > { %v1797_v21 = vmax.f32 %v1215_v17, 0.0  ;;  %5497 = vmatmul.mubr.msk.bf16.gmra.mrb[124].mxu0 %vm858_vm1, %v5875_v13  ;;  %v5884_v17 = vld [vmem:[%s6065_s17 + $0x240] sm:$0xff]  }
 0x11c   : > { %v1795_v23 = vmax.f32 %v1207_v19, 0.0  ;;  %5500 = vmatprep.mubr.msk.bf16.mxu0 %vm858_vm1, %v5876_v16 }
 0x11d   : > { %v1947_v24 = vpack.c.bf16 %v1797_v21, %v1796_v20 }
 0x11e   : > { %v1946_v25 = vpack.c.bf16 %v1795_v23, %v1794_v22  ;;  %v5394_v26 = vpop.f32.mrb[20].mxu0 }
 0x11f   : > { %v1228_v27 = vadd.f32 %v5394_v26, %v6206_v8  ;;  %v1219_v28 = vpop.f32.mrb[21].mxu0 }
 0x120   : > { %v1220_v30 = vadd.f32 %v6206_v8, %v1219_v28  ;;  %v5395_v31 = vpop.f32.mrb[22].mxu0  ;;  %5564 = vmatprep.mubr.bf16.mxu1 %v1946_v25 }
 0x121   : > { %v1231_v33 = vadd.f32 %v5395_v31, %v6206_v8  ;;  %v1222_v34 = vpop.f32.mrb[23].mxu0  ;;  %5565 = vmatmul.mubr.bf16.gmra.mrb[16].mxu1 %v1947_v24  ;;  %v1800_v36 = vmax.f32 %v1228_v27, 0.0 }
 0x122   : > { %v1223_v35 = vadd.f32 %v6206_v8, %v1222_v34  ;;  %v1798_v38 = vmax.f32 %v1220_v30, 0.0  ;;  %v5885_v30 = vld [vmem:[%s6065_s17 + $0x248] sm:$0xff]  }
 0x123   : > { %v1801_v37 = vmax.f32 %v1231_v33, 0.0  ;;  %5501 = vmatmul.mubr.msk.bf16.gmra.mrb[128].mxu0 %vm858_vm1, %v5877_v29  ;;  %v5886_v33 = vld [vmem:[%s6065_s17 + $0x250] sm:$0xff]  }
 0x124   : > { %v1799_v39 = vmax.f32 %v1223_v35, 0.0  ;;  %5504 = vmatprep.mubr.msk.bf16.mxu0 %vm858_vm1, %v5878_v32 }
 0x125   : > { %v1949_v40 = vpack.c.bf16 %v1801_v37, %v1800_v36 }
 0x126   : > { %v1948_v41 = vpack.c.bf16 %v1799_v39, %v1798_v38  ;;  %v5398_v42 = vpop.f32.mrb[24].mxu0 }
 0x127   : > { %v1244_v43 = vadd.f32 %v5398_v42, %v6206_v8  ;;  %v1235_v44 = vpop.f32.mrb[25].mxu0 }
 0x128   : > { %v1236_v46 = vadd.f32 %v6206_v8, %v1235_v44  ;;  %v5399_v47 = vpop.f32.mrb[26].mxu0  ;;  %5568 = vmatprep.mubr.bf16.mxu1 %v1948_v41 }
 0x129   : > { %v1247_v49 = vadd.f32 %v5399_v47, %v6206_v8  ;;  %v1238_v50 = vpop.f32.mrb[27].mxu0  ;;  %5569 = vmatmul.mubr.bf16.gmra.mrb[20].mxu1 %v1949_v40  ;;  %v1804_v52 = vmax.f32 %v1244_v43, 0.0 }
 0x12a   : > { %v1239_v51 = vadd.f32 %v6206_v8, %v1238_v50  ;;  %v1802_v54 = vmax.f32 %v1236_v46, 0.0  ;;  %v5887_v46 = vld [vmem:[%s6065_s17 + $0x258] sm:$0xff]  }
 0x12b   : > { %v1805_v53 = vmax.f32 %v1247_v49, 0.0  ;;  %5505 = vmatmul.mubr.msk.bf16.gmra.mrb[132].mxu0 %vm858_vm1, %v5879_v45  ;;  %v5888_v49 = vld [vmem:[%s6065_s17 + $0x260] sm:$0xff]  }
 0x12c   : > { %v1803_v55 = vmax.f32 %v1239_v51, 0.0  ;;  %5508 = vmatprep.mubr.msk.bf16.mxu0 %vm858_vm1, %v5880_v48 }
 0x12d   : > { %v1951_v56 = vpack.c.bf16 %v1805_v53, %v1804_v52 }
 0x12e   : > { %v1950_v57 = vpack.c.bf16 %v1803_v55, %v1802_v54  ;;  %v5402_v58 = vpop.f32.mrb[28].mxu0 }
 0x12f   : > { %v1260_v59 = vadd.f32 %v5402_v58, %v6206_v8  ;;  %v1251_v60 = vpop.f32.mrb[29].mxu0 }
 0x130   : > { %v1252_v62 = vadd.f32 %v6206_v8, %v1251_v60  ;;  %v5403_v63 = vpop.f32.mrb[30].mxu0  ;;  %5572 = vmatprep.mubr.bf16.mxu1 %v1950_v57 }
 0x131   : > { %v1263_v1 = vadd.f32 %v5403_v63, %v6206_v8  ;;  %v1254_v2 = vpop.f32.mrb[31].mxu0  ;;  %5573 = vmatmul.mubr.bf16.gmra.mrb[24].mxu1 %v1951_v56  ;;  %v1808_v4 = vmax.f32 %v1260_v59, 0.0 }
 0x132   : > { %v1255_v3 = vadd.f32 %v6206_v8, %v1254_v2  ;;  %v1806_v6 = vmax.f32 %v1252_v62, 0.0  ;;  %v5889_v62 = vld [vmem:[%s6065_s17 + $0x268] sm:$0xff]  }
 0x133   : > { %v1809_v5 = vmax.f32 %v1263_v1, 0.0  ;;  %5509 = vmatmul.mubr.msk.bf16.gmra.mrb[136].mxu0 %vm858_vm1, %v5881_v61  ;;  %v5890_v1 = vld [vmem:[%s6065_s17 + $0x270] sm:$0xff]  }
 0x134   : > { %v1807_v7 = vmax.f32 %v1255_v3, 0.0  ;;  %5512 = vmatprep.mubr.msk.bf16.mxu0 %vm858_vm1, %v5882_v0 }
 0x135   : > { %v1953_v9 = vpack.c.bf16 %v1809_v5, %v1808_v4 }
 0x136   : > { %v1952_v10 = vpack.c.bf16 %v1807_v7, %v1806_v6  ;;  %v5406_v11 = vpop.f32.mrb[32].mxu0 }
 0x137   : > { %v1276_v12 = vadd.f32 %v5406_v11, %v6206_v8  ;;  %v1267_v13 = vpop.f32.mrb[33].mxu0 }
 0x138   : > { %v1268_v15 = vadd.f32 %v6206_v8, %v1267_v13  ;;  %v5407_v16 = vpop.f32.mrb[34].mxu0  ;;  %5576 = vmatprep.mubr.bf16.mxu1 %v1952_v10 }
 0x139   : > { %v1279_v18 = vadd.f32 %v5407_v16, %v6206_v8  ;;  %v1270_v19 = vpop.f32.mrb[35].mxu0  ;;  %5577 = vmatmul.mubr.bf16.gmra.mrb[28].mxu1 %v1953_v9  ;;  %v1812_v21 = vmax.f32 %v1276_v12, 0.0 }
 0x13a   : > { %v1271_v20 = vadd.f32 %v6206_v8, %v1270_v19  ;;  %v1810_v23 = vmax.f32 %v1268_v15, 0.0  ;;  %v5891_v15 = vld [vmem:[%s6065_s17 + $0x278] sm:$0xff]  }
 0x13b   : > { %v1813_v22 = vmax.f32 %v1279_v18, 0.0  ;;  %5513 = vmatmul.mubr.msk.bf16.gmra.mrb[140].mxu0 %vm858_vm1, %v5883_v14 }
 0x13c   : > { %v1811_v24 = vmax.f32 %v1271_v20, 0.0  ;;  %5516 = vmatprep.mubr.msk.bf16.mxu0 %vm858_vm1, %v5884_v17 }
 0x13d   : > { %v1955_v25 = vpack.c.bf16 %v1813_v22, %v1812_v21 }
 0x13e   : > { %v1954_v26 = vpack.c.bf16 %v1811_v24, %v1810_v23  ;;  %v5410_v27 = vpop.f32.mrb[36].mxu0 }
 0x13f   : > { %v1292_v28 = vadd.f32 %v5410_v27, %v6206_v8  ;;  %v1283_v29 = vpop.f32.mrb[37].mxu0 }
 0x140   : > { %v1284_v31 = vadd.f32 %v6206_v8, %v1283_v29  ;;  %v5411_v32 = vpop.f32.mrb[38].mxu0  ;;  %5580 = vmatprep.mubr.bf16.mxu1 %v1954_v26 }
 0x141   : > { %v1295_v34 = vadd.f32 %v5411_v32, %v6206_v8  ;;  %v1286_v35 = vpop.f32.mrb[39].mxu0  ;;  %5581 = vmatmul.mubr.bf16.gmra.mrb[32].mxu1 %v1955_v25  ;;  %v1816_v37 = vmax.f32 %v1292_v28, 0.0 }
 0x142   : > { %v1287_v36 = vadd.f32 %v6206_v8, %v1286_v35  ;;  %v1814_v39 = vmax.f32 %v1284_v31, 0.0 }
 0x143   : > { %v1817_v38 = vmax.f32 %v1295_v34, 0.0  ;;  %5517 = vmatmul.mubr.msk.bf16.gmra.mrb[144].mxu0 %vm858_vm1, %v5885_v30 }
 0x144   : > { %v1815_v40 = vmax.f32 %v1287_v36, 0.0  ;;  %5520 = vmatprep.mubr.msk.bf16.mxu0 %vm858_vm1, %v5886_v33 }
 0x145   : > { %v1957_v41 = vpack.c.bf16 %v1817_v38, %v1816_v37 }
 0x146   : > { %v1956_v42 = vpack.c.bf16 %v1815_v40, %v1814_v39  ;;  %v5414_v43 = vpop.f32.mrb[40].mxu0 }
 0x147   : > { %v1308_v44 = vadd.f32 %v5414_v43, %v6206_v8  ;;  %v1299_v45 = vpop.f32.mrb[41].mxu0 }
 0x148   : > { %v1300_v47 = vadd.f32 %v6206_v8, %v1299_v45  ;;  %v5415_v48 = vpop.f32.mrb[42].mxu0  ;;  %5584 = vmatprep.mubr.bf16.mxu1 %v1956_v42 }
 0x149   : > { %v1311_v50 = vadd.f32 %v5415_v48, %v6206_v8  ;;  %v1302_v51 = vpop.f32.mrb[43].mxu0  ;;  %5585 = vmatmul.mubr.bf16.gmra.mrb[36].mxu1 %v1957_v41  ;;  %v1820_v53 = vmax.f32 %v1308_v44, 0.0 }
 0x14a   : > { %v1303_v52 = vadd.f32 %v6206_v8, %v1302_v51  ;;  %v1818_v55 = vmax.f32 %v1300_v47, 0.0 }
 0x14b   : > { %v1821_v54 = vmax.f32 %v1311_v50, 0.0  ;;  %5521 = vmatmul.mubr.msk.bf16.gmra.mrb[148].mxu0 %vm858_vm1, %v5887_v46 }
 0x14c   : > { %v1819_v56 = vmax.f32 %v1303_v52, 0.0  ;;  %5524 = vmatprep.mubr.msk.bf16.mxu0 %vm858_vm1, %v5888_v49 }
 0x14d   : > { %v1959_v57 = vpack.c.bf16 %v1821_v54, %v1820_v53 }
 0x14e   : > { %v1958_v58 = vpack.c.bf16 %v1819_v56, %v1818_v55  ;;  %v5418_v59 = vpop.f32.mrb[44].mxu0 }
 0x14f   : > { %v1324_v60 = vadd.f32 %v5418_v59, %v6206_v8  ;;  %v1315_v61 = vpop.f32.mrb[45].mxu0 }
 0x150   : > { %v1316_v63 = vadd.f32 %v6206_v8, %v1315_v61  ;;  %v5419_v0 = vpop.f32.mrb[46].mxu0  ;;  %5588 = vmatprep.mubr.bf16.mxu1 %v1958_v58 }
 0x151   : > { %v1327_v2 = vadd.f32 %v5419_v0, %v6206_v8  ;;  %v1318_v3 = vpop.f32.mrb[47].mxu0  ;;  %5589 = vmatmul.mubr.bf16.gmra.mrb[40].mxu1 %v1959_v57  ;;  %v1824_v5 = vmax.f32 %v1324_v60, 0.0 }
 0x152   : > { %v1319_v4 = vadd.f32 %v6206_v8, %v1318_v3  ;;  %v1822_v7 = vmax.f32 %v1316_v63, 0.0 }
 0x153   : > { %v1825_v6 = vmax.f32 %v1327_v2, 0.0  ;;  %5525 = vmatmul.mubr.msk.bf16.gmra.mrb[152].mxu0 %vm858_vm1, %v5889_v62 }
 0x154   : > { %v1823_v9 = vmax.f32 %v1319_v4, 0.0  ;;  %5528 = vmatprep.mubr.msk.bf16.mxu0 %vm858_vm1, %v5890_v1 }
 0x155   : > { %v1961_v10 = vpack.c.bf16 %v1825_v6, %v1824_v5 }
 0x156   : > { %v1960_v11 = vpack.c.bf16 %v1823_v9, %v1822_v7  ;;  %v5422_v12 = vpop.f32.mrb[48].mxu0 }
 0x157   : > { %v1340_v13 = vadd.f32 %v5422_v12, %v6206_v8  ;;  %v1331_v14 = vpop.f32.mrb[49].mxu0 }
 0x158   : > { %v1332_v16 = vadd.f32 %v6206_v8, %v1331_v14  ;;  %v5423_v17 = vpop.f32.mrb[50].mxu0  ;;  %5592 = vmatprep.mubr.bf16.mxu1 %v1960_v11 }
 0x159   : > { %v1343_v18 = vadd.f32 %v5423_v17, %v6206_v8  ;;  %v1334_v19 = vpop.f32.mrb[51].mxu0  ;;  %5593 = vmatmul.mubr.bf16.gmra.mrb[44].mxu1 %v1961_v10  ;;  %v1828_v21 = vmax.f32 %v1340_v13, 0.0 }
 0x15a   : > { %v1335_v20 = vadd.f32 %v6206_v8, %v1334_v19  ;;  %v1826_v23 = vmax.f32 %v1332_v16, 0.0 }
 0x15b   : > { %v1829_v22 = vmax.f32 %v1343_v18, 0.0  ;;  %5529 = vmatmul.mubr.msk.bf16.gmra.mrb[156].mxu0 %vm858_vm1, %v5891_v15 }
 0x15c   : > { %v1827_v24 = vmax.f32 %v1335_v20, 0.0 }
 0x15d   : > { %v1963_v25 = vpack.c.bf16 %v1829_v22, %v1828_v21 }
 0x15e   : > { %v1962_v26 = vpack.c.bf16 %v1827_v24, %v1826_v23  ;;  %v5426_v27 = vpop.f32.mrb[52].mxu0 }
 0x15f   : > { %v1356_v28 = vadd.f32 %v5426_v27, %v6206_v8  ;;  %v1347_v29 = vpop.f32.mrb[53].mxu0 }
 0x160   : > { %v1348_v30 = vadd.f32 %v6206_v8, %v1347_v29  ;;  %v5427_v31 = vpop.f32.mrb[54].mxu0  ;;  %5596 = vmatprep.mubr.bf16.mxu1 %v1962_v26 }
 0x161   : > { %v1359_v32 = vadd.f32 %v5427_v31, %v6206_v8  ;;  %v1350_v33 = vpop.f32.mrb[55].mxu0  ;;  %5597 = vmatmul.mubr.bf16.gmra.mrb[48].mxu1 %v1963_v25  ;;  %v1832_v35 = vmax.f32 %v1356_v28, 0.0 }
 0x162   : > { %v1351_v34 = vadd.f32 %v6206_v8, %v1350_v33  ;;  %v1830_v37 = vmax.f32 %v1348_v30, 0.0 }
 0x163   : > { %v1833_v36 = vmax.f32 %v1359_v32, 0.0 }
 0x164   : > { %v1831_v38 = vmax.f32 %v1351_v34, 0.0 }
 0x165   : > { %v1965_v39 = vpack.c.bf16 %v1833_v36, %v1832_v35 }
 0x166   : > { %v1964_v40 = vpack.c.bf16 %v1831_v38, %v1830_v37  ;;  %v5430_v41 = vpop.f32.mrb[56].mxu0 }
 0x167   : > { %v1372_v42 = vadd.f32 %v5430_v41, %v6206_v8  ;;  %v1363_v43 = vpop.f32.mrb[57].mxu0 }
 0x168   : > { %v1364_v44 = vadd.f32 %v6206_v8, %v1363_v43  ;;  %v5431_v45 = vpop.f32.mrb[58].mxu0  ;;  %5600 = vmatprep.mubr.bf16.mxu1 %v1964_v40 }
 0x169   : > { %v1375_v46 = vadd.f32 %v5431_v45, %v6206_v8  ;;  %v1366_v47 = vpop.f32.mrb[59].mxu0  ;;  %5601 = vmatmul.mubr.bf16.gmra.mrb[52].mxu1 %v1965_v39  ;;  %v1836_v49 = vmax.f32 %v1372_v42, 0.0 }
 0x16a   : > { %v1367_v48 = vadd.f32 %v6206_v8, %v1366_v47  ;;  %v1834_v51 = vmax.f32 %v1364_v44, 0.0 }
 0x16b   : > { %v1837_v50 = vmax.f32 %v1375_v46, 0.0 }
 0x16c   : > { %v1835_v52 = vmax.f32 %v1367_v48, 0.0 }
 0x16d   : > { %v1967_v53 = vpack.c.bf16 %v1837_v50, %v1836_v49 }
 0x16e   : > { %v1966_v54 = vpack.c.bf16 %v1835_v52, %v1834_v51  ;;  %v5434_v55 = vpop.f32.mrb[60].mxu0 }
 0x16f   : > { %v1388_v56 = vadd.f32 %v5434_v55, %v6206_v8  ;;  %v1379_v57 = vpop.f32.mrb[61].mxu0 }
 0x170   : > { %v1380_v58 = vadd.f32 %v6206_v8, %v1379_v57  ;;  %v5435_v59 = vpop.f32.mrb[62].mxu0  ;;  %5604 = vmatprep.mubr.bf16.mxu1 %v1966_v54 }
 0x171   : > { %v1391_v60 = vadd.f32 %v5435_v59, %v6206_v8  ;;  %v1382_v61 = vpop.f32.mrb[63].mxu0  ;;  %5605 = vmatmul.mubr.bf16.gmra.mrb[56].mxu1 %v1967_v53  ;;  %v1840_v63 = vmax.f32 %v1388_v56, 0.0 }
 0x172   : > { %v1383_v62 = vadd.f32 %v6206_v8, %v1382_v61  ;;  %v1838_v1 = vmax.f32 %v1380_v58, 0.0 }
 0x173   : > { %v1841_v0 = vmax.f32 %v1391_v60, 0.0 }
 0x174   : > { %v1839_v2 = vmax.f32 %v1383_v62, 0.0 }
 0x175   : > { %v1969_v3 = vpack.c.bf16 %v1841_v0, %v1840_v63 }
 0x176   : > { %v1968_v4 = vpack.c.bf16 %v1839_v2, %v1838_v1  ;;  %v5438_v5 = vpop.f32.mrb[64].mxu0 }
 0x177   : > { %v1404_v6 = vadd.f32 %v5438_v5, %v6206_v8  ;;  %v1395_v7 = vpop.f32.mrb[65].mxu0 }
 0x178   : > { %v1396_v9 = vadd.f32 %v6206_v8, %v1395_v7  ;;  %v5439_v10 = vpop.f32.mrb[66].mxu0  ;;  %5608 = vmatprep.mubr.bf16.mxu1 %v1968_v4 }
 0x179   : > { %v1407_v11 = vadd.f32 %v5439_v10, %v6206_v8  ;;  %v1398_v12 = vpop.f32.mrb[67].mxu0  ;;  %5609 = vmatmul.mubr.bf16.gmra.mrb[60].mxu1 %v1969_v3  ;;  %v1844_v14 = vmax.f32 %v1404_v6, 0.0 }
 0x17a   : > { %v1399_v13 = vadd.f32 %v6206_v8, %v1398_v12  ;;  %v1842_v16 = vmax.f32 %v1396_v9, 0.0 }
 0x17b   : > { %v1845_v15 = vmax.f32 %v1407_v11, 0.0 }
 0x17c   : > { %v1843_v17 = vmax.f32 %v1399_v13, 0.0 }
 0x17d   : > { %v1971_v18 = vpack.c.bf16 %v1845_v15, %v1844_v14 }
 0x17e   : > { %v1970_v19 = vpack.c.bf16 %v1843_v17, %v1842_v16  ;;  %v5442_v20 = vpop.f32.mrb[68].mxu0 }
 0x17f   : > { %v1420_v21 = vadd.f32 %v5442_v20, %v6206_v8  ;;  %v1411_v22 = vpop.f32.mrb[69].mxu0 }
 0x180   : > { %v1412_v23 = vadd.f32 %v6206_v8, %v1411_v22  ;;  %v5443_v24 = vpop.f32.mrb[70].mxu0  ;;  %5612 = vmatprep.mubr.bf16.mxu1 %v1970_v19 }
 0x181   : > { %v1423_v25 = vadd.f32 %v5443_v24, %v6206_v8  ;;  %v1414_v26 = vpop.f32.mrb[71].mxu0  ;;  %5613 = vmatmul.mubr.bf16.gmra.mrb[64].mxu1 %v1971_v18  ;;  %v1848_v28 = vmax.f32 %v1420_v21, 0.0 }
 0x182   : > { %v1415_v27 = vadd.f32 %v6206_v8, %v1414_v26  ;;  %v1846_v30 = vmax.f32 %v1412_v23, 0.0 }
 0x183   : > { %v1849_v29 = vmax.f32 %v1423_v25, 0.0 }
 0x184   : > { %v1847_v31 = vmax.f32 %v1415_v27, 0.0 }
 0x185   : > { %v1973_v32 = vpack.c.bf16 %v1849_v29, %v1848_v28 }
 0x186   : > { %v1972_v33 = vpack.c.bf16 %v1847_v31, %v1846_v30  ;;  %v5446_v34 = vpop.f32.mrb[72].mxu0 }
 0x187   : > { %v1436_v35 = vadd.f32 %v5446_v34, %v6206_v8  ;;  %v1427_v36 = vpop.f32.mrb[73].mxu0 }
 0x188   : > { %v1428_v37 = vadd.f32 %v6206_v8, %v1427_v36  ;;  %v5447_v38 = vpop.f32.mrb[74].mxu0  ;;  %5616 = vmatprep.mubr.bf16.mxu1 %v1972_v33 }
 0x189   : > { %v1439_v39 = vadd.f32 %v5447_v38, %v6206_v8  ;;  %v1430_v40 = vpop.f32.mrb[75].mxu0  ;;  %5617 = vmatmul.mubr.bf16.gmra.mrb[68].mxu1 %v1973_v32  ;;  %v1852_v42 = vmax.f32 %v1436_v35, 0.0 }
 0x18a   : > { %v1431_v41 = vadd.f32 %v6206_v8, %v1430_v40  ;;  %v1850_v44 = vmax.f32 %v1428_v37, 0.0 }
 0x18b   : > { %v1853_v43 = vmax.f32 %v1439_v39, 0.0 }
 0x18c   : > { %v1851_v45 = vmax.f32 %v1431_v41, 0.0 }
 0x18d   : > { %v1975_v46 = vpack.c.bf16 %v1853_v43, %v1852_v42 }
 0x18e   : > { %v1974_v47 = vpack.c.bf16 %v1851_v45, %v1850_v44  ;;  %v5450_v48 = vpop.f32.mrb[76].mxu0 }
 0x18f   : > { %v1452_v49 = vadd.f32 %v5450_v48, %v6206_v8  ;;  %v1443_v50 = vpop.f32.mrb[77].mxu0 }
 0x190   : > { %v1444_v51 = vadd.f32 %v6206_v8, %v1443_v50  ;;  %v5451_v52 = vpop.f32.mrb[78].mxu0  ;;  %5620 = vmatprep.mubr.bf16.mxu1 %v1974_v47 }
 0x191   : > { %v1455_v53 = vadd.f32 %v5451_v52, %v6206_v8  ;;  %v1446_v54 = vpop.f32.mrb[79].mxu0  ;;  %5621 = vmatmul.mubr.bf16.gmra.mrb[72].mxu1 %v1975_v46  ;;  %v1856_v56 = vmax.f32 %v1452_v49, 0.0 }
 0x192   : > { %v1447_v55 = vadd.f32 %v6206_v8, %v1446_v54  ;;  %v1854_v58 = vmax.f32 %v1444_v51, 0.0 }
 0x193   : > { %v1857_v57 = vmax.f32 %v1455_v53, 0.0 }
 0x194   : > { %v1855_v59 = vmax.f32 %v1447_v55, 0.0 }
 0x195   : > { %v1977_v60 = vpack.c.bf16 %v1857_v57, %v1856_v56 }
 0x196   : > { %v1976_v61 = vpack.c.bf16 %v1855_v59, %v1854_v58  ;;  %v5454_v62 = vpop.f32.mrb[80].mxu0 }
 0x197   : > { %v1468_v63 = vadd.f32 %v5454_v62, %v6206_v8  ;;  %v1459_v0 = vpop.f32.mrb[81].mxu0 }
 0x198   : > { %v1460_v1 = vadd.f32 %v6206_v8, %v1459_v0  ;;  %v5455_v2 = vpop.f32.mrb[82].mxu0  ;;  %5624 = vmatprep.mubr.bf16.mxu1 %v1976_v61 }
 0x199   : > { %v1471_v3 = vadd.f32 %v5455_v2, %v6206_v8  ;;  %v1462_v4 = vpop.f32.mrb[83].mxu0  ;;  %5625 = vmatmul.mubr.bf16.gmra.mrb[76].mxu1 %v1977_v60  ;;  %v1860_v6 = vmax.f32 %v1468_v63, 0.0 }
 0x19a   : > { %v1463_v5 = vadd.f32 %v6206_v8, %v1462_v4  ;;  %v1858_v9 = vmax.f32 %v1460_v1, 0.0 }
 0x19b   : > { %v1861_v7 = vmax.f32 %v1471_v3, 0.0 }
 0x19c   : > { %v1859_v10 = vmax.f32 %v1463_v5, 0.0 }
 0x19d   : > { %v1979_v11 = vpack.c.bf16 %v1861_v7, %v1860_v6 }
 0x19e   : > { %v1978_v12 = vpack.c.bf16 %v1859_v10, %v1858_v9  ;;  %v5458_v13 = vpop.f32.mrb[84].mxu0 }
 0x19f   : > { %v1484_v14 = vadd.f32 %v5458_v13, %v6206_v8  ;;  %v1475_v15 = vpop.f32.mrb[85].mxu0 }
 0x1a0   : > { %v1476_v16 = vadd.f32 %v6206_v8, %v1475_v15  ;;  %v5459_v17 = vpop.f32.mrb[86].mxu0  ;;  %5628 = vmatprep.mubr.bf16.mxu1 %v1978_v12 }
 0x1a1   : > { %v1487_v18 = vadd.f32 %v5459_v17, %v6206_v8  ;;  %v1478_v19 = vpop.f32.mrb[87].mxu0  ;;  %5629 = vmatmul.mubr.bf16.gmra.mrb[80].mxu1 %v1979_v11  ;;  %v1864_v21 = vmax.f32 %v1484_v14, 0.0 }
 0x1a2   : > { %v1479_v20 = vadd.f32 %v6206_v8, %v1478_v19  ;;  %v1862_v23 = vmax.f32 %v1476_v16, 0.0 }
 0x1a3   : > { %v1865_v22 = vmax.f32 %v1487_v18, 0.0 }
 0x1a4   : > { %v1863_v24 = vmax.f32 %v1479_v20, 0.0 }
 0x1a5   : > { %v1981_v25 = vpack.c.bf16 %v1865_v22, %v1864_v21 }
 0x1a6   : > { %v1980_v26 = vpack.c.bf16 %v1863_v24, %v1862_v23  ;;  %v5462_v27 = vpop.f32.mrb[88].mxu0 }
 0x1a7   : > { %v1500_v28 = vadd.f32 %v5462_v27, %v6206_v8  ;;  %v1491_v29 = vpop.f32.mrb[89].mxu0 }
 0x1a8   : > { %v1492_v30 = vadd.f32 %v6206_v8, %v1491_v29  ;;  %v5463_v31 = vpop.f32.mrb[90].mxu0  ;;  %5632 = vmatprep.mubr.bf16.mxu1 %v1980_v26 }
 0x1a9   : > { %v1503_v32 = vadd.f32 %v5463_v31, %v6206_v8  ;;  %v1494_v33 = vpop.f32.mrb[91].mxu0  ;;  %5633 = vmatmul.mubr.bf16.gmra.mrb[84].mxu1 %v1981_v25  ;;  %v1868_v35 = vmax.f32 %v1500_v28, 0.0 }
 0x1aa   : > { %v1495_v34 = vadd.f32 %v6206_v8, %v1494_v33  ;;  %v1866_v37 = vmax.f32 %v1492_v30, 0.0 }
 0x1ab   : > { %v1869_v36 = vmax.f32 %v1503_v32, 0.0 }
 0x1ac   : > { %v1867_v38 = vmax.f32 %v1495_v34, 0.0 }
 0x1ad   : > { %v1983_v39 = vpack.c.bf16 %v1869_v36, %v1868_v35 }
 0x1ae   : > { %v1982_v40 = vpack.c.bf16 %v1867_v38, %v1866_v37  ;;  %v5466_v41 = vpop.f32.mrb[92].mxu0 }
 0x1af   : > { %v1516_v42 = vadd.f32 %v5466_v41, %v6206_v8  ;;  %v1507_v43 = vpop.f32.mrb[93].mxu0 }
 0x1b0   : > { %v1508_v44 = vadd.f32 %v6206_v8, %v1507_v43  ;;  %v5467_v45 = vpop.f32.mrb[94].mxu0  ;;  %5636 = vmatprep.mubr.bf16.mxu1 %v1982_v40 }
 0x1b1   : > { %v1519_v46 = vadd.f32 %v5467_v45, %v6206_v8  ;;  %v1510_v47 = vpop.f32.mrb[95].mxu0  ;;  %5637 = vmatmul.mubr.bf16.gmra.mrb[88].mxu1 %v1983_v39  ;;  %v1872_v49 = vmax.f32 %v1516_v42, 0.0  ;;  %v6374_v42 = vld [vmem:[%s6880_s4] ss:$0 sm:$0xff] }
 0x1b2   : > { %v1511_v48 = vadd.f32 %v6206_v8, %v1510_v47  ;;  %v1870_v51 = vmax.f32 %v1508_v44, 0.0 }
 0x1b3   : > { %v1873_v50 = vmax.f32 %v1519_v46, 0.0 }
 0x1b4   : > { %v1871_v52 = vmax.f32 %v1511_v48, 0.0 }
 0x1b5   : > { %v1985_v53 = vpack.c.bf16 %v1873_v50, %v1872_v49 }
 0x1b6   : > { %v1984_v54 = vpack.c.bf16 %v1871_v52, %v1870_v51  ;;  %v5470_v55 = vpop.f32.mrb[96].mxu0 }
 0x1b7   : > { %v1532_v56 = vadd.f32 %v5470_v55, %v6206_v8  ;;  %v1523_v57 = vpop.f32.mrb[97].mxu0 }
 0x1b8   : > { %v1524_v58 = vadd.f32 %v6206_v8, %v1523_v57  ;;  %v5471_v59 = vpop.f32.mrb[98].mxu0  ;;  %5640 = vmatprep.mubr.bf16.mxu1 %v1984_v54 }
 0x1b9   : > { %v1535_v60 = vadd.f32 %v5471_v59, %v6206_v8  ;;  %v1526_v61 = vpop.f32.mrb[99].mxu0  ;;  %5641 = vmatmul.mubr.bf16.gmra.mrb[92].mxu1 %v1985_v53  ;;  %v1876_v63 = vmax.f32 %v1532_v56, 0.0 }
 0x1ba   : > { %v1527_v62 = vadd.f32 %v6206_v8, %v1526_v61  ;;  %v1874_v1 = vmax.f32 %v1524_v58, 0.0 }
 0x1bb   : > { %v1877_v0 = vmax.f32 %v1535_v60, 0.0 }
 0x1bc   : > { %v1875_v2 = vmax.f32 %v1527_v62, 0.0 }
 0x1bd   : > { %v1987_v3 = vpack.c.bf16 %v1877_v0, %v1876_v63  ;;  %v6386_v0 = vld [vmem:[%s6878_s2] ss:$0 sm:$0xff] }
 0x1be   : > { %v1986_v4 = vpack.c.bf16 %v1875_v2, %v1874_v1  ;;  %v5474_v5 = vpop.f32.mrb[100].mxu0 }
 0x1bf   : > { %v1548_v6 = vadd.f32 %v5474_v5, %v6206_v8  ;;  %v1539_v7 = vpop.f32.mrb[101].mxu0 }
 0x1c0   : > { %v1540_v9 = vadd.f32 %v6206_v8, %v1539_v7  ;;  %v5475_v10 = vpop.f32.mrb[102].mxu0  ;;  %5644 = vmatprep.mubr.bf16.mxu1 %v1986_v4 }
 0x1c1   : > { %v1551_v11 = vadd.f32 %v5475_v10, %v6206_v8  ;;  %v1542_v12 = vpop.f32.mrb[103].mxu0  ;;  %5645 = vmatmul.mubr.bf16.gmra.mrb[96].mxu1 %v1987_v3  ;;  %v1880_v14 = vmax.f32 %v1548_v6, 0.0 }
 0x1c2   : > { %v1543_v13 = vadd.f32 %v6206_v8, %v1542_v12  ;;  %v1878_v16 = vmax.f32 %v1540_v9, 0.0 }
 0x1c3   : > { %v1881_v15 = vmax.f32 %v1551_v11, 0.0 }
 0x1c4   : > { %v1879_v17 = vmax.f32 %v1543_v13, 0.0 }
 0x1c5   : > { %v1989_v18 = vpack.c.bf16 %v1881_v15, %v1880_v14 }
 0x1c6   : > { %v1988_v19 = vpack.c.bf16 %v1879_v17, %v1878_v16  ;;  %v5478_v20 = vpop.f32.mrb[104].mxu0 }
 0x1c7   : > { %v1564_v21 = vadd.f32 %v5478_v20, %v6206_v8  ;;  %v1555_v22 = vpop.f32.mrb[105].mxu0 }
 0x1c8   : > { %v1556_v23 = vadd.f32 %v6206_v8, %v1555_v22  ;;  %v5479_v24 = vpop.f32.mrb[106].mxu0  ;;  %5648 = vmatprep.mubr.bf16.mxu1 %v1988_v19 }
 0x1c9   : > { %v1567_v25 = vadd.f32 %v5479_v24, %v6206_v8  ;;  %v1558_v26 = vpop.f32.mrb[107].mxu0  ;;  %5649 = vmatmul.mubr.bf16.gmra.mrb[100].mxu1 %v1989_v18  ;;  %v1884_v28 = vmax.f32 %v1564_v21, 0.0 }
 0x1ca   : > { %v1559_v27 = vadd.f32 %v6206_v8, %v1558_v26  ;;  %v1882_v30 = vmax.f32 %v1556_v23, 0.0 }
 0x1cb   : > { %v1885_v29 = vmax.f32 %v1567_v25, 0.0 }
 0x1cc   : > { %v1883_v31 = vmax.f32 %v1559_v27, 0.0 }
 0x1cd   : > { %v1991_v32 = vpack.c.bf16 %v1885_v29, %v1884_v28 }
 0x1ce   : > { %v1990_v33 = vpack.c.bf16 %v1883_v31, %v1882_v30  ;;  %v5482_v34 = vpop.f32.mrb[108].mxu0 }
 0x1cf   : > { %v1580_v35 = vadd.f32 %v5482_v34, %v6206_v8  ;;  %v1571_v36 = vpop.f32.mrb[109].mxu0 }
 0x1d0   : > { %v1572_v37 = vadd.f32 %v6206_v8, %v1571_v36  ;;  %v5483_v38 = vpop.f32.mrb[110].mxu0  ;;  %5652 = vmatprep.mubr.bf16.mxu1 %v1990_v33 }
 0x1d1   : > { %v1583_v39 = vadd.f32 %v5483_v38, %v6206_v8  ;;  %v1574_v40 = vpop.f32.mrb[111].mxu0  ;;  %5653 = vmatmul.mubr.bf16.gmra.mrb[104].mxu1 %v1991_v32  ;;  %v1888_v43 = vmax.f32 %v1580_v35, 0.0 }
 0x1d2   : > { %v1575_v41 = vadd.f32 %v6206_v8, %v1574_v40  ;;  %v1886_v45 = vmax.f32 %v1572_v37, 0.0 }
 0x1d3   : > { %v1889_v44 = vmax.f32 %v1583_v39, 0.0 }
 0x1d4   : > { %v1887_v46 = vmax.f32 %v1575_v41, 0.0  ;;  %v5550_v47 = vpop.f32.mrb[0].mxu1 }
 0x1d5   : > { %v1993_v48 = vpack.c.bf16 %v1889_v44, %v1888_v43  ;;  %v2132_v49 = vadd.f32 %v5550_v47, %v6374_v42  ;;  %v2123_v50 = vpop.f32.mrb[1].mxu1 }
 0x1d6   : > { %v1992_v51 = vpack.c.bf16 %v1887_v46, %v1886_v45  ;;  %v2124_v52 = vadd.f32 %v6374_v42, %v2123_v50  ;;  %v5486_v53 = vpop.f32.mrb[112].mxu0  ;;  %v5551_v54 = vpop.f32.mrb[2].mxu1 }
 0x1d7   : > { %v1596_v55 = vadd.f32 %v5486_v53, %v6206_v8  ;;  %v2135_v56 = vadd.f32 %v5551_v54, %v6374_v42  ;;  %v1587_v57 = vpop.f32.mrb[113].mxu0  ;;  %v2126_v58 = vpop.f32.mrb[3].mxu1  ;;  %v2764_v62 = vmax.f32 %v2132_v49, 0.0 }
 0x1d8   : > { %v1588_v59 = vadd.f32 %v6206_v8, %v1587_v57  ;;  %v2127_v60 = vadd.f32 %v6374_v42, %v2126_v58  ;;  %v5487_v61 = vpop.f32.mrb[114].mxu0  ;;  %5656 = vmatprep.mubr.bf16.mxu1 %v1992_v51  ;;  %v2762_v3 = vmax.f32 %v2124_v52, 0.0 }
 0x1d9   : > { %v2765_v63 = vmax.f32 %v2135_v56, 0.0  ;;  %v1599_v1 = vadd.f32 %v6386_v0, %v5487_v61  ;;  %v1590_v2 = vpop.f32.mrb[115].mxu0  ;;  %5657 = vmatmul.mubr.bf16.gmra.mrb[108].mxu1 %v1993_v48  ;;  %v1892_v8 = vmax.f32 %v1596_v55, 0.0 }
 0x1da   : > { %v2763_v4 = vmax.f32 %v2127_v60, 0.0  ;;  %v1591_v5 = vadd.f32 %v6386_v0, %v1590_v2  ;;  %v1890_v9 = vmax.f32 %v1588_v59, 0.0 }
 0x1db   : > { %v4715_v6 = vpack.c.bf16 %v2765_v63, %v2764_v62  ;;  %v1893_v7 = vmax.f32 %v1599_v1, 0.0 }
 0x1dc   : > { %v4710_v10 = vpack.c.bf16 %v2763_v4, %v2762_v3  ;;  %v1891_v11 = vmax.f32 %v1591_v5, 0.0  ;;  %v5554_v12 = vpop.f32.mrb[4].mxu1 }
 0x1dd   : > { %5107 = vst [vmem:[%s6390_s7 + $0x8] sm:$0xff] %v4715_v6   ;;  %v1995_v13 = vpack.c.bf16 %v1893_v7, %v1892_v8  ;;  %v2148_v14 = vadd.f32 %v5554_v12, %v6374_v42  ;;  %v2139_v15 = vpop.f32.mrb[5].mxu1 }
 0x1de   : > { %4711 = vst [vmem:[%s6390_s7] sm:$0xff] %v4710_v10   ;;  %v1994_v16 = vpack.c.bf16 %v1891_v11, %v1890_v9  ;;  %v2140_v17 = vadd.f32 %v6374_v42, %v2139_v15  ;;  %v5490_v18 = vpop.f32.mrb[116].mxu0  ;;  %v5555_v19 = vpop.f32.mrb[6].mxu1 }
 0x1df   : > { %v1612_v20 = vadd.f32 %v6386_v0, %v5490_v18  ;;  %v2151_v21 = vadd.f32 %v5555_v19, %v6374_v42  ;;  %v1603_v22 = vpop.f32.mrb[117].mxu0  ;;  %v2142_v23 = vpop.f32.mrb[7].mxu1  ;;  %v2768_v27 = vmax.f32 %v2148_v14, 0.0 }
 0x1e0   : > { %v1604_v24 = vadd.f32 %v6386_v0, %v1603_v22  ;;  %v2143_v25 = vadd.f32 %v6374_v42, %v2142_v23  ;;  %v5491_v26 = vpop.f32.mrb[118].mxu0  ;;  %5660 = vmatprep.mubr.bf16.mxu1 %v1994_v16  ;;  %v2766_v31 = vmax.f32 %v2140_v17, 0.0 }
 0x1e1   : > { %v2769_v28 = vmax.f32 %v2151_v21, 0.0  ;;  %v1615_v29 = vadd.f32 %v6386_v0, %v5491_v26  ;;  %v1606_v30 = vpop.f32.mrb[119].mxu0  ;;  %5661 = vmatmul.mubr.bf16.gmra.mrb[112].mxu1 %v1995_v13  ;;  %v1896_v34 = vmax.f32 %v1612_v20, 0.0 }
 0x1e2   : > { %v2767_v32 = vmax.f32 %v2143_v25, 0.0  ;;  %v1607_v33 = vadd.f32 %v6386_v0, %v1606_v30  ;;  %v1894_v37 = vmax.f32 %v1604_v24, 0.0 }
 0x1e3   : > { %v4725_v35 = vpack.c.bf16 %v2769_v28, %v2768_v27  ;;  %v1897_v36 = vmax.f32 %v1615_v29, 0.0 }
 0x1e4   : > { %v4720_v38 = vpack.c.bf16 %v2767_v32, %v2766_v31  ;;  %v1895_v39 = vmax.f32 %v1607_v33, 0.0  ;;  %v5558_v40 = vpop.f32.mrb[8].mxu1 }
 0x1e5   : > { %5109 = vst [vmem:[%s6390_s7 + $0x18] sm:$0xff] %v4725_v35   ;;  %v1997_v41 = vpack.c.bf16 %v1897_v36, %v1896_v34  ;;  %v2164_v43 = vadd.f32 %v5558_v40, %v6374_v42  ;;  %v2155_v44 = vpop.f32.mrb[9].mxu1 }
 0x1e6   : > { %5108 = vst [vmem:[%s6390_s7 + $0x10] sm:$0xff] %v4720_v38   ;;  %v1996_v45 = vpack.c.bf16 %v1895_v39, %v1894_v37  ;;  %v2156_v46 = vadd.f32 %v6374_v42, %v2155_v44  ;;  %v5494_v47 = vpop.f32.mrb[120].mxu0  ;;  %v5559_v48 = vpop.f32.mrb[10].mxu1 }
 0x1e7   : > { %v1628_v49 = vadd.f32 %v6386_v0, %v5494_v47  ;;  %v2167_v50 = vadd.f32 %v5559_v48, %v6374_v42  ;;  %v1619_v51 = vpop.f32.mrb[121].mxu0  ;;  %v2158_v52 = vpop.f32.mrb[11].mxu1  ;;  %v2772_v56 = vmax.f32 %v2164_v43, 0.0 }
 0x1e8   : > { %v1620_v53 = vadd.f32 %v6386_v0, %v1619_v51  ;;  %v2159_v54 = vadd.f32 %v6374_v42, %v2158_v52  ;;  %v5495_v55 = vpop.f32.mrb[122].mxu0  ;;  %5664 = vmatprep.mubr.bf16.mxu1 %v1996_v45  ;;  %v2770_v60 = vmax.f32 %v2156_v46, 0.0 }
 0x1e9   : > { %v2773_v57 = vmax.f32 %v2167_v50, 0.0  ;;  %v1631_v58 = vadd.f32 %v6386_v0, %v5495_v55  ;;  %v1622_v59 = vpop.f32.mrb[123].mxu0  ;;  %5665 = vmatmul.mubr.bf16.gmra.mrb[116].mxu1 %v1997_v41  ;;  %v1900_v63 = vmax.f32 %v1628_v49, 0.0 }
 0x1ea   : > { %v2771_v61 = vmax.f32 %v2159_v54, 0.0  ;;  %v1623_v62 = vadd.f32 %v6386_v0, %v1622_v59  ;;  %v1898_v3 = vmax.f32 %v1620_v53, 0.0 }
 0x1eb   : > { %v4735_v1 = vpack.c.bf16 %v2773_v57, %v2772_v56  ;;  %v1901_v2 = vmax.f32 %v1631_v58, 0.0 }
 0x1ec   : > { %v4730_v4 = vpack.c.bf16 %v2771_v61, %v2770_v60  ;;  %v1899_v5 = vmax.f32 %v1623_v62, 0.0  ;;  %v5562_v8 = vpop.f32.mrb[12].mxu1 }
 0x1ed   : > { %5111 = vst [vmem:[%s6390_s7 + $0x28] sm:$0xff] %v4735_v1   ;;  %v1999_v6 = vpack.c.bf16 %v1901_v2, %v1900_v63  ;;  %v2180_v7 = vadd.f32 %v5562_v8, %v6374_v42  ;;  %v2171_v9 = vpop.f32.mrb[13].mxu1 }
 0x1ee   : > { %5110 = vst [vmem:[%s6390_s7 + $0x20] sm:$0xff] %v4730_v4   ;;  %v1998_v10 = vpack.c.bf16 %v1899_v5, %v1898_v3  ;;  %v2172_v11 = vadd.f32 %v6374_v42, %v2171_v9  ;;  %v5498_v12 = vpop.f32.mrb[124].mxu0  ;;  %v5563_v13 = vpop.f32.mrb[14].mxu1 }
 0x1ef   : > { %v1644_v14 = vadd.f32 %v6386_v0, %v5498_v12  ;;  %v2183_v15 = vadd.f32 %v5563_v13, %v6374_v42  ;;  %v1635_v16 = vpop.f32.mrb[125].mxu0  ;;  %v2174_v17 = vpop.f32.mrb[15].mxu1  ;;  %v2776_v21 = vmax.f32 %v2180_v7, 0.0 }
 0x1f0   : > { %v1636_v18 = vadd.f32 %v6386_v0, %v1635_v16  ;;  %v2175_v19 = vadd.f32 %v6374_v42, %v2174_v17  ;;  %v5499_v20 = vpop.f32.mrb[126].mxu0  ;;  %5668 = vmatprep.mubr.bf16.mxu1 %v1998_v10  ;;  %v2774_v25 = vmax.f32 %v2172_v11, 0.0 }
 0x1f1   : > { %v2777_v22 = vmax.f32 %v2183_v15, 0.0  ;;  %v1647_v23 = vadd.f32 %v6386_v0, %v5499_v20  ;;  %v1638_v24 = vpop.f32.mrb[127].mxu0  ;;  %5669 = vmatmul.mubr.bf16.gmra.mrb[120].mxu1 %v1999_v6  ;;  %v1904_v28 = vmax.f32 %v1644_v14, 0.0 }
 0x1f2   : > { %v2775_v26 = vmax.f32 %v2175_v19, 0.0  ;;  %v1639_v27 = vadd.f32 %v6386_v0, %v1638_v24  ;;  %v1902_v31 = vmax.f32 %v1636_v18, 0.0 }
 0x1f3   : > { %v4745_v29 = vpack.c.bf16 %v2777_v22, %v2776_v21  ;;  %v1905_v30 = vmax.f32 %v1647_v23, 0.0 }
 0x1f4   : > { %v4740_v32 = vpack.c.bf16 %v2775_v26, %v2774_v25  ;;  %v1903_v33 = vmax.f32 %v1639_v27, 0.0  ;;  %v5566_v34 = vpop.f32.mrb[16].mxu1 }
 0x1f5   : > { %5113 = vst [vmem:[%s6390_s7 + $0x38] sm:$0xff] %v4745_v29   ;;  %v2001_v35 = vpack.c.bf16 %v1905_v30, %v1904_v28  ;;  %v2196_v36 = vadd.f32 %v5566_v34, %v6374_v42  ;;  %v2187_v37 = vpop.f32.mrb[17].mxu1 }
 0x1f6   : > { %5112 = vst [vmem:[%s6390_s7 + $0x30] sm:$0xff] %v4740_v32   ;;  %v2000_v38 = vpack.c.bf16 %v1903_v33, %v1902_v31  ;;  %v2188_v39 = vadd.f32 %v6374_v42, %v2187_v37  ;;  %v5502_v40 = vpop.f32.mrb[128].mxu0  ;;  %v5567_v41 = vpop.f32.mrb[18].mxu1 }
 0x1f7   : > { %v1660_v43 = vadd.f32 %v6386_v0, %v5502_v40  ;;  %v2199_v44 = vadd.f32 %v5567_v41, %v6374_v42  ;;  %v1651_v45 = vpop.f32.mrb[129].mxu0  ;;  %v2190_v46 = vpop.f32.mrb[19].mxu1  ;;  %v2780_v50 = vmax.f32 %v2196_v36, 0.0 }
 0x1f8   : > { %v1652_v47 = vadd.f32 %v6386_v0, %v1651_v45  ;;  %v2191_v48 = vadd.f32 %v6374_v42, %v2190_v46  ;;  %v5503_v49 = vpop.f32.mrb[130].mxu0  ;;  %5672 = vmatprep.mubr.bf16.mxu1 %v2000_v38  ;;  %v2778_v54 = vmax.f32 %v2188_v39, 0.0 }
 0x1f9   : > { %v2781_v51 = vmax.f32 %v2199_v44, 0.0  ;;  %v1663_v52 = vadd.f32 %v6386_v0, %v5503_v49  ;;  %v1654_v53 = vpop.f32.mrb[131].mxu0  ;;  %5673 = vmatmul.mubr.bf16.gmra.mrb[124].mxu1 %v2001_v35  ;;  %v1908_v57 = vmax.f32 %v1660_v43, 0.0 }
 0x1fa   : > { %v2779_v55 = vmax.f32 %v2191_v48, 0.0  ;;  %v1655_v56 = vadd.f32 %v6386_v0, %v1654_v53  ;;  %v1906_v60 = vmax.f32 %v1652_v47, 0.0 }
 0x1fb   : > { %v4755_v58 = vpack.c.bf16 %v2781_v51, %v2780_v50  ;;  %v1909_v59 = vmax.f32 %v1663_v52, 0.0 }
 0x1fc   : > { %v4750_v61 = vpack.c.bf16 %v2779_v55, %v2778_v54  ;;  %v1907_v62 = vmax.f32 %v1655_v56, 0.0  ;;  %v5570_v63 = vpop.f32.mrb[20].mxu1 }
 0x1fd   : > { %5115 = vst [vmem:[%s6390_s7 + $0x48] sm:$0xff] %v4755_v58   ;;  %v2003_v1 = vpack.c.bf16 %v1909_v59, %v1908_v57  ;;  %v2212_v2 = vadd.f32 %v5570_v63, %v6374_v42  ;;  %v2203_v3 = vpop.f32.mrb[21].mxu1 }
 0x1fe   : > { %5114 = vst [vmem:[%s6390_s7 + $0x40] sm:$0xff] %v4750_v61   ;;  %v2002_v4 = vpack.c.bf16 %v1907_v62, %v1906_v60  ;;  %v2204_v5 = vadd.f32 %v6374_v42, %v2203_v3  ;;  %v5506_v8 = vpop.f32.mrb[132].mxu0  ;;  %v5571_v6 = vpop.f32.mrb[22].mxu1 }
 0x1ff   : > { %v1676_v7 = vadd.f32 %v6386_v0, %v5506_v8  ;;  %v2215_v9 = vadd.f32 %v5571_v6, %v6374_v42  ;;  %v1667_v10 = vpop.f32.mrb[133].mxu0  ;;  %v2206_v11 = vpop.f32.mrb[23].mxu1  ;;  %v2784_v15 = vmax.f32 %v2212_v2, 0.0 }
 0x200   : > { %v1668_v12 = vadd.f32 %v6386_v0, %v1667_v10  ;;  %v2207_v13 = vadd.f32 %v6374_v42, %v2206_v11  ;;  %v5507_v14 = vpop.f32.mrb[134].mxu0  ;;  %5676 = vmatprep.mubr.bf16.mxu1 %v2002_v4  ;;  %v2782_v19 = vmax.f32 %v2204_v5, 0.0 }
 0x201   : > { %v2785_v16 = vmax.f32 %v2215_v9, 0.0  ;;  %v1679_v17 = vadd.f32 %v6386_v0, %v5507_v14  ;;  %v1670_v18 = vpop.f32.mrb[135].mxu0  ;;  %5677 = vmatmul.mubr.bf16.gmra.mrb[128].mxu1 %v2003_v1  ;;  %v1912_v22 = vmax.f32 %v1676_v7, 0.0 }
 0x202   : > { %v2783_v20 = vmax.f32 %v2207_v13, 0.0  ;;  %v1671_v21 = vadd.f32 %v6386_v0, %v1670_v18  ;;  %v1910_v25 = vmax.f32 %v1668_v12, 0.0 }
 0x203   : > { %v4765_v23 = vpack.c.bf16 %v2785_v16, %v2784_v15  ;;  %v1913_v24 = vmax.f32 %v1679_v17, 0.0 }
 0x204   : > { %v4760_v26 = vpack.c.bf16 %v2783_v20, %v2782_v19  ;;  %v1911_v27 = vmax.f32 %v1671_v21, 0.0  ;;  %v5574_v28 = vpop.f32.mrb[24].mxu1 }
 0x205   : > { %5117 = vst [vmem:[%s6390_s7 + $0x58] sm:$0xff] %v4765_v23   ;;  %v2005_v29 = vpack.c.bf16 %v1913_v24, %v1912_v22  ;;  %v2228_v30 = vadd.f32 %v5574_v28, %v6374_v42  ;;  %v2219_v31 = vpop.f32.mrb[25].mxu1 }
 0x206   : > { %5116 = vst [vmem:[%s6390_s7 + $0x50] sm:$0xff] %v4760_v26   ;;  %v2004_v32 = vpack.c.bf16 %v1911_v27, %v1910_v25  ;;  %v2220_v33 = vadd.f32 %v6374_v42, %v2219_v31  ;;  %v5510_v34 = vpop.f32.mrb[136].mxu0  ;;  %v5575_v35 = vpop.f32.mrb[26].mxu1 }
 0x207   : > { %v1692_v36 = vadd.f32 %v6386_v0, %v5510_v34  ;;  %v2231_v37 = vadd.f32 %v5575_v35, %v6374_v42  ;;  %v1683_v38 = vpop.f32.mrb[137].mxu0  ;;  %v2222_v39 = vpop.f32.mrb[27].mxu1  ;;  %v2788_v44 = vmax.f32 %v2228_v30, 0.0 }
 0x208   : > { %v1684_v40 = vadd.f32 %v6386_v0, %v1683_v38  ;;  %v2223_v41 = vadd.f32 %v6374_v42, %v2222_v39  ;;  %v5511_v43 = vpop.f32.mrb[138].mxu0  ;;  %5680 = vmatprep.mubr.bf16.mxu1 %v2004_v32  ;;  %v2786_v48 = vmax.f32 %v2220_v33, 0.0 }
 0x209   : > { %v2789_v45 = vmax.f32 %v2231_v37, 0.0  ;;  %v1695_v46 = vadd.f32 %v6386_v0, %v5511_v43  ;;  %v1686_v47 = vpop.f32.mrb[139].mxu0  ;;  %5681 = vmatmul.mubr.bf16.gmra.mrb[132].mxu1 %v2005_v29  ;;  %v1916_v51 = vmax.f32 %v1692_v36, 0.0 }
 0x20a   : > { %v2787_v49 = vmax.f32 %v2223_v41, 0.0  ;;  %v1687_v50 = vadd.f32 %v6386_v0, %v1686_v47  ;;  %v1914_v54 = vmax.f32 %v1684_v40, 0.0 }
 0x20b   : > { %v4775_v52 = vpack.c.bf16 %v2789_v45, %v2788_v44  ;;  %v1917_v53 = vmax.f32 %v1695_v46, 0.0 }
 0x20c   : > { %v4770_v55 = vpack.c.bf16 %v2787_v49, %v2786_v48  ;;  %v1915_v56 = vmax.f32 %v1687_v50, 0.0  ;;  %v5578_v57 = vpop.f32.mrb[28].mxu1 }
 0x20d   : > { %5119 = vst [vmem:[%s6390_s7 + $0x68] sm:$0xff] %v4775_v52   ;;  %v2007_v58 = vpack.c.bf16 %v1917_v53, %v1916_v51  ;;  %v2244_v59 = vadd.f32 %v5578_v57, %v6374_v42  ;;  %v2235_v60 = vpop.f32.mrb[29].mxu1 }
 0x20e   : > { %5118 = vst [vmem:[%s6390_s7 + $0x60] sm:$0xff] %v4770_v55   ;;  %v2006_v61 = vpack.c.bf16 %v1915_v56, %v1914_v54  ;;  %v2236_v62 = vadd.f32 %v6374_v42, %v2235_v60  ;;  %v5514_v63 = vpop.f32.mrb[140].mxu0  ;;  %v5579_v1 = vpop.f32.mrb[30].mxu1 }
 0x20f   : > { %v1708_v2 = vadd.f32 %v6386_v0, %v5514_v63  ;;  %v2247_v3 = vadd.f32 %v5579_v1, %v6374_v42  ;;  %v1699_v4 = vpop.f32.mrb[141].mxu0  ;;  %v2238_v5 = vpop.f32.mrb[31].mxu1  ;;  %v2792_v9 = vmax.f32 %v2244_v59, 0.0 }
 0x210   : > { %v1700_v8 = vadd.f32 %v6386_v0, %v1699_v4  ;;  %v2239_v6 = vadd.f32 %v6374_v42, %v2238_v5  ;;  %v5515_v7 = vpop.f32.mrb[142].mxu0  ;;  %5684 = vmatprep.mubr.bf16.mxu1 %v2006_v61  ;;  %v2790_v13 = vmax.f32 %v2236_v62, 0.0 }
 0x211   : > { %v2793_v10 = vmax.f32 %v2247_v3, 0.0  ;;  %v1711_v11 = vadd.f32 %v6386_v0, %v5515_v7  ;;  %v1702_v12 = vpop.f32.mrb[143].mxu0  ;;  %5685 = vmatmul.mubr.bf16.gmra.mrb[136].mxu1 %v2007_v58  ;;  %v1920_v16 = vmax.f32 %v1708_v2, 0.0 }
 0x212   : > { %v2791_v14 = vmax.f32 %v2239_v6, 0.0  ;;  %v1703_v15 = vadd.f32 %v6386_v0, %v1702_v12  ;;  %v1918_v19 = vmax.f32 %v1700_v8, 0.0 }
 0x213   : > { %v4785_v17 = vpack.c.bf16 %v2793_v10, %v2792_v9  ;;  %v1921_v18 = vmax.f32 %v1711_v11, 0.0 }
 0x214   : > { %v4780_v20 = vpack.c.bf16 %v2791_v14, %v2790_v13  ;;  %v1919_v21 = vmax.f32 %v1703_v15, 0.0  ;;  %v5582_v22 = vpop.f32.mrb[32].mxu1 }
 0x215   : > { %5121 = vst [vmem:[%s6390_s7 + $0x78] sm:$0xff] %v4785_v17   ;;  %v2009_v23 = vpack.c.bf16 %v1921_v18, %v1920_v16  ;;  %v2260_v24 = vadd.f32 %v5582_v22, %v6374_v42  ;;  %v2251_v25 = vpop.f32.mrb[33].mxu1 }
 0x216   : > { %5120 = vst [vmem:[%s6390_s7 + $0x70] sm:$0xff] %v4780_v20   ;;  %v2008_v26 = vpack.c.bf16 %v1919_v21, %v1918_v19  ;;  %v2252_v27 = vadd.f32 %v6374_v42, %v2251_v25  ;;  %v5518_v28 = vpop.f32.mrb[144].mxu0  ;;  %v5583_v29 = vpop.f32.mrb[34].mxu1 }
 0x217   : > { %v1724_v30 = vadd.f32 %v6386_v0, %v5518_v28  ;;  %v2263_v31 = vadd.f32 %v5583_v29, %v6374_v42  ;;  %v1715_v32 = vpop.f32.mrb[145].mxu0  ;;  %v2254_v33 = vpop.f32.mrb[35].mxu1  ;;  %v2796_v37 = vmax.f32 %v2260_v24, 0.0 }
 0x218   : > { %v1716_v34 = vadd.f32 %v6386_v0, %v1715_v32  ;;  %v2255_v35 = vadd.f32 %v6374_v42, %v2254_v33  ;;  %v5519_v36 = vpop.f32.mrb[146].mxu0  ;;  %5688 = vmatprep.mubr.bf16.mxu1 %v2008_v26  ;;  %v2794_v41 = vmax.f32 %v2252_v27, 0.0 }
 0x219   : > { %v2797_v38 = vmax.f32 %v2263_v31, 0.0  ;;  %v1727_v39 = vadd.f32 %v6386_v0, %v5519_v36  ;;  %v1718_v40 = vpop.f32.mrb[147].mxu0  ;;  %5689 = vmatmul.mubr.bf16.gmra.mrb[140].mxu1 %v2009_v23  ;;  %v1924_v45 = vmax.f32 %v1724_v30, 0.0 }
 0x21a   : > { %v2795_v43 = vmax.f32 %v2255_v35, 0.0  ;;  %v1719_v44 = vadd.f32 %v6386_v0, %v1718_v40  ;;  %v1922_v48 = vmax.f32 %v1716_v34, 0.0 }
 0x21b   : > { %v4795_v46 = vpack.c.bf16 %v2797_v38, %v2796_v37  ;;  %v1925_v47 = vmax.f32 %v1727_v39, 0.0 }
 0x21c   : > { %v4790_v49 = vpack.c.bf16 %v2795_v43, %v2794_v41  ;;  %v1923_v50 = vmax.f32 %v1719_v44, 0.0  ;;  %v5586_v51 = vpop.f32.mrb[36].mxu1 }
 0x21d   : > { %5123 = vst [vmem:[%s6390_s7 + $0x88] sm:$0xff] %v4795_v46   ;;  %v2011_v52 = vpack.c.bf16 %v1925_v47, %v1924_v45  ;;  %v2276_v53 = vadd.f32 %v5586_v51, %v6374_v42  ;;  %v2267_v54 = vpop.f32.mrb[37].mxu1 }
 0x21e   : > { %5122 = vst [vmem:[%s6390_s7 + $0x80] sm:$0xff] %v4790_v49   ;;  %v2010_v55 = vpack.c.bf16 %v1923_v50, %v1922_v48  ;;  %v2268_v56 = vadd.f32 %v6374_v42, %v2267_v54  ;;  %v5522_v57 = vpop.f32.mrb[148].mxu0  ;;  %v5587_v58 = vpop.f32.mrb[38].mxu1 }
 0x21f   : > { %v1740_v59 = vadd.f32 %v6386_v0, %v5522_v57  ;;  %v2279_v60 = vadd.f32 %v5587_v58, %v6374_v42  ;;  %v1731_v61 = vpop.f32.mrb[149].mxu0  ;;  %v2270_v62 = vpop.f32.mrb[39].mxu1  ;;  %v2800_v3 = vmax.f32 %v2276_v53, 0.0 }
 0x220   : > { %v1732_v63 = vadd.f32 %v6386_v0, %v1731_v61  ;;  %v2271_v1 = vadd.f32 %v6374_v42, %v2270_v62  ;;  %v5523_v2 = vpop.f32.mrb[150].mxu0  ;;  %5692 = vmatprep.mubr.bf16.mxu1 %v2010_v55  ;;  %v2798_v6 = vmax.f32 %v2268_v56, 0.0 }
 0x221   : > { %v2801_v4 = vmax.f32 %v2279_v60, 0.0  ;;  %v1743_v5 = vadd.f32 %v6386_v0, %v5523_v2  ;;  %v1734_v8 = vpop.f32.mrb[151].mxu0  ;;  %5693 = vmatmul.mubr.bf16.gmra.mrb[144].mxu1 %v2011_v52  ;;  %v1928_v10 = vmax.f32 %v1740_v59, 0.0 }
 0x222   : > { %v2799_v7 = vmax.f32 %v2271_v1, 0.0  ;;  %v1735_v9 = vadd.f32 %v6386_v0, %v1734_v8  ;;  %v1926_v13 = vmax.f32 %v1732_v63, 0.0 }
 0x223   : > { %v4805_v11 = vpack.c.bf16 %v2801_v4, %v2800_v3  ;;  %v1929_v12 = vmax.f32 %v1743_v5, 0.0 }
 0x224   : > { %v4800_v14 = vpack.c.bf16 %v2799_v7, %v2798_v6  ;;  %v1927_v15 = vmax.f32 %v1735_v9, 0.0  ;;  %v5590_v16 = vpop.f32.mrb[40].mxu1 }
 0x225   : > { %5125 = vst [vmem:[%s6390_s7 + $0x98] sm:$0xff] %v4805_v11   ;;  %v2013_v17 = vpack.c.bf16 %v1929_v12, %v1928_v10  ;;  %v2292_v18 = vadd.f32 %v5590_v16, %v6374_v42  ;;  %v2283_v19 = vpop.f32.mrb[41].mxu1 }
 0x226   : > { %5124 = vst [vmem:[%s6390_s7 + $0x90] sm:$0xff] %v4800_v14   ;;  %v2012_v20 = vpack.c.bf16 %v1927_v15, %v1926_v13  ;;  %v2284_v21 = vadd.f32 %v6374_v42, %v2283_v19  ;;  %v5526_v22 = vpop.f32.mrb[152].mxu0  ;;  %v5591_v23 = vpop.f32.mrb[42].mxu1 }
 0x227   : > { %v1756_v24 = vadd.f32 %v6386_v0, %v5526_v22  ;;  %v2295_v25 = vadd.f32 %v5591_v23, %v6374_v42  ;;  %v1747_v26 = vpop.f32.mrb[153].mxu0  ;;  %v2286_v27 = vpop.f32.mrb[43].mxu1  ;;  %v2804_v31 = vmax.f32 %v2292_v18, 0.0 }
 0x228   : > { %v1748_v28 = vadd.f32 %v6386_v0, %v1747_v26  ;;  %v2287_v29 = vadd.f32 %v6374_v42, %v2286_v27  ;;  %v5527_v30 = vpop.f32.mrb[154].mxu0  ;;  %5696 = vmatprep.mubr.bf16.mxu1 %v2012_v20  ;;  %v2802_v35 = vmax.f32 %v2284_v21, 0.0 }
 0x229   : > { %v2805_v32 = vmax.f32 %v2295_v25, 0.0  ;;  %v1759_v33 = vadd.f32 %v6386_v0, %v5527_v30  ;;  %v1750_v34 = vpop.f32.mrb[155].mxu0  ;;  %5697 = vmatmul.mubr.bf16.gmra.mrb[148].mxu1 %v2013_v17  ;;  %v1932_v38 = vmax.f32 %v1756_v24, 0.0 }
 0x22a   : > { %v2803_v36 = vmax.f32 %v2287_v29, 0.0  ;;  %v1751_v37 = vadd.f32 %v6386_v0, %v1750_v34  ;;  %v1930_v41 = vmax.f32 %v1748_v28, 0.0 }
 0x22b   : > { %v4815_v39 = vpack.c.bf16 %v2805_v32, %v2804_v31  ;;  %v1933_v40 = vmax.f32 %v1759_v33, 0.0 }
 0x22c   : > { %v4810_v43 = vpack.c.bf16 %v2803_v36, %v2802_v35  ;;  %v1931_v44 = vmax.f32 %v1751_v37, 0.0  ;;  %v5594_v45 = vpop.f32.mrb[44].mxu1 }
 0x22d   : > { %5127 = vst [vmem:[%s6390_s7 + $0xa8] sm:$0xff] %v4815_v39   ;;  %v2015_v46 = vpack.c.bf16 %v1933_v40, %v1932_v38  ;;  %v2308_v47 = vadd.f32 %v5594_v45, %v6374_v42  ;;  %v2299_v48 = vpop.f32.mrb[45].mxu1 }
 0x22e   : > { %5126 = vst [vmem:[%s6390_s7 + $0xa0] sm:$0xff] %v4810_v43   ;;  %v2014_v49 = vpack.c.bf16 %v1931_v44, %v1930_v41  ;;  %v2300_v50 = vadd.f32 %v6374_v42, %v2299_v48  ;;  %v5530_v51 = vpop.f32.mrb[156].mxu0  ;;  %v5595_v52 = vpop.f32.mrb[46].mxu1 }
 0x22f   : > { %v1772_v53 = vadd.f32 %v6386_v0, %v5530_v51  ;;  %v2311_v54 = vadd.f32 %v5595_v52, %v6374_v42  ;;  %v1763_v55 = vpop.f32.mrb[157].mxu0  ;;  %v2302_v56 = vpop.f32.mrb[47].mxu1  ;;  %v2808_v60 = vmax.f32 %v2308_v47, 0.0 }
 0x230   : > { %v1764_v57 = vadd.f32 %v6386_v0, %v1763_v55  ;;  %v2303_v58 = vadd.f32 %v6374_v42, %v2302_v56  ;;  %v5531_v59 = vpop.f32.mrb[158].mxu0  ;;  %5700 = vmatprep.mubr.bf16.mxu1 %v2014_v49  ;;  %v2806_v1 = vmax.f32 %v2300_v50, 0.0 }
 0x231   : > { %v2809_v61 = vmax.f32 %v2311_v54, 0.0  ;;  %v1775_v62 = vadd.f32 %v6386_v0, %v5531_v59  ;;  %v1766_v63 = vpop.f32.mrb[159].mxu0  ;;  %5701 = vmatmul.mubr.bf16.gmra.mrb[152].mxu1 %v2015_v46  ;;  %v1936_v4 = vmax.f32 %v1772_v53, 0.0 }
 0x232   : > { %v2807_v2 = vmax.f32 %v2303_v58, 0.0  ;;  %v1767_v3 = vadd.f32 %v6386_v0, %v1766_v63  ;;  %v1934_v6 = vmax.f32 %v1764_v57, 0.0 }
 0x233   : > { %v4825_v5 = vpack.c.bf16 %v2809_v61, %v2808_v60  ;;  %v1937_v8 = vmax.f32 %v1775_v62, 0.0 }
 0x234   : > { %v4820_v7 = vpack.c.bf16 %v2807_v2, %v2806_v1  ;;  %v1935_v9 = vmax.f32 %v1767_v3, 0.0  ;;  %v5598_v10 = vpop.f32.mrb[48].mxu1 }
 0x235   : > { %5129 = vst [vmem:[%s6390_s7 + $0xb8] sm:$0xff] %v4825_v5   ;;  %v2017_v11 = vpack.c.bf16 %v1937_v8, %v1936_v4  ;;  %v2324_v12 = vadd.f32 %v5598_v10, %v6374_v42  ;;  %v2315_v13 = vpop.f32.mrb[49].mxu1 }
 0x236   : > { %5128 = vst [vmem:[%s6390_s7 + $0xb0] sm:$0xff] %v4820_v7   ;;  %v2016_v14 = vpack.c.bf16 %v1935_v9, %v1934_v6  ;;  %v2316_v15 = vadd.f32 %v6374_v42, %v2315_v13  ;;  %v5599_v16 = vpop.f32.mrb[50].mxu1 }
 0x237   : > { %v2327_v0 = vadd.f32 %v5599_v16, %v6374_v42  ;;  %v2318_v17 = vpop.f32.mrb[51].mxu1  ;;  %v2812_v19 = vmax.f32 %v2324_v12, 0.0 }
 0x238   : > { %v2319_v18 = vadd.f32 %v6374_v42, %v2318_v17  ;;  %5704 = vmatprep.mubr.bf16.mxu1 %v2016_v14  ;;  %v2810_v21 = vmax.f32 %v2316_v15, 0.0 }
 0x239   : > { %v2813_v20 = vmax.f32 %v2327_v0, 0.0  ;;  %5705 = vmatmul.mubr.bf16.gmra.mrb[156].mxu1 %v2017_v11 }
 0x23a   : > { %v2811_v22 = vmax.f32 %v2319_v18, 0.0 }
 0x23b   : > { %v4835_v23 = vpack.c.bf16 %v2813_v20, %v2812_v19 }
 0x23c   : > { %v4830_v24 = vpack.c.bf16 %v2811_v22, %v2810_v21  ;;  %v5602_v25 = vpop.f32.mrb[52].mxu1 }
 0x23d   : > { %5131 = vst [vmem:[%s6390_s7 + $0xc8] sm:$0xff] %v4835_v23   ;;  %v2340_v26 = vadd.f32 %v5602_v25, %v6374_v42  ;;  %v2331_v27 = vpop.f32.mrb[53].mxu1 }
 0x23e   : > { %5130 = vst [vmem:[%s6390_s7 + $0xc0] sm:$0xff] %v4830_v24   ;;  %v2332_v28 = vadd.f32 %v6374_v42, %v2331_v27  ;;  %v5603_v29 = vpop.f32.mrb[54].mxu1 }
 0x23f   : > { %v2343_v30 = vadd.f32 %v5603_v29, %v6374_v42  ;;  %v2334_v31 = vpop.f32.mrb[55].mxu1  ;;  %v2816_v33 = vmax.f32 %v2340_v26, 0.0 }
 0x240   : > { %v2335_v32 = vadd.f32 %v6374_v42, %v2334_v31  ;;  %v2814_v35 = vmax.f32 %v2332_v28, 0.0 }
 0x241   : > { %v2817_v34 = vmax.f32 %v2343_v30, 0.0 }
 0x242   : > { %v2815_v36 = vmax.f32 %v2335_v32, 0.0 }
 0x243   : > { %v4845_v37 = vpack.c.bf16 %v2817_v34, %v2816_v33 }
 0x244   : > { %v4840_v38 = vpack.c.bf16 %v2815_v36, %v2814_v35  ;;  %v5606_v39 = vpop.f32.mrb[56].mxu1 }
 0x245   : > { %5133 = vst [vmem:[%s6390_s7 + $0xd8] sm:$0xff] %v4845_v37   ;;  %v2356_v40 = vadd.f32 %v5606_v39, %v6374_v42  ;;  %v2347_v41 = vpop.f32.mrb[57].mxu1 }
 0x246   : > { %5132 = vst [vmem:[%s6390_s7 + $0xd0] sm:$0xff] %v4840_v38   ;;  %v2348_v43 = vadd.f32 %v6374_v42, %v2347_v41  ;;  %v5607_v44 = vpop.f32.mrb[58].mxu1 }
 0x247   : > { %v2359_v45 = vadd.f32 %v5607_v44, %v6374_v42  ;;  %v2350_v46 = vpop.f32.mrb[59].mxu1  ;;  %v2820_v48 = vmax.f32 %v2356_v40, 0.0 }
 0x248   : > { %v2351_v47 = vadd.f32 %v6374_v42, %v2350_v46  ;;  %v2818_v50 = vmax.f32 %v2348_v43, 0.0 }
 0x249   : > { %v2821_v49 = vmax.f32 %v2359_v45, 0.0 }
 0x24a   : > { %v2819_v51 = vmax.f32 %v2351_v47, 0.0 }
 0x24b   : > { %v4855_v52 = vpack.c.bf16 %v2821_v49, %v2820_v48 }
 0x24c   : > { %v4850_v53 = vpack.c.bf16 %v2819_v51, %v2818_v50  ;;  %v5610_v54 = vpop.f32.mrb[60].mxu1 }
 0x24d   : > { %5135 = vst [vmem:[%s6390_s7 + $0xe8] sm:$0xff] %v4855_v52   ;;  %v2372_v55 = vadd.f32 %v5610_v54, %v6374_v42  ;;  %v2363_v56 = vpop.f32.mrb[61].mxu1  ;;  %v6551_v52 = vld [vmem:[%s6880_s4] ss:$0 sm:$0xff] }
 0x24e   : > { %5134 = vst [vmem:[%s6390_s7 + $0xe0] sm:$0xff] %v4850_v53   ;;  %v2364_v57 = vadd.f32 %v6374_v42, %v2363_v56  ;;  %v5611_v58 = vpop.f32.mrb[62].mxu1 }
 0x24f   : > { %v2375_v59 = vadd.f32 %v5611_v58, %v6374_v42  ;;  %v2366_v60 = vpop.f32.mrb[63].mxu1  ;;  %v2824_v62 = vmax.f32 %v2372_v55, 0.0 }
 0x250   : > { %v2367_v61 = vadd.f32 %v6374_v42, %v2366_v60  ;;  %v2822_v1 = vmax.f32 %v2364_v57, 0.0 }
 0x251   : > { %v2825_v63 = vmax.f32 %v2375_v59, 0.0 }
 0x252   : > { %v2823_v2 = vmax.f32 %v2367_v61, 0.0 }
 0x253   : > { %v4865_v3 = vpack.c.bf16 %v2825_v63, %v2824_v62 }
 0x254   : > { %v4860_v4 = vpack.c.bf16 %v2823_v2, %v2822_v1  ;;  %v5614_v5 = vpop.f32.mrb[64].mxu1 }
 0x255   : > { %5137 = vst [vmem:[%s6390_s7 + $0xf8] sm:$0xff] %v4865_v3   ;;  %v2388_v8 = vadd.f32 %v5614_v5, %v6374_v42  ;;  %v2379_v6 = vpop.f32.mrb[65].mxu1 }
 0x256   : > { %5136 = vst [vmem:[%s6390_s7 + $0xf0] sm:$0xff] %v4860_v4   ;;  %v2380_v7 = vadd.f32 %v6374_v42, %v2379_v6  ;;  %v5615_v9 = vpop.f32.mrb[66].mxu1 }
 0x257   : > { %v2391_v10 = vadd.f32 %v5615_v9, %v6374_v42  ;;  %v2382_v11 = vpop.f32.mrb[67].mxu1  ;;  %v2828_v13 = vmax.f32 %v2388_v8, 0.0 }
 0x258   : > { %v2383_v12 = vadd.f32 %v6374_v42, %v2382_v11  ;;  %v2826_v15 = vmax.f32 %v2380_v7, 0.0 }
 0x259   : > { %v2829_v14 = vmax.f32 %v2391_v10, 0.0 }
 0x25a   : > { %v2827_v16 = vmax.f32 %v2383_v12, 0.0 }
 0x25b   : > { %v4875_v0 = vpack.c.bf16 %v2829_v14, %v2828_v13 }
 0x25c   : > { %v4870_v17 = vpack.c.bf16 %v2827_v16, %v2826_v15  ;;  %v5618_v18 = vpop.f32.mrb[68].mxu1 }
 0x25d   : > { %5139 = vst [vmem:[%s6390_s7 + $0x108] sm:$0xff] %v4875_v0   ;;  %v2404_v19 = vadd.f32 %v5618_v18, %v6374_v42  ;;  %v2395_v20 = vpop.f32.mrb[69].mxu1 }
 0x25e   : > { %5138 = vst [vmem:[%s6390_s7 + $0x100] sm:$0xff] %v4870_v17   ;;  %v2396_v21 = vadd.f32 %v6374_v42, %v2395_v20  ;;  %v5619_v22 = vpop.f32.mrb[70].mxu1 }
 0x25f   : > { %v2407_v23 = vadd.f32 %v5619_v22, %v6374_v42  ;;  %v2398_v24 = vpop.f32.mrb[71].mxu1  ;;  %v2832_v26 = vmax.f32 %v2404_v19, 0.0 }
 0x260   : > { %v2399_v25 = vadd.f32 %v6374_v42, %v2398_v24  ;;  %v2830_v28 = vmax.f32 %v2396_v21, 0.0 }
 0x261   : > { %v2833_v27 = vmax.f32 %v2407_v23, 0.0 }
 0x262   : > { %v2831_v29 = vmax.f32 %v2399_v25, 0.0 }
 0x263   : > { %v4885_v30 = vpack.c.bf16 %v2833_v27, %v2832_v26 }
 0x264   : > { %v4880_v31 = vpack.c.bf16 %v2831_v29, %v2830_v28  ;;  %v5622_v32 = vpop.f32.mrb[72].mxu1 }
 0x265   : > { %5141 = vst [vmem:[%s6390_s7 + $0x118] sm:$0xff] %v4885_v30   ;;  %v2420_v33 = vadd.f32 %v5622_v32, %v6374_v42  ;;  %v2411_v34 = vpop.f32.mrb[73].mxu1 }
 0x266   : > { %5140 = vst [vmem:[%s6390_s7 + $0x110] sm:$0xff] %v4880_v31   ;;  %v2412_v35 = vadd.f32 %v6374_v42, %v2411_v34  ;;  %v5623_v36 = vpop.f32.mrb[74].mxu1 }
 0x267   : > { %v2423_v37 = vadd.f32 %v5623_v36, %v6374_v42  ;;  %v2414_v38 = vpop.f32.mrb[75].mxu1  ;;  %v2836_v40 = vmax.f32 %v2420_v33, 0.0 }
 0x268   : > { %v2415_v39 = vadd.f32 %v6374_v42, %v2414_v38  ;;  %v2834_v43 = vmax.f32 %v2412_v35, 0.0 }
 0x269   : > { %v2837_v41 = vmax.f32 %v2423_v37, 0.0 }
 0x26a   : > { %v2835_v44 = vmax.f32 %v2415_v39, 0.0 }
 0x26b   : > { %v4895_v45 = vpack.c.bf16 %v2837_v41, %v2836_v40 }
 0x26c   : > { %v4890_v46 = vpack.c.bf16 %v2835_v44, %v2834_v43  ;;  %v5626_v47 = vpop.f32.mrb[76].mxu1 }
 0x26d   : > { %5143 = vst [vmem:[%s6390_s7 + $0x128] sm:$0xff] %v4895_v45   ;;  %v2436_v48 = vadd.f32 %v5626_v47, %v6374_v42  ;;  %v2427_v49 = vpop.f32.mrb[77].mxu1 }
 0x26e   : > { %5142 = vst [vmem:[%s6390_s7 + $0x120] sm:$0xff] %v4890_v46   ;;  %v2428_v50 = vadd.f32 %v6374_v42, %v2427_v49  ;;  %v5627_v51 = vpop.f32.mrb[78].mxu1 }
 0x26f   : > { %v2439_v53 = vadd.f32 %v6551_v52, %v5627_v51  ;;  %v2430_v54 = vpop.f32.mrb[79].mxu1  ;;  %v2840_v56 = vmax.f32 %v2436_v48, 0.0 }
 0x270   : > { %v2431_v55 = vadd.f32 %v6551_v52, %v2430_v54  ;;  %v2838_v58 = vmax.f32 %v2428_v50, 0.0 }
 0x271   : > { %v2841_v57 = vmax.f32 %v2439_v53, 0.0 }
 0x272   : > { %v2839_v59 = vmax.f32 %v2431_v55, 0.0 }
 0x273   : > { %v4905_v60 = vpack.c.bf16 %v2841_v57, %v2840_v56 }
 0x274   : > { %v4900_v61 = vpack.c.bf16 %v2839_v59, %v2838_v58  ;;  %v5630_v62 = vpop.f32.mrb[80].mxu1 }
 0x275   : > { %5145 = vst [vmem:[%s6390_s7 + $0x138] sm:$0xff] %v4905_v60   ;;  %v2452_v42 = vadd.f32 %v6551_v52, %v5630_v62  ;;  %v2443_v63 = vpop.f32.mrb[81].mxu1 }
 0x276   : > { %5144 = vst [vmem:[%s6390_s7 + $0x130] sm:$0xff] %v4900_v61   ;;  %v2444_v1 = vadd.f32 %v6551_v52, %v2443_v63  ;;  %v5631_v2 = vpop.f32.mrb[82].mxu1 }
 0x277   : > { %v2455_v3 = vadd.f32 %v6551_v52, %v5631_v2  ;;  %v2446_v4 = vpop.f32.mrb[83].mxu1  ;;  %v2844_v8 = vmax.f32 %v2452_v42, 0.0 }
 0x278   : > { %v2447_v5 = vadd.f32 %v6551_v52, %v2446_v4  ;;  %v2842_v7 = vmax.f32 %v2444_v1, 0.0 }
 0x279   : > { %v2845_v6 = vmax.f32 %v2455_v3, 0.0 }
 0x27a   : > { %v2843_v9 = vmax.f32 %v2447_v5, 0.0 }
 0x27b   : > { %v4915_v10 = vpack.c.bf16 %v2845_v6, %v2844_v8 }
 0x27c   : > { %v4910_v11 = vpack.c.bf16 %v2843_v9, %v2842_v7  ;;  %v5634_v12 = vpop.f32.mrb[84].mxu1 }
 0x27d   : > { %5147 = vst [vmem:[%s6390_s7 + $0x148] sm:$0xff] %v4915_v10   ;;  %v2468_v13 = vadd.f32 %v6551_v52, %v5634_v12  ;;  %v2459_v14 = vpop.f32.mrb[85].mxu1 }
 0x27e   : > { %5146 = vst [vmem:[%s6390_s7 + $0x140] sm:$0xff] %v4910_v11   ;;  %v2460_v15 = vadd.f32 %v6551_v52, %v2459_v14  ;;  %v5635_v16 = vpop.f32.mrb[86].mxu1 }
 0x27f   : > { %v2471_v0 = vadd.f32 %v6551_v52, %v5635_v16  ;;  %v2462_v17 = vpop.f32.mrb[87].mxu1  ;;  %v2848_v19 = vmax.f32 %v2468_v13, 0.0 }
 0x280   : > { %v2463_v18 = vadd.f32 %v6551_v52, %v2462_v17  ;;  %v2846_v21 = vmax.f32 %v2460_v15, 0.0 }
 0x281   : > { %v2849_v20 = vmax.f32 %v2471_v0, 0.0 }
 0x282   : > { %v2847_v22 = vmax.f32 %v2463_v18, 0.0 }
 0x283   : > { %v4925_v23 = vpack.c.bf16 %v2849_v20, %v2848_v19 }
 0x284   : > { %v4920_v24 = vpack.c.bf16 %v2847_v22, %v2846_v21  ;;  %v5638_v25 = vpop.f32.mrb[88].mxu1 }
 0x285   : > { %5149 = vst [vmem:[%s6390_s7 + $0x158] sm:$0xff] %v4925_v23   ;;  %v2484_v26 = vadd.f32 %v6551_v52, %v5638_v25  ;;  %v2475_v27 = vpop.f32.mrb[89].mxu1 }
 0x286   : > { %5148 = vst [vmem:[%s6390_s7 + $0x150] sm:$0xff] %v4920_v24   ;;  %v2476_v28 = vadd.f32 %v6551_v52, %v2475_v27  ;;  %v5639_v29 = vpop.f32.mrb[90].mxu1 }
 0x287   : > { %v2487_v30 = vadd.f32 %v6551_v52, %v5639_v29  ;;  %v2478_v31 = vpop.f32.mrb[91].mxu1  ;;  %v2852_v33 = vmax.f32 %v2484_v26, 0.0 }
 0x288   : > { %v2479_v32 = vadd.f32 %v6551_v52, %v2478_v31  ;;  %v2850_v35 = vmax.f32 %v2476_v28, 0.0 }
 0x289   : > { %v2853_v34 = vmax.f32 %v2487_v30, 0.0 }
 0x28a   : > { %v2851_v36 = vmax.f32 %v2479_v32, 0.0 }
 0x28b   : > { %v4935_v37 = vpack.c.bf16 %v2853_v34, %v2852_v33 }
 0x28c   : > { %v4930_v38 = vpack.c.bf16 %v2851_v36, %v2850_v35  ;;  %v5642_v39 = vpop.f32.mrb[92].mxu1 }
 0x28d   : > { %5151 = vst [vmem:[%s6390_s7 + $0x168] sm:$0xff] %v4935_v37   ;;  %v2500_v40 = vadd.f32 %v6551_v52, %v5642_v39  ;;  %v2491_v41 = vpop.f32.mrb[93].mxu1 }
 0x28e   : > { %5150 = vst [vmem:[%s6390_s7 + $0x160] sm:$0xff] %v4930_v38   ;;  %v2492_v43 = vadd.f32 %v6551_v52, %v2491_v41  ;;  %v5643_v44 = vpop.f32.mrb[94].mxu1 }
 0x28f   : > { %v2503_v45 = vadd.f32 %v6551_v52, %v5643_v44  ;;  %v2494_v46 = vpop.f32.mrb[95].mxu1  ;;  %v2856_v48 = vmax.f32 %v2500_v40, 0.0 }
 0x290   : > { %v2495_v47 = vadd.f32 %v6551_v52, %v2494_v46  ;;  %v2854_v50 = vmax.f32 %v2492_v43, 0.0 }
 0x291   : > { %v2857_v49 = vmax.f32 %v2503_v45, 0.0 }
 0x292   : > { %v2855_v51 = vmax.f32 %v2495_v47, 0.0 }
 0x293   : > { %v4945_v53 = vpack.c.bf16 %v2857_v49, %v2856_v48 }
 0x294   : > { %v4940_v54 = vpack.c.bf16 %v2855_v51, %v2854_v50  ;;  %v5646_v55 = vpop.f32.mrb[96].mxu1 }
 0x295   : > { %5153 = vst [vmem:[%s6390_s7 + $0x178] sm:$0xff] %v4945_v53   ;;  %v2516_v56 = vadd.f32 %v6551_v52, %v5646_v55  ;;  %v2507_v57 = vpop.f32.mrb[97].mxu1 }
 0x296   : > { %5152 = vst [vmem:[%s6390_s7 + $0x170] sm:$0xff] %v4940_v54   ;;  %v2508_v58 = vadd.f32 %v6551_v52, %v2507_v57  ;;  %v5647_v59 = vpop.f32.mrb[98].mxu1 }
 0x297   : > { %v2519_v60 = vadd.f32 %v6551_v52, %v5647_v59  ;;  %v2510_v61 = vpop.f32.mrb[99].mxu1  ;;  %v2860_v42 = vmax.f32 %v2516_v56, 0.0 }
 0x298   : > { %v2511_v62 = vadd.f32 %v6551_v52, %v2510_v61  ;;  %v2858_v1 = vmax.f32 %v2508_v58, 0.0 }
 0x299   : > { %v2861_v63 = vmax.f32 %v2519_v60, 0.0 }
 0x29a   : > { %v2859_v2 = vmax.f32 %v2511_v62, 0.0 }
 0x29b   : > { %v4955_v3 = vpack.c.bf16 %v2861_v63, %v2860_v42 }
 0x29c   : > { %v4950_v4 = vpack.c.bf16 %v2859_v2, %v2858_v1  ;;  %v5650_v5 = vpop.f32.mrb[100].mxu1 }
 0x29d   : > { %5155 = vst [vmem:[%s6390_s7 + $0x188] sm:$0xff] %v4955_v3   ;;  %v2532_v8 = vadd.f32 %v6551_v52, %v5650_v5  ;;  %v2523_v6 = vpop.f32.mrb[101].mxu1 }
 0x29e   : > { %5154 = vst [vmem:[%s6390_s7 + $0x180] sm:$0xff] %v4950_v4   ;;  %v2524_v7 = vadd.f32 %v6551_v52, %v2523_v6  ;;  %v5651_v9 = vpop.f32.mrb[102].mxu1 }
 0x29f   : > { %v2535_v10 = vadd.f32 %v6551_v52, %v5651_v9  ;;  %v2526_v11 = vpop.f32.mrb[103].mxu1  ;;  %v2864_v13 = vmax.f32 %v2532_v8, 0.0 }
 0x2a0   : > { %v2527_v12 = vadd.f32 %v6551_v52, %v2526_v11  ;;  %v2862_v15 = vmax.f32 %v2524_v7, 0.0 }
 0x2a1   : > { %v2865_v14 = vmax.f32 %v2535_v10, 0.0 }
 0x2a2   : > { %v2863_v16 = vmax.f32 %v2527_v12, 0.0 }
 0x2a3   : > { %v4965_v0 = vpack.c.bf16 %v2865_v14, %v2864_v13 }
 0x2a4   : > { %v4960_v17 = vpack.c.bf16 %v2863_v16, %v2862_v15  ;;  %v5654_v18 = vpop.f32.mrb[104].mxu1 }
 0x2a5   : > { %5157 = vst [vmem:[%s6390_s7 + $0x198] sm:$0xff] %v4965_v0   ;;  %v2548_v19 = vadd.f32 %v6551_v52, %v5654_v18  ;;  %v2539_v20 = vpop.f32.mrb[105].mxu1 }
 0x2a6   : > { %5156 = vst [vmem:[%s6390_s7 + $0x190] sm:$0xff] %v4960_v17   ;;  %v2540_v21 = vadd.f32 %v6551_v52, %v2539_v20  ;;  %v5655_v22 = vpop.f32.mrb[106].mxu1 }
 0x2a7   : > { %v2551_v23 = vadd.f32 %v6551_v52, %v5655_v22  ;;  %v2542_v24 = vpop.f32.mrb[107].mxu1  ;;  %v2868_v26 = vmax.f32 %v2548_v19, 0.0 }
 0x2a8   : > { %v2543_v25 = vadd.f32 %v6551_v52, %v2542_v24  ;;  %v2866_v28 = vmax.f32 %v2540_v21, 0.0 }
 0x2a9   : > { %v2869_v27 = vmax.f32 %v2551_v23, 0.0 }
 0x2aa   : > { %v2867_v29 = vmax.f32 %v2543_v25, 0.0 }
 0x2ab   : > { %v4975_v30 = vpack.c.bf16 %v2869_v27, %v2868_v26 }
 0x2ac   : > { %v4970_v31 = vpack.c.bf16 %v2867_v29, %v2866_v28  ;;  %v5658_v32 = vpop.f32.mrb[108].mxu1 }
 0x2ad   : > { %5159 = vst [vmem:[%s6390_s7 + $0x1a8] sm:$0xff] %v4975_v30   ;;  %v2564_v33 = vadd.f32 %v6551_v52, %v5658_v32  ;;  %v2555_v34 = vpop.f32.mrb[109].mxu1 }
 0x2ae   : > { %5158 = vst [vmem:[%s6390_s7 + $0x1a0] sm:$0xff] %v4970_v31   ;;  %v2556_v35 = vadd.f32 %v6551_v52, %v2555_v34  ;;  %v5659_v36 = vpop.f32.mrb[110].mxu1 }
 0x2af   : > { %v2567_v37 = vadd.f32 %v6551_v52, %v5659_v36  ;;  %v2558_v38 = vpop.f32.mrb[111].mxu1  ;;  %v2872_v40 = vmax.f32 %v2564_v33, 0.0 }
 0x2b0   : > { %v2559_v39 = vadd.f32 %v6551_v52, %v2558_v38  ;;  %v2870_v43 = vmax.f32 %v2556_v35, 0.0 }
 0x2b1   : > { %v2873_v41 = vmax.f32 %v2567_v37, 0.0 }
 0x2b2   : > { %v2871_v44 = vmax.f32 %v2559_v39, 0.0 }
 0x2b3   : > { %v4985_v45 = vpack.c.bf16 %v2873_v41, %v2872_v40 }
 0x2b4   : > { %v4980_v46 = vpack.c.bf16 %v2871_v44, %v2870_v43  ;;  %v5662_v47 = vpop.f32.mrb[112].mxu1 }
 0x2b5   : > { %5161 = vst [vmem:[%s6390_s7 + $0x1b8] sm:$0xff] %v4985_v45   ;;  %v2580_v48 = vadd.f32 %v6551_v52, %v5662_v47  ;;  %v2571_v49 = vpop.f32.mrb[113].mxu1 }
 0x2b6   : > { %5160 = vst [vmem:[%s6390_s7 + $0x1b0] sm:$0xff] %v4980_v46   ;;  %v2572_v50 = vadd.f32 %v6551_v52, %v2571_v49  ;;  %v5663_v51 = vpop.f32.mrb[114].mxu1 }
 0x2b7   : > { %v2583_v53 = vadd.f32 %v6551_v52, %v5663_v51  ;;  %v2574_v54 = vpop.f32.mrb[115].mxu1  ;;  %v2876_v56 = vmax.f32 %v2580_v48, 0.0 }
 0x2b8   : > { %v2575_v55 = vadd.f32 %v6551_v52, %v2574_v54  ;;  %v2874_v58 = vmax.f32 %v2572_v50, 0.0 }
 0x2b9   : > { %v2877_v57 = vmax.f32 %v2583_v53, 0.0 }
 0x2ba   : > { %v2875_v59 = vmax.f32 %v2575_v55, 0.0 }
 0x2bb   : > { %v4995_v60 = vpack.c.bf16 %v2877_v57, %v2876_v56 }
 0x2bc   : > { %v4990_v61 = vpack.c.bf16 %v2875_v59, %v2874_v58  ;;  %v5666_v62 = vpop.f32.mrb[116].mxu1 }
 0x2bd   : > { %5163 = vst [vmem:[%s6390_s7 + $0x1c8] sm:$0xff] %v4995_v60   ;;  %v2596_v42 = vadd.f32 %v6551_v52, %v5666_v62  ;;  %v2587_v63 = vpop.f32.mrb[117].mxu1 }
 0x2be   : > { %5162 = vst [vmem:[%s6390_s7 + $0x1c0] sm:$0xff] %v4990_v61   ;;  %v2588_v1 = vadd.f32 %v6551_v52, %v2587_v63  ;;  %v5667_v2 = vpop.f32.mrb[118].mxu1 }
 0x2bf   : > { %v2599_v3 = vadd.f32 %v6551_v52, %v5667_v2  ;;  %v2590_v4 = vpop.f32.mrb[119].mxu1  ;;  %v2880_v8 = vmax.f32 %v2596_v42, 0.0 }
 0x2c0   : > { %v2591_v5 = vadd.f32 %v6551_v52, %v2590_v4  ;;  %v2878_v7 = vmax.f32 %v2588_v1, 0.0 }
 0x2c1   : > { %v2881_v6 = vmax.f32 %v2599_v3, 0.0 }
 0x2c2   : > { %v2879_v9 = vmax.f32 %v2591_v5, 0.0 }
 0x2c3   : > { %v5005_v10 = vpack.c.bf16 %v2881_v6, %v2880_v8 }
 0x2c4   : > { %v5000_v11 = vpack.c.bf16 %v2879_v9, %v2878_v7  ;;  %v5670_v12 = vpop.f32.mrb[120].mxu1 }
 0x2c5   : > { %5165 = vst [vmem:[%s6390_s7 + $0x1d8] sm:$0xff] %v5005_v10   ;;  %v2612_v13 = vadd.f32 %v6551_v52, %v5670_v12  ;;  %v2603_v14 = vpop.f32.mrb[121].mxu1 }
 0x2c6   : > { %5164 = vst [vmem:[%s6390_s7 + $0x1d0] sm:$0xff] %v5000_v11   ;;  %v2604_v15 = vadd.f32 %v6551_v52, %v2603_v14  ;;  %v5671_v16 = vpop.f32.mrb[122].mxu1 }
 0x2c7   : > { %v2615_v0 = vadd.f32 %v6551_v52, %v5671_v16  ;;  %v2606_v17 = vpop.f32.mrb[123].mxu1  ;;  %v2884_v19 = vmax.f32 %v2612_v13, 0.0 }
 0x2c8   : > { %v2607_v18 = vadd.f32 %v6551_v52, %v2606_v17  ;;  %v2882_v21 = vmax.f32 %v2604_v15, 0.0 }
 0x2c9   : > { %v2885_v20 = vmax.f32 %v2615_v0, 0.0 }
 0x2ca   : > { %v2883_v22 = vmax.f32 %v2607_v18, 0.0 }
 0x2cb   : > { %v5015_v23 = vpack.c.bf16 %v2885_v20, %v2884_v19 }
 0x2cc   : > { %v5010_v24 = vpack.c.bf16 %v2883_v22, %v2882_v21  ;;  %v5674_v25 = vpop.f32.mrb[124].mxu1 }
 0x2cd   : > { %5167 = vst [vmem:[%s6390_s7 + $0x1e8] sm:$0xff] %v5015_v23   ;;  %v2628_v26 = vadd.f32 %v6551_v52, %v5674_v25  ;;  %v2619_v27 = vpop.f32.mrb[125].mxu1 }
 0x2ce   : > { %5166 = vst [vmem:[%s6390_s7 + $0x1e0] sm:$0xff] %v5010_v24   ;;  %v2620_v28 = vadd.f32 %v6551_v52, %v2619_v27  ;;  %v5675_v29 = vpop.f32.mrb[126].mxu1 }
 0x2cf   : > { %v2631_v30 = vadd.f32 %v6551_v52, %v5675_v29  ;;  %v2622_v31 = vpop.f32.mrb[127].mxu1  ;;  %v2888_v33 = vmax.f32 %v2628_v26, 0.0 }
 0x2d0   : > { %v2623_v32 = vadd.f32 %v6551_v52, %v2622_v31  ;;  %v2886_v35 = vmax.f32 %v2620_v28, 0.0 }
 0x2d1   : > { %v2889_v34 = vmax.f32 %v2631_v30, 0.0 }
 0x2d2   : > { %v2887_v36 = vmax.f32 %v2623_v32, 0.0 }
 0x2d3   : > { %v5025_v37 = vpack.c.bf16 %v2889_v34, %v2888_v33 }
 0x2d4   : > { %v5020_v38 = vpack.c.bf16 %v2887_v36, %v2886_v35  ;;  %v5678_v39 = vpop.f32.mrb[128].mxu1 }
 0x2d5   : > { %5169 = vst [vmem:[%s6390_s7 + $0x1f8] sm:$0xff] %v5025_v37   ;;  %v2644_v40 = vadd.f32 %v6551_v52, %v5678_v39  ;;  %v2635_v41 = vpop.f32.mrb[129].mxu1 }
 0x2d6   : > { %5168 = vst [vmem:[%s6390_s7 + $0x1f0] sm:$0xff] %v5020_v38   ;;  %v2636_v43 = vadd.f32 %v6551_v52, %v2635_v41  ;;  %v5679_v44 = vpop.f32.mrb[130].mxu1 }
 0x2d7   : > { %v2647_v45 = vadd.f32 %v6551_v52, %v5679_v44  ;;  %v2638_v46 = vpop.f32.mrb[131].mxu1  ;;  %v2892_v48 = vmax.f32 %v2644_v40, 0.0 }
 0x2d8   : > { %v2639_v47 = vadd.f32 %v6551_v52, %v2638_v46  ;;  %v2890_v50 = vmax.f32 %v2636_v43, 0.0 }
 0x2d9   : > { %v2893_v49 = vmax.f32 %v2647_v45, 0.0 }
 0x2da   : > { %v2891_v51 = vmax.f32 %v2639_v47, 0.0 }
 0x2db   : > { %v5035_v53 = vpack.c.bf16 %v2893_v49, %v2892_v48 }
 0x2dc   : > { %v5030_v54 = vpack.c.bf16 %v2891_v51, %v2890_v50  ;;  %v5682_v55 = vpop.f32.mrb[132].mxu1 }
 0x2dd   : > { %5171 = vst [vmem:[%s6390_s7 + $0x208] sm:$0xff] %v5035_v53   ;;  %v2660_v56 = vadd.f32 %v6551_v52, %v5682_v55  ;;  %v2651_v57 = vpop.f32.mrb[133].mxu1 }
 0x2de   : > { %5170 = vst [vmem:[%s6390_s7 + $0x200] sm:$0xff] %v5030_v54   ;;  %v2652_v58 = vadd.f32 %v6551_v52, %v2651_v57  ;;  %v5683_v59 = vpop.f32.mrb[134].mxu1 }
 0x2df   : > { %v2663_v60 = vadd.f32 %v6551_v52, %v5683_v59  ;;  %v2654_v61 = vpop.f32.mrb[135].mxu1  ;;  %v2896_v42 = vmax.f32 %v2660_v56, 0.0 }
 0x2e0   : > { %v2655_v62 = vadd.f32 %v6551_v52, %v2654_v61  ;;  %v2894_v1 = vmax.f32 %v2652_v58, 0.0 }
 0x2e1   : > { %v2897_v63 = vmax.f32 %v2663_v60, 0.0 }
 0x2e2   : > { %v2895_v2 = vmax.f32 %v2655_v62, 0.0 }
 0x2e3   : > { %v5045_v3 = vpack.c.bf16 %v2897_v63, %v2896_v42 }
 0x2e4   : > { %v5040_v4 = vpack.c.bf16 %v2895_v2, %v2894_v1  ;;  %v5686_v5 = vpop.f32.mrb[136].mxu1 }
 0x2e5   : > { %5173 = vst [vmem:[%s6390_s7 + $0x218] sm:$0xff] %v5045_v3   ;;  %v2676_v8 = vadd.f32 %v6551_v52, %v5686_v5  ;;  %v2667_v6 = vpop.f32.mrb[137].mxu1 }
 0x2e6   : > { %5172 = vst [vmem:[%s6390_s7 + $0x210] sm:$0xff] %v5040_v4   ;;  %v2668_v7 = vadd.f32 %v6551_v52, %v2667_v6  ;;  %v5687_v9 = vpop.f32.mrb[138].mxu1 }
 0x2e7   : > { %v2679_v10 = vadd.f32 %v6551_v52, %v5687_v9  ;;  %v2670_v11 = vpop.f32.mrb[139].mxu1  ;;  %v2900_v13 = vmax.f32 %v2676_v8, 0.0 }
 0x2e8   : > { %v2671_v12 = vadd.f32 %v6551_v52, %v2670_v11  ;;  %v2898_v15 = vmax.f32 %v2668_v7, 0.0 }
 0x2e9   : > { %v2901_v14 = vmax.f32 %v2679_v10, 0.0 }
 0x2ea   : > { %v2899_v16 = vmax.f32 %v2671_v12, 0.0 }
 0x2eb   : > { %v5055_v0 = vpack.c.bf16 %v2901_v14, %v2900_v13 }
 0x2ec   : > { %v5050_v17 = vpack.c.bf16 %v2899_v16, %v2898_v15  ;;  %v5690_v18 = vpop.f32.mrb[140].mxu1 }
 0x2ed   : > { %5175 = vst [vmem:[%s6390_s7 + $0x228] sm:$0xff] %v5055_v0   ;;  %v2692_v19 = vadd.f32 %v6551_v52, %v5690_v18  ;;  %v2683_v20 = vpop.f32.mrb[141].mxu1 }
 0x2ee   : > { %5174 = vst [vmem:[%s6390_s7 + $0x220] sm:$0xff] %v5050_v17   ;;  %v2684_v21 = vadd.f32 %v6551_v52, %v2683_v20  ;;  %v5691_v22 = vpop.f32.mrb[142].mxu1 }
 0x2ef   : > { %v2695_v23 = vadd.f32 %v6551_v52, %v5691_v22  ;;  %v2686_v24 = vpop.f32.mrb[143].mxu1  ;;  %v2904_v26 = vmax.f32 %v2692_v19, 0.0 }
 0x2f0   : > { %v2687_v25 = vadd.f32 %v6551_v52, %v2686_v24  ;;  %v2902_v28 = vmax.f32 %v2684_v21, 0.0 }
 0x2f1   : > { %v2905_v27 = vmax.f32 %v2695_v23, 0.0 }
 0x2f2   : > { %v2903_v29 = vmax.f32 %v2687_v25, 0.0 }
 0x2f3   : > { %v5065_v30 = vpack.c.bf16 %v2905_v27, %v2904_v26 }
 0x2f4   : > { %v5060_v31 = vpack.c.bf16 %v2903_v29, %v2902_v28  ;;  %v5694_v32 = vpop.f32.mrb[144].mxu1 }
 0x2f5   : > { %5177 = vst [vmem:[%s6390_s7 + $0x238] sm:$0xff] %v5065_v30   ;;  %v2708_v33 = vadd.f32 %v6551_v52, %v5694_v32  ;;  %v2699_v34 = vpop.f32.mrb[145].mxu1 }
 0x2f6   : > { %5176 = vst [vmem:[%s6390_s7 + $0x230] sm:$0xff] %v5060_v31   ;;  %v2700_v35 = vadd.f32 %v6551_v52, %v2699_v34  ;;  %v5695_v36 = vpop.f32.mrb[146].mxu1 }
 0x2f7   : > { %v2711_v37 = vadd.f32 %v6551_v52, %v5695_v36  ;;  %v2702_v38 = vpop.f32.mrb[147].mxu1  ;;  %v2908_v40 = vmax.f32 %v2708_v33, 0.0 }
 0x2f8   : > { %v2703_v39 = vadd.f32 %v6551_v52, %v2702_v38  ;;  %v2906_v43 = vmax.f32 %v2700_v35, 0.0 }
 0x2f9   : > { %v2909_v41 = vmax.f32 %v2711_v37, 0.0 }
 0x2fa   : > { %v2907_v44 = vmax.f32 %v2703_v39, 0.0 }
 0x2fb   : > { %v5075_v45 = vpack.c.bf16 %v2909_v41, %v2908_v40 }
 0x2fc   : > { %v5070_v46 = vpack.c.bf16 %v2907_v44, %v2906_v43  ;;  %v5698_v47 = vpop.f32.mrb[148].mxu1 }
 0x2fd   : > { %5179 = vst [vmem:[%s6390_s7 + $0x248] sm:$0xff] %v5075_v45   ;;  %v2724_v48 = vadd.f32 %v6551_v52, %v5698_v47  ;;  %v2715_v49 = vpop.f32.mrb[149].mxu1 }
 0x2fe   : > { %5178 = vst [vmem:[%s6390_s7 + $0x240] sm:$0xff] %v5070_v46   ;;  %v2716_v50 = vadd.f32 %v6551_v52, %v2715_v49  ;;  %v5699_v51 = vpop.f32.mrb[150].mxu1 }
 0x2ff   : > { %v2727_v53 = vadd.f32 %v6551_v52, %v5699_v51  ;;  %v2718_v54 = vpop.f32.mrb[151].mxu1  ;;  %v2912_v56 = vmax.f32 %v2724_v48, 0.0 }
 0x300   : > { %v2719_v55 = vadd.f32 %v6551_v52, %v2718_v54  ;;  %v2910_v58 = vmax.f32 %v2716_v50, 0.0 }
 0x301   : > { %v2913_v57 = vmax.f32 %v2727_v53, 0.0 }
 0x302   : > { %v2911_v59 = vmax.f32 %v2719_v55, 0.0 }
 0x303   : > { %v5085_v60 = vpack.c.bf16 %v2913_v57, %v2912_v56 }
 0x304   : > { %v5080_v61 = vpack.c.bf16 %v2911_v59, %v2910_v58  ;;  %v5702_v62 = vpop.f32.mrb[152].mxu1 }
 0x305   : > { %5181 = vst [vmem:[%s6390_s7 + $0x258] sm:$0xff] %v5085_v60   ;;  %v2740_v42 = vadd.f32 %v6551_v52, %v5702_v62  ;;  %v2731_v63 = vpop.f32.mrb[153].mxu1 }
 0x306   : > { %5180 = vst [vmem:[%s6390_s7 + $0x250] sm:$0xff] %v5080_v61   ;;  %v2732_v1 = vadd.f32 %v6551_v52, %v2731_v63  ;;  %v5703_v2 = vpop.f32.mrb[154].mxu1 }
 0x307   : > { %v2743_v3 = vadd.f32 %v6551_v52, %v5703_v2  ;;  %v2734_v4 = vpop.f32.mrb[155].mxu1  ;;  %v2916_v8 = vmax.f32 %v2740_v42, 0.0 }
 0x308   : > { %v2735_v5 = vadd.f32 %v6551_v52, %v2734_v4  ;;  %v2914_v7 = vmax.f32 %v2732_v1, 0.0 }
 0x309   : > { %v2917_v6 = vmax.f32 %v2743_v3, 0.0 }
 0x30a   : > { %v2915_v9 = vmax.f32 %v2735_v5, 0.0 }
 0x30b   : > { %v5095_v10 = vpack.c.bf16 %v2917_v6, %v2916_v8 }
 0x30c   : > { %v5090_v11 = vpack.c.bf16 %v2915_v9, %v2914_v7  ;;  %v5706_v12 = vpop.f32.mrb[156].mxu1 }
 0x30d   : > { %5183 = vst [vmem:[%s6390_s7 + $0x268] sm:$0xff] %v5095_v10   ;;  %v2756_v13 = vadd.f32 %v6551_v52, %v5706_v12  ;;  %v2747_v14 = vpop.f32.mrb[157].mxu1 }
 0x30e   : > { %5182 = vst [vmem:[%s6390_s7 + $0x260] sm:$0xff] %v5090_v11   ;;  %v2748_v15 = vadd.f32 %v6551_v52, %v2747_v14  ;;  %v5707_v16 = vpop.f32.mrb[158].mxu1 }
 0x30f   : > { %v2759_v0 = vadd.f32 %v6551_v52, %v5707_v16  ;;  %v2750_v17 = vpop.f32.mrb[159].mxu1  ;;  %v2920_v19 = vmax.f32 %v2756_v13, 0.0 }
 0x310   : > { %v2751_v18 = vadd.f32 %v6551_v52, %v2750_v17  ;;  %v2918_v21 = vmax.f32 %v2748_v15, 0.0  ;;  %3728 = sbr.rel (!%p6038_p4) target bundleno = 882 (0x372), region = 44 }
 0x311   : > { %v2921_v20 = vmax.f32 %v2759_v0, 0.0 }
 0x312   : > { %v2919_v22 = vmax.f32 %v2751_v18, 0.0 }
 0x313   : > { %v5105_v23 = vpack.c.bf16 %v2921_v20, %v2920_v19 }
 0x314   : > { %v5100_v24 = vpack.c.bf16 %v2919_v22, %v2918_v21 }
 0x315   : > { %5185 = vst [vmem:[%s6390_s7 + $0x278] sm:$0xff] %v5105_v23  }
 0x316   : > { %5184 = vst [vmem:[%s6390_s7 + $0x270] sm:$0xff] %v5100_v24  }
 0x317   : > { %s6890_s10 = smov (!%p3731_p8, %s3730_s10), 160 }
 0x318   : > { %s4529_s15 = sshll.u32 %s6890_s10, 6 }
 0x319   : > { %p4532_p9 = scmp.eq.s32.totalorder %s4529_s15, 0 }
 0x31a   : > { %s6690_s16 = sshrl.u32 (!%p4532_p9), %s6890_s10, 6 }
 0x31b   : > { %3739 = sbr.rel (%p4532_p9) target bundleno = 882 (0x372), region = 48  ;;  %p4533_p10 = scmp.le.s32.totalorder (!%p4532_p9), %s6690_s16, 0 }
 0x322   : > { %4144 = sbr.rel (%p4533_p10) target bundleno = 861 (0x35d), region = 120  ;;  %s6883_s21 = smov (!%p4533_p10), %s6684_s14 }
 0x323   : > { %s6884_s26 = smov (!%p4533_p10), %s6390_s7  ;;  %s6699_s6 = smov (!%p4533_p10), 0  }
 0x324   : > { %s6701_s20 = smov (!%p4533_p10), 0  }
 0x329 LB: >> { %v3755_v52 = vld [vmem:[%s5956_s26] sm:$0xf]  ;;  %v3757_v25 = vld [vmem:[%s5956_s26 + $0x4] sm:$0xf]  ;;  %v3759_v26 = vld [vmem:[%s5956_s26 + $0x8] sm:$0xf]  ;;  %s5964_s20 = sphi %s6701_s20, %s3749_s20   ;;  %s5960_s6 = sphi %s6699_s6, %s6885_s6   ;;  %s5956_s26 = sphi %s6884_s26, %s3888_s26   ;;  %s5952_s21 = sphi %s6883_s21, %s3889_s21  }
 0x32a   : >> { %3756 = vst [vmem:[%s5952_s21] sm:$0xf] %v3755_v52  ;;  %3758 = vst [vmem:[%s5952_s21 + $0x4] sm:$0xf] %v3757_v25  ;;  %v3761_v27 = vld [vmem:[%s5956_s26 + $0xc] sm:$0xf]  ;;  %s3883_s23 = sadd.s32 1, %s5960_s6 }
 0x32b   : >> { %3760 = vst [vmem:[%s5952_s21 + $0x8] sm:$0xf] %v3759_v26  ;;  %v3763_v28 = vld [vmem:[%s5956_s26 + $0x10] sm:$0xf]  ;;  %v3765_v29 = vld [vmem:[%s5956_s26 + $0x14] sm:$0xf]  ;;  %p3884_p11 = scmp.ge.s32.totalorder %s3883_s23, %s6690_s16 }
 0x32c   : >> { %3762 = vst [vmem:[%s5952_s21 + $0xc] sm:$0xf] %v3761_v27  ;;  %3764 = vst [vmem:[%s5952_s21 + $0x10] sm:$0xf] %v3763_v28  ;;  %v3767_v30 = vld [vmem:[%s5956_s26 + $0x18] sm:$0xf] }
 0x32d   : >> { %3766 = vst [vmem:[%s5952_s21 + $0x14] sm:$0xf] %v3765_v29  ;;  %v3769_v31 = vld [vmem:[%s5956_s26 + $0x1c] sm:$0xf]  ;;  %v3771_v32 = vld [vmem:[%s5956_s26 + $0x20] sm:$0xf] }
 0x32e   : >> { %3768 = vst [vmem:[%s5952_s21 + $0x18] sm:$0xf] %v3767_v30  ;;  %3770 = vst [vmem:[%s5952_s21 + $0x1c] sm:$0xf] %v3769_v31  ;;  %v3773_v33 = vld [vmem:[%s5956_s26 + $0x24] sm:$0xf] }
 0x32f   : >> { %3772 = vst [vmem:[%s5952_s21 + $0x20] sm:$0xf] %v3771_v32  ;;  %v3775_v34 = vld [vmem:[%s5956_s26 + $0x28] sm:$0xf]  ;;  %v3777_v35 = vld [vmem:[%s5956_s26 + $0x2c] sm:$0xf] }
 0x330   : >> { %3774 = vst [vmem:[%s5952_s21 + $0x24] sm:$0xf] %v3773_v33  ;;  %3776 = vst [vmem:[%s5952_s21 + $0x28] sm:$0xf] %v3775_v34  ;;  %v3779_v36 = vld [vmem:[%s5956_s26 + $0x30] sm:$0xf] }
 0x331   : >> { %3778 = vst [vmem:[%s5952_s21 + $0x2c] sm:$0xf] %v3777_v35  ;;  %v3781_v37 = vld [vmem:[%s5956_s26 + $0x34] sm:$0xf]  ;;  %v3783_v38 = vld [vmem:[%s5956_s26 + $0x38] sm:$0xf] }
 0x332   : >> { %3780 = vst [vmem:[%s5952_s21 + $0x30] sm:$0xf] %v3779_v36  ;;  %3782 = vst [vmem:[%s5952_s21 + $0x34] sm:$0xf] %v3781_v37  ;;  %v3785_v39 = vld [vmem:[%s5956_s26 + $0x3c] sm:$0xf] }
 0x333   : >> { %3784 = vst [vmem:[%s5952_s21 + $0x38] sm:$0xf] %v3783_v38  ;;  %v3787_v40 = vld [vmem:[%s5956_s26 + $0x40] sm:$0xf]  ;;  %v3789_v41 = vld [vmem:[%s5956_s26 + $0x44] sm:$0xf] }
 0x334   : >> { %3786 = vst [vmem:[%s5952_s21 + $0x3c] sm:$0xf] %v3785_v39  ;;  %3788 = vst [vmem:[%s5952_s21 + $0x40] sm:$0xf] %v3787_v40  ;;  %v3791_v43 = vld [vmem:[%s5956_s26 + $0x48] sm:$0xf] }
 0x335   : >> { %3790 = vst [vmem:[%s5952_s21 + $0x44] sm:$0xf] %v3789_v41  ;;  %v3793_v44 = vld [vmem:[%s5956_s26 + $0x4c] sm:$0xf]  ;;  %v3795_v45 = vld [vmem:[%s5956_s26 + $0x50] sm:$0xf] }
 0x336   : >> { %3792 = vst [vmem:[%s5952_s21 + $0x48] sm:$0xf] %v3791_v43  ;;  %3794 = vst [vmem:[%s5952_s21 + $0x4c] sm:$0xf] %v3793_v44  ;;  %v3797_v46 = vld [vmem:[%s5956_s26 + $0x54] sm:$0xf] }
 0x337   : >> { %3796 = vst [vmem:[%s5952_s21 + $0x50] sm:$0xf] %v3795_v45  ;;  %v3799_v47 = vld [vmem:[%s5956_s26 + $0x58] sm:$0xf]  ;;  %v3801_v48 = vld [vmem:[%s5956_s26 + $0x5c] sm:$0xf] }
 0x338   : >> { %3798 = vst [vmem:[%s5952_s21 + $0x54] sm:$0xf] %v3797_v46  ;;  %3800 = vst [vmem:[%s5952_s21 + $0x58] sm:$0xf] %v3799_v47  ;;  %v3803_v49 = vld [vmem:[%s5956_s26 + $0x60] sm:$0xf] }
 0x339   : >> { %3802 = vst [vmem:[%s5952_s21 + $0x5c] sm:$0xf] %v3801_v48  ;;  %v3805_v50 = vld [vmem:[%s5956_s26 + $0x64] sm:$0xf]  ;;  %v3807_v51 = vld [vmem:[%s5956_s26 + $0x68] sm:$0xf] }
 0x33a   : >> { %3804 = vst [vmem:[%s5952_s21 + $0x60] sm:$0xf] %v3803_v49  ;;  %3806 = vst [vmem:[%s5952_s21 + $0x64] sm:$0xf] %v3805_v50  ;;  %v3809_v53 = vld [vmem:[%s5956_s26 + $0x6c] sm:$0xf] }
 0x33b   : >> { %3808 = vst [vmem:[%s5952_s21 + $0x68] sm:$0xf] %v3807_v51  ;;  %v3811_v54 = vld [vmem:[%s5956_s26 + $0x70] sm:$0xf]  ;;  %v3813_v55 = vld [vmem:[%s5956_s26 + $0x74] sm:$0xf] }
 0x33c   : >> { %3810 = vst [vmem:[%s5952_s21 + $0x6c] sm:$0xf] %v3809_v53  ;;  %3812 = vst [vmem:[%s5952_s21 + $0x70] sm:$0xf] %v3811_v54  ;;  %v3815_v56 = vld [vmem:[%s5956_s26 + $0x78] sm:$0xf] }
 0x33d   : >> { %3814 = vst [vmem:[%s5952_s21 + $0x74] sm:$0xf] %v3813_v55  ;;  %v3817_v57 = vld [vmem:[%s5956_s26 + $0x7c] sm:$0xf]  ;;  %v3819_v58 = vld [vmem:[%s5956_s26 + $0x80] sm:$0xf] }
 0x33e   : >> { %3816 = vst [vmem:[%s5952_s21 + $0x78] sm:$0xf] %v3815_v56  ;;  %3818 = vst [vmem:[%s5952_s21 + $0x7c] sm:$0xf] %v3817_v57  ;;  %v3821_v59 = vld [vmem:[%s5956_s26 + $0x84] sm:$0xf] }
 0x33f   : >> { %3820 = vst [vmem:[%s5952_s21 + $0x80] sm:$0xf] %v3819_v58  ;;  %v3823_v60 = vld [vmem:[%s5956_s26 + $0x88] sm:$0xf]  ;;  %v3825_v61 = vld [vmem:[%s5956_s26 + $0x8c] sm:$0xf] }
 0x340   : >> { %3822 = vst [vmem:[%s5952_s21 + $0x84] sm:$0xf] %v3821_v59  ;;  %3824 = vst [vmem:[%s5952_s21 + $0x88] sm:$0xf] %v3823_v60  ;;  %v3827_v62 = vld [vmem:[%s5956_s26 + $0x90] sm:$0xf] }
 0x341   : >> { %3826 = vst [vmem:[%s5952_s21 + $0x8c] sm:$0xf] %v3825_v61  ;;  %v3829_v42 = vld [vmem:[%s5956_s26 + $0x94] sm:$0xf]  ;;  %v3831_v63 = vld [vmem:[%s5956_s26 + $0x98] sm:$0xf] }
 0x342   : >> { %3828 = vst [vmem:[%s5952_s21 + $0x90] sm:$0xf] %v3827_v62  ;;  %3830 = vst [vmem:[%s5952_s21 + $0x94] sm:$0xf] %v3829_v42  ;;  %v3833_v1 = vld [vmem:[%s5956_s26 + $0x9c] sm:$0xf] }
 0x343   : >> { %3832 = vst [vmem:[%s5952_s21 + $0x98] sm:$0xf] %v3831_v63  ;;  %v3835_v2 = vld [vmem:[%s5956_s26 + $0xa0] sm:$0xf]  ;;  %v3837_v3 = vld [vmem:[%s5956_s26 + $0xa4] sm:$0xf] }
 0x344   : >> { %3834 = vst [vmem:[%s5952_s21 + $0x9c] sm:$0xf] %v3833_v1  ;;  %3836 = vst [vmem:[%s5952_s21 + $0xa0] sm:$0xf] %v3835_v2  ;;  %v3839_v4 = vld [vmem:[%s5956_s26 + $0xa8] sm:$0xf] }
 0x345   : >> { %3838 = vst [vmem:[%s5952_s21 + $0xa4] sm:$0xf] %v3837_v3  ;;  %v3841_v5 = vld [vmem:[%s5956_s26 + $0xac] sm:$0xf]  ;;  %v3843_v8 = vld [vmem:[%s5956_s26 + $0xb0] sm:$0xf] }
 0x346   : >> { %3840 = vst [vmem:[%s5952_s21 + $0xa8] sm:$0xf] %v3839_v4  ;;  %3842 = vst [vmem:[%s5952_s21 + $0xac] sm:$0xf] %v3841_v5  ;;  %v3845_v6 = vld [vmem:[%s5956_s26 + $0xb4] sm:$0xf] }
 0x347   : >> { %3844 = vst [vmem:[%s5952_s21 + $0xb0] sm:$0xf] %v3843_v8  ;;  %v3847_v7 = vld [vmem:[%s5956_s26 + $0xb8] sm:$0xf]  ;;  %v3849_v9 = vld [vmem:[%s5956_s26 + $0xbc] sm:$0xf] }
 0x348   : >> { %3846 = vst [vmem:[%s5952_s21 + $0xb4] sm:$0xf] %v3845_v6  ;;  %3848 = vst [vmem:[%s5952_s21 + $0xb8] sm:$0xf] %v3847_v7  ;;  %v3851_v10 = vld [vmem:[%s5956_s26 + $0xc0] sm:$0xf] }
 0x349   : >> { %3850 = vst [vmem:[%s5952_s21 + $0xbc] sm:$0xf] %v3849_v9  ;;  %v3853_v11 = vld [vmem:[%s5956_s26 + $0xc4] sm:$0xf]  ;;  %v3855_v12 = vld [vmem:[%s5956_s26 + $0xc8] sm:$0xf] }
 0x34a   : >> { %3852 = vst [vmem:[%s5952_s21 + $0xc0] sm:$0xf] %v3851_v10  ;;  %3854 = vst [vmem:[%s5952_s21 + $0xc4] sm:$0xf] %v3853_v11  ;;  %v3857_v13 = vld [vmem:[%s5956_s26 + $0xcc] sm:$0xf] }
 0x34b   : >> { %3856 = vst [vmem:[%s5952_s21 + $0xc8] sm:$0xf] %v3855_v12  ;;  %v3859_v14 = vld [vmem:[%s5956_s26 + $0xd0] sm:$0xf]  ;;  %v3861_v15 = vld [vmem:[%s5956_s26 + $0xd4] sm:$0xf] }
 0x34c   : >> { %3858 = vst [vmem:[%s5952_s21 + $0xcc] sm:$0xf] %v3857_v13  ;;  %3860 = vst [vmem:[%s5952_s21 + $0xd0] sm:$0xf] %v3859_v14  ;;  %v3863_v16 = vld [vmem:[%s5956_s26 + $0xd8] sm:$0xf] }
 0x34d   : >> { %3862 = vst [vmem:[%s5952_s21 + $0xd4] sm:$0xf] %v3861_v15  ;;  %v3865_v0 = vld [vmem:[%s5956_s26 + $0xdc] sm:$0xf]  ;;  %v3867_v17 = vld [vmem:[%s5956_s26 + $0xe0] sm:$0xf] }
 0x34e   : >> { %3864 = vst [vmem:[%s5952_s21 + $0xd8] sm:$0xf] %v3863_v16  ;;  %3866 = vst [vmem:[%s5952_s21 + $0xdc] sm:$0xf] %v3865_v0  ;;  %v3869_v18 = vld [vmem:[%s5956_s26 + $0xe4] sm:$0xf] }
 0x34f   : >> { %3868 = vst [vmem:[%s5952_s21 + $0xe0] sm:$0xf] %v3867_v17  ;;  %v3871_v19 = vld [vmem:[%s5956_s26 + $0xe8] sm:$0xf]  ;;  %v3873_v20 = vld [vmem:[%s5956_s26 + $0xec] sm:$0xf] }
 0x350   : >> { %3870 = vst [vmem:[%s5952_s21 + $0xe4] sm:$0xf] %v3869_v18  ;;  %3872 = vst [vmem:[%s5952_s21 + $0xe8] sm:$0xf] %v3871_v19  ;;  %v3875_v21 = vld [vmem:[%s5956_s26 + $0xf0] sm:$0xf] }
 0x351   : >> { %3874 = vst [vmem:[%s5952_s21 + $0xec] sm:$0xf] %v3873_v20  ;;  %v3877_v22 = vld [vmem:[%s5956_s26 + $0xf4] sm:$0xf]  ;;  %v3879_v23 = vld [vmem:[%s5956_s26 + $0xf8] sm:$0xf] }
 0x352   : >> { %3876 = vst [vmem:[%s5952_s21 + $0xf0] sm:$0xf] %v3875_v21  ;;  %3878 = vst [vmem:[%s5952_s21 + $0xf4] sm:$0xf] %v3877_v22  ;;  %v3881_v24 = vld [vmem:[%s5956_s26 + $0xfc] sm:$0xf] }
 0x353   : >> { %3880 = vst [vmem:[%s5952_s21 + $0xf8] sm:$0xf] %v3879_v23  ;;  %3882 = vst [vmem:[%s5952_s21 + $0xfc] sm:$0xf] %v3881_v24  ;;  %s6892_s23 = smov (%p3884_p11, %s3883_s23), 0  ;;  %s3749_s20 = sadd.s32 1, %s5964_s20  }
 0x354   : >> { %s4534_s24 = sshll.u32 %s6892_s23, 8  ;;  %p3748_p12 = scmp.ge.s32.totalorder %s3749_s20, %s6690_s16 }
 0x355   : >> { %s3888_s26 = scalar_lea.vmem %s6390_s7, %s4534_s24 [#allocation2]   ;;  %s3889_s21 = scalar_lea.vmem %s6684_s14, %s4534_s24  }
 0x356   : >> { %s6885_s6 = smov %s6892_s23  ;;  %3751 = sbr.rel (!%p3748_p12) target bundleno = 809 (0x329), region = 126 }
 0x35d PF: > { %s6858_s17 = sand.u32 63, %s6890_s10   ;;  %s4705_s27 = sshll.u32 %s6690_s16, 8 }
 0x35e   : > { %s3894_s28 = scalar_lea.vmem %s6390_s7, %s4705_s27 [#allocation2]   ;;  %s3896_s29 = scalar_lea.vmem %s6684_s14, %s4705_s27  }
 0x35f   : > { %p4539_p13 = scmp.le.s32.totalorder %s6858_s17, 0 }
 0x360   : > { %s5966_s18 = smov (!%p4539_p13), %s3896_s29   ;;  %s5970_s30 = smov (!%p4539_p13), %s3894_s28  }
 0x361   : > { %4158 = sbr.rel (%p4539_p13) target bundleno = 882 (0x372), region = 131  ;;  %s5974_s8 = smov (!%p4539_p13), 0  }
 0x362   : > { %s5978_s9 = smov (!%p4539_p13), 0  }
 0x368 LB: >> { %v3906_v52 = vld [vmem:[%s5972_s30] sm:$0xf]  ;;  %s3908_s10 = sadd.s32 1, %s5976_s8  ;;  %s3900_s9 = sadd.s32 1, %s5980_s9   ;;  %s5980_s9 = sphi %s5978_s9, %s3900_s9   ;;  %s5976_s8 = sphi %s5974_s8, %s5975_s8   ;;  %s5972_s30 = sphi %s5970_s30, %s3913_s30   ;;  %s5968_s18 = sphi %s5966_s18, %s3914_s18  }
 0x369   : >> { %3907 = vst [vmem:[%s5968_s18] sm:$0xf] %v3906_v52  ;;  %p3909_p0 = scmp.ge.s32.totalorder %s3908_s10, %s6858_s17  ;;  %p3899_p1 = scmp.ge.s32.totalorder %s3900_s9, %s6858_s17 }
 0x36b   : >> { %s6894_s10 = smov (%p3909_p0, %s3908_s10), 0  ;;  %3902 = sbr.rel (!%p3899_p1) target bundleno = 872 (0x368), region = 137 }
 0x36c   : >> { %s4540_s7 = sshll.u32 %s6894_s10, 2  ;;  %s5975_s8 = smov %s6894_s10  }
 0x36d   : >> { %s3913_s30 = scalar_lea.vmem %s3894_s28, %s4540_s7 [#allocation2]   ;;  %s3914_s18 = scalar_lea.vmem %s3896_s29, %s4540_s7  }
 0x372 PF: > { %p12_p2 = scmp.ge.s32.totalorder %s6028_s22, 4   ;;  %s6886_s18 = smov %s5944_s19 }
 0x373   : > { %s6887_s19 = smov %s6036_s25  ;;  %s6888_s20 = smov %s6028_s22 }
 0x374   :  { %14 = sbr.rel (!%p12_p2) target bundleno = 2 (0x2), region = 148 }

// kernel: _forward.3
= control target key start
LH: loop header
LB: loop body
LE: loop exit
PB: predicated region body
PF: predicated region fallthrough
CT: control target
= control target key end

     0   :  { %s5983_s12 = smov 0   ;;  %s5985_s13 = smov 0   ;;  %s7453_s0 = inlined_call_operand.vmem [shape: bf16[1152,864], index: 0, kind: input, shape index: {}]   ;;  %s7454_s1 = inlined_call_operand.vmem [shape: bf16[864,128], index: 1, kind: input, shape index: {}]   ;;  %s7455_s2 = inlined_call_operand.vmem [shape: f32[1,128], index: 2, kind: input, shape index: {}]   ;;  %s7456_s3 = inlined_call_operand.vmem [shape: f32[1152,128], index: 3, kind: output, shape index: {}]  }
   0x1   :  { %s5987_s14 = smov 0  }
   0x2 LB: > { %s5996_s15 = sadd.s32 4294967295, %s5928_s14   ;;  %s5998_s16 = sadd.s32 1, %s5928_s14   ;;  %s5928_s14 = sphi %s5987_s14, %s7525_s14   ;;  %s5924_s13 = sphi %s5985_s13, %s7524_s13   ;;  %s5920_s12 = sphi %s5983_s12, %s7523_s12  }
   0x3   : > { %s85_s17 = ssub.s32 %s5928_s14, %s5998_s16  ;;  %s88_s18 = sadd.s32 1, %s5924_s13 }
   0x4   : > { %p86_p0 = scmp.eq.s32.totalorder %s85_s17, 0  ;;  %p98_p1 = scmp.ne.s32.totalorder %s5924_s13, %s5920_s12 }
   0x5   : > { %p99_p2 = scmp.eq.s32.totalorder %s5996_s15, 1  ;;  %p4443_p3 = scmp.ge.s32.totalorder %s5928_s14, 1 }
   0x6   : > { %s6006_s19 = scalar_select %p86_p0, %s5924_s13, %s88_s18  }
   0x7   : > { %p6008_p4 = por %p99_p2, %p98_p1  ;;  %p149_p5 = scmp.lt.s32.totalorder %s5928_s14, 3 }
   0x9   : > { %p150_p6 = pnand %p4443_p3, %p149_p5 }
   0xb   : > { %153 = sbr.rel (%p150_p6) target bundleno = 926 (0x39e), region = 32 }
  0x12   : > { %v5419_v0 = vld [vmem:[%s7454_s1] sm:$0xff]   ;;  %v5962_v1 = vmov 0   ;;  %v5421_v3 = vld [vmem:[%s7454_s1 + $0x8] sm:$0xff]   ;;  %v5423_v5 = vld [vmem:[%s7454_s1 + $0x10] sm:$0xff]   ;;  %s6059_s14 = smul.u32 80, %s5996_s15  ;;  %vm2360_vm0 = vcmask 785408  }
  0x13   : > { %2481 = vmatprep.subr.bf16.mxu1 %v5962_v1  ;;  %2834 = vmatprep.subr.bf16.mxu0 %v5962_v1  ;;  %v6020_v2 = vld [vmem:[%s7454_s1 + $0x80] sm:$0xff]   ;;  %v6030_v4 = vld [vmem:[%s7454_s1 + $0x88] sm:$0xff]   ;;  %v6041_v6 = vld [vmem:[%s7454_s1 + $0x90] sm:$0xff]   ;;  %s4835_s24 = smul.u32 (%p6008_p4), 640, %s5996_s15 }
  0x14   : > { %2482 = vmatpush1.bf16.msra.mxu1 %v5419_v0  ;;  %2835 = vmatpush1.bf16.msra.mxu0 %v6020_v2  ;;  %v5425_v7 = vld [vmem:[%s7454_s1 + $0x18] sm:$0xff]   ;;  %v5427_v9 = vld [vmem:[%s7454_s1 + $0x20] sm:$0xff]   ;;  %v5429_v11 = vld [vmem:[%s7454_s1 + $0x28] sm:$0xff]   ;;  %p184_p7 = scmp.lt.s32.totalorder %s6059_s14, 143  ;;  %s3981_s23 = ssub.s32 (%p6008_p4), 144, %s6059_s14 }
  0x15   : > { %2483 = vmatprep.subr.bf16.mxu1 %v5962_v1  ;;  %2836 = vmatprep.subr.bf16.mxu0 %v5962_v1  ;;  %v6052_v8 = vld [vmem:[%s7454_s1 + $0x98] sm:$0xff]   ;;  %v6066_v10 = vld [vmem:[%s7454_s1 + $0xa0] sm:$0xff]   ;;  %v6078_v12 = vld [vmem:[%s7454_s1 + $0xa8] sm:$0xff]   ;;  %p3982_p8 = scmp.lt.s32.totalorder (%p6008_p4), %s3981_s23, 80 }
  0x16   : > { %v5431_v13 = vld [vmem:[%s7454_s1 + $0x30] sm:$0xff]   ;;  %s185_s27 = scalar_select %p184_p7, %s6059_s14, 143  ;;  %v5433_v15 = vld [vmem:[%s7454_s1 + $0x38] sm:$0xff]   ;;  %v5435_v17 = vld [vmem:[%s7454_s1 + $0x40] sm:$0xff]  }
  0x17   : > { %v6090_v14 = vld [vmem:[%s7454_s1 + $0xb0] sm:$0xff]   ;;  %v6101_v16 = vld [vmem:[%s7454_s1 + $0xb8] sm:$0xff]   ;;  %v6117_v18 = vld [vmem:[%s7454_s1 + $0xc0] sm:$0xff]  }
  0x18   : > { %2484 = vmatpush1.bf16.msra.mxu1 %v5421_v3  ;;  %2837 = vmatpush1.bf16.msra.mxu0 %v6030_v4  ;;  %s5329_s5 = smul.u32 28, %s185_s27  ;;  %v5437_v20 = vld [vmem:[%s7454_s1 + $0x48] sm:$0xff]   ;;  %v5439_v23 = vld [vmem:[%s7454_s1 + $0x50] sm:$0xff]   ;;  %v5441_v25 = vld [vmem:[%s7454_s1 + $0x58] sm:$0xff]   ;;  %s7254_s27 = scalar_lea.vmem (%p6008_p4), %s7456_s3, %s4835_s24  }
  0x19   : > { %2485 = vmatprep.subr.bf16.mxu1 %v5962_v1  ;;  %2838 = vmatprep.subr.bf16.mxu0 %v5962_v1  ;;  %v6130_v22 = vld [vmem:[%s7454_s1 + $0xc8] sm:$0xff]   ;;  %v6141_v24 = vld [vmem:[%s7454_s1 + $0xd0] sm:$0xff]   ;;  %v6152_v26 = vld [vmem:[%s7454_s1 + $0xd8] sm:$0xff]  }
  0x1a   : > { %s6110_s17 = scalar_lea.vmem %s7453_s0, %s5329_s5  ;;  %v5443_v27 = vld [vmem:[%s7454_s1 + $0x60] sm:$0xff]   ;;  %v5445_v29 = vld [vmem:[%s7454_s1 + $0x68] sm:$0xff]   ;;  %v5447_v31 = vld [vmem:[%s7454_s1 + $0x70] sm:$0xff]  }
  0x1b   : > { %v5453_v19 = vld [vmem:[%s6110_s17 + $0x4] ss:$28 sps:$4 sm:$0xff]   ;;  %v5456_v21 = vld [vmem:[%s6110_s17 + $0xc] ss:$28 sps:$4 sm:$0xff]   ;;  %v6185_v32 = vld [vmem:[%s7454_s1 + $0xf0] sm:$0xff]  }
  0x1c   : > { %2486 = vmatpush1.bf16.msra.mxu1 %v5423_v5  ;;  %2839 = vmatpush1.bf16.msra.mxu0 %v6041_v6  ;;  %v6163_v28 = vld [vmem:[%s7454_s1 + $0xe0] sm:$0xff]   ;;  %v6174_v30 = vld [vmem:[%s7454_s1 + $0xe8] sm:$0xff]   ;;  %v5449_v33 = vld [vmem:[%s7454_s1 + $0x78] sm:$0xff]  }
  0x1d   : > { %2487 = vmatprep.subr.bf16.mxu1 %v5962_v1  ;;  %2840 = vmatprep.subr.bf16.mxu0 %v5962_v1  ;;  %v6196_v34 = vld [vmem:[%s7454_s1 + $0xf8] sm:$0xff]   ;;  %v5454_v36 = vld [vmem:[%s6110_s17 + $0x8] ss:$28 sps:$4 sm:$0xff]   ;;  %v5464_v43 = vld [vmem:[%s6110_s17 + $0x74] ss:$28 sps:$4 sm:$0xff]  }
  0x1e   : > { %2513 = vmatprep.mubr.bf16.mxu1 %v5453_v19  ;;  %2866 = vmatprep.mubr.bf16.mxu0 %v5456_v21  ;;  %v5451_v35 = vld [vmem:[%s6110_s17] ss:$28 sps:$4 sm:$0xff]   ;;  %v5470_v40 = vld [vmem:[%s7454_s1 + $0x108] sm:$0xff]   ;;  %v5462_v41 = vld [vmem:[%s6110_s17 + $0x38] ss:$28 sps:$4 sm:$0xff]  }
  0x1f   : > { %v5457_v37 = vld [vmem:[%s7454_s1 + $0x100] sm:$0xff]   ;;  %v5458_v38 = vld [vmem:[%s6110_s17 + $0x3c] ss:$28 sps:$4 sm:$0xff]   ;;  %v5481_v45 = vld [vmem:[%s7454_s1 + $0x110] sm:$0xff]  }
  0x20   : > { %2488 = vmatpush1.bf16.msra.mxu1 %v5425_v7  ;;  %2841 = vmatpush1.bf16.msra.mxu0 %v6052_v8  ;;  %v5460_v39 = vld [vmem:[%s6110_s17 + $0x44] ss:$28 sps:$4 sm:$0xff]   ;;  %v5466_v44 = vld [vmem:[%s6110_s17 + $0x7c] ss:$28 sps:$4 sm:$0xff]   ;;  %v5468_v47 = vld [vmem:[%s6110_s17 + $0x70] ss:$28 sps:$4 sm:$0xff]  }
  0x21   : > { %2489 = vmatprep.subr.bf16.mxu1 %v5962_v1  ;;  %2842 = vmatprep.subr.bf16.mxu0 %v5962_v1  ;;  %v5463_v42 = vld [vmem:[%s6110_s17 + $0x40] ss:$28 sps:$4 sm:$0xff]   ;;  %v5469_v48 = vld [vmem:[%s6110_s17 + $0x78] ss:$28 sps:$4 sm:$0xff]   ;;  %v5471_v49 = vld [vmem:[%s6110_s17 + $0xac] ss:$28 sps:$4 sm:$0xff]  }
  0x22   : > { %v5490_v46 = vld [vmem:[%s7454_s1 + $0x118] sm:$0xff]   ;;  %v5473_v50 = vld [vmem:[%s6110_s17 + $0xb4] ss:$28 sps:$4 sm:$0xff]   ;;  %v5503_v51 = vld [vmem:[%s7454_s1 + $0x120] sm:$0xff]  }
  0x23   : > { %v5516_v52 = vld [vmem:[%s7454_s1 + $0x128] sm:$0xff]   ;;  %v5477_v55 = vld [vmem:[%s6110_s17 + $0xe4] ss:$28 sps:$4 sm:$0xff]   ;;  %v5529_v57 = vld [vmem:[%s7454_s1 + $0x130] sm:$0xff]  }
  0x24   : > { %2490 = vmatpush1.bf16.msra.mxu1 %v5427_v9  ;;  %2843 = vmatpush1.bf16.msra.mxu0 %v6066_v10  ;;  %v5475_v53 = vld [vmem:[%s6110_s17 + $0xa8] ss:$28 sps:$4 sm:$0xff]   ;;  %v5476_v54 = vld [vmem:[%s6110_s17 + $0xb0] ss:$28 sps:$4 sm:$0xff]   ;;  %v5542_v58 = vld [vmem:[%s7454_s1 + $0x138] sm:$0xff]  }
  0x25   : > { %2491 = vmatprep.subr.bf16.mxu1 %v5962_v1  ;;  %2844 = vmatprep.subr.bf16.mxu0 %v5962_v1  ;;  %v5479_v56 = vld [vmem:[%s6110_s17 + $0xec] ss:$28 sps:$4 sm:$0xff]   ;;  %v5482_v59 = vld [vmem:[%s6110_s17 + $0xe0] ss:$28 sps:$4 sm:$0xff]   ;;  %v5488_v0 = vld [vmem:[%s6110_s17 + $0x118] ss:$28 sps:$4 sm:$0xff]  }
  0x26   : > { %v5483_v60 = vld [vmem:[%s6110_s17 + $0xe8] ss:$28 sps:$4 sm:$0xff]   ;;  %v5484_v61 = vld [vmem:[%s6110_s17 + $0x11c] ss:$28 sps:$4 sm:$0xff]   ;;  %v5495_v7 = vld [vmem:[%s6110_s17 + $0x150] ss:$28 sps:$4 sm:$0xff]  }
  0x27   : > { %v5486_v62 = vld [vmem:[%s6110_s17 + $0x124] ss:$28 sps:$4 sm:$0xff]   ;;  %v5493_v5 = vld [vmem:[%s6110_s17 + $0x15c] ss:$28 sps:$4 sm:$0xff]   ;;  %v5614_v21 = vld [vmem:[%s7454_s1 + $0x168] sm:$0xff]  }
  0x28   : > { %2492 = vmatpush1.bf16.msra.mxu1 %v5429_v11  ;;  %2845 = vmatpush1.bf16.msra.mxu0 %v6078_v12  ;;  %v5555_v63 = vld [vmem:[%s7454_s1 + $0x140] sm:$0xff]   ;;  %v5496_v9 = vld [vmem:[%s6110_s17 + $0x158] ss:$28 sps:$4 sm:$0xff]  }
  0x29   : > { %2493 = vmatprep.subr.bf16.mxu1 %v5962_v1  ;;  %2846 = vmatprep.subr.bf16.mxu0 %v5962_v1  ;;  %v5489_v3 = vld [vmem:[%s6110_s17 + $0x120] ss:$28 sps:$4 sm:$0xff]   ;;  %v5499_v11 = vld [vmem:[%s6110_s17 + $0x194] ss:$28 sps:$4 sm:$0xff]  }
  0x2a   : > { %v5510_v19 = vld [vmem:[%s6110_s17 + $0x1fc] ss:$28 sps:$4 sm:$0xff]  }
  0x2c   : > { %2494 = vmatpush1.bf16.msra.mxu1 %v5431_v13  ;;  %2847 = vmatpush1.bf16.msra.mxu0 %v6090_v14  ;;  %v5501_v13 = vld [vmem:[%s6110_s17 + $0x188] ss:$28 sps:$4 sm:$0xff]  }
  0x2d   : > { %2495 = vmatprep.subr.bf16.mxu1 %v5962_v1  ;;  %2848 = vmatprep.subr.bf16.mxu0 %v5962_v1 }
  0x30   : > { %2496 = vmatpush1.bf16.msra.mxu1 %v5433_v15  ;;  %2849 = vmatpush1.bf16.msra.mxu0 %v6101_v16  ;;  %v5504_v15 = vld [vmem:[%s6110_s17 + $0x1c4] ss:$28 sps:$4 sm:$0xff]  }
  0x31   : > { %2497 = vmatprep.subr.bf16.mxu1 %v5962_v1  ;;  %2850 = vmatprep.subr.bf16.mxu0 %v5962_v1 }
  0x34   : > { %2498 = vmatpush1.bf16.msra.mxu1 %v5435_v17  ;;  %2851 = vmatpush1.bf16.msra.mxu0 %v6117_v18  ;;  %v5508_v17 = vld [vmem:[%s6110_s17 + $0x1c0] ss:$28 sps:$4 sm:$0xff]  }
  0x35   : > { %2499 = vmatprep.subr.bf16.mxu1 %v5962_v1  ;;  %2852 = vmatprep.subr.bf16.mxu0 %v5962_v1 }
  0x38   : > { %2500 = vmatpush1.bf16.msra.mxu1 %v5437_v20  ;;  %2853 = vmatpush1.bf16.msra.mxu0 %v6130_v22  ;;  %v5512_v20 = vld [vmem:[%s6110_s17 + $0x204] ss:$28 sps:$4 sm:$0xff]  }
  0x39   : > { %2501 = vmatprep.subr.bf16.mxu1 %v5962_v1  ;;  %2854 = vmatprep.subr.bf16.mxu0 %v5962_v1 }
  0x3c   : > { %2502 = vmatpush1.bf16.msra.mxu1 %v5439_v23  ;;  %2855 = vmatpush1.bf16.msra.mxu0 %v6141_v24  ;;  %v5515_v23 = vld [vmem:[%s6110_s17 + $0x200] ss:$28 sps:$4 sm:$0xff]  }
  0x3d   : > { %2503 = vmatprep.subr.bf16.mxu1 %v5962_v1  ;;  %2856 = vmatprep.subr.bf16.mxu0 %v5962_v1 }
  0x40   : > { %2504 = vmatpush1.bf16.msra.mxu1 %v5441_v25  ;;  %2857 = vmatpush1.bf16.msra.mxu0 %v6152_v26  ;;  %v5519_v25 = vld [vmem:[%s6110_s17 + $0x23c] ss:$28 sps:$4 sm:$0xff]  }
  0x41   : > { %2505 = vmatprep.subr.bf16.mxu1 %v5962_v1  ;;  %2858 = vmatprep.subr.bf16.mxu0 %v5962_v1 }
  0x44   : > { %2506 = vmatpush1.bf16.msra.mxu1 %v5443_v27  ;;  %2859 = vmatpush1.bf16.msra.mxu0 %v6163_v28  ;;  %v5522_v27 = vld [vmem:[%s6110_s17 + $0x238] ss:$28 sps:$4 sm:$0xff]  }
  0x45   : > { %2507 = vmatprep.subr.bf16.mxu1 %v5962_v1  ;;  %2860 = vmatprep.subr.bf16.mxu0 %v5962_v1 }
  0x48   : > { %2508 = vmatpush1.bf16.msra.mxu1 %v5445_v29  ;;  %2861 = vmatpush1.bf16.msra.mxu0 %v6174_v30  ;;  %v5525_v29 = vld [vmem:[%s6110_s17 + $0x274] ss:$28 sps:$4 sm:$0xff]  }
  0x49   : > { %2509 = vmatprep.subr.bf16.mxu1 %v5962_v1  ;;  %2862 = vmatprep.subr.bf16.mxu0 %v5962_v1 }
  0x4c   : > { %2510 = vmatpush1.bf16.msra.mxu1 %v5447_v31  ;;  %2863 = vmatpush1.bf16.msra.mxu0 %v6185_v32  ;;  %v5528_v31 = vld [vmem:[%s6110_s17 + $0x270] ss:$28 sps:$4 sm:$0xff]  }
  0x4d   : > { %2511 = vmatprep.subr.bf16.mxu1 %v5962_v1  ;;  %2864 = vmatprep.subr.bf16.mxu0 %v5962_v1 }
  0x50   : > { %2512 = vmatpush1.bf16.msra.mxu1 %v5449_v33  ;;  %2865 = vmatpush1.bf16.msra.mxu0 %v6196_v34  ;;  %v5627_v33 = vld [vmem:[%s7454_s1 + $0x170] sm:$0xff]  }
  0x51   : > { %4976 = vmatprep.subr.bf16.mxu1 %v5962_v1  ;;  %3187 = vmatprep.subr.bf16.mxu0 %v5962_v1 }
  0x53   : > { %2514 = vmatmul.mubr.bf16.vlgmr.msra.gmra.mrb[0].mxu1 %v5451_v35  ;;  %2867 = vmatmul.mubr.bf16.vlgmr.msra.gmra.mrb[0].mxu0 %v5454_v36  ;;  %v5534_v35 = vld [vmem:[%s6110_s17 + $0x2a0] ss:$28 sps:$4 sm:$0xff]   ;;  %v5535_v36 = vld [vmem:[%s6110_s17 + $0x2a8] ss:$28 sps:$4 sm:$0xff]  }
  0x54   : > { %4992 = vmatpush1.bf16.msra.mxu1 %v6020_v2  ;;  %3188 = vmatpush1.bf16.msra.mxu0 %v5457_v37  ;;  %v5568_v2 = vld [vmem:[%s7454_s1 + $0x148] sm:$0xff]   ;;  %v5536_v37 = vld [vmem:[%s6110_s17 + $0x2dc] ss:$28 sps:$4 sm:$0xff]  }
  0x55   : > { %2521 = vmatprep.mubr.bf16.mxu1 %v5458_v38  ;;  %2874 = vmatprep.mubr.bf16.mxu0 %v5460_v39  ;;  %v5538_v38 = vld [vmem:[%s6110_s17 + $0x2e4] ss:$28 sps:$4 sm:$0xff]   ;;  %v5540_v39 = vld [vmem:[%s6110_s17 + $0x2d8] ss:$28 sps:$4 sm:$0xff]  }
  0x56   : > { %3189 = vmatprep.subr.bf16.mxu0 %v5962_v1  ;;  %4977 = vmatprep.subr.bf16.mxu1 %v5962_v1 }
  0x58   : > { %4993 = vmatpush1.bf16.msra.mxu1 %v6030_v4  ;;  %3190 = vmatpush1.bf16.msra.mxu0 %v5470_v40  ;;  %v5491_v4 = vld [vmem:[%s6110_s17 + $0x154] ss:$28 sps:$4 sm:$0xff]   ;;  %v5541_v40 = vld [vmem:[%s6110_s17 + $0x2e0] ss:$28 sps:$4 sm:$0xff]  }
  0x59   : > { %4978 = vmatprep.subr.bf16.mxu1 %v5962_v1  ;;  %3191 = vmatprep.subr.bf16.mxu0 %v5962_v1 }
  0x5b   : > { %2522 = vmatmul.mubr.bf16.gmra.mrb[4].mxu1 %v5462_v41  ;;  %2875 = vmatmul.mubr.bf16.gmra.mrb[4].mxu0 %v5463_v42  ;;  %v5543_v41 = vld [vmem:[%s6110_s17 + $0x314] ss:$28 sps:$4 sm:$0xff]   ;;  %v5545_v42 = vld [vmem:[%s6110_s17 + $0x31c] ss:$28 sps:$4 sm:$0xff]  }
  0x5c   : > { %2529 = vmatprep.mubr.bf16.mxu1 %v5464_v43  ;;  %2882 = vmatprep.mubr.bf16.mxu0 %v5466_v44  ;;  %v5547_v43 = vld [vmem:[%s6110_s17 + $0x310] ss:$28 sps:$4 sm:$0xff]   ;;  %v5548_v44 = vld [vmem:[%s6110_s17 + $0x318] ss:$28 sps:$4 sm:$0xff]  }
  0x5d   : > { %3192 = vmatpush1.bf16.msra.mxu0 %v5481_v45  ;;  %4994 = vmatpush1.bf16.msra.mxu1 %v6041_v6  ;;  %v5579_v6 = vld [vmem:[%s7454_s1 + $0x150] sm:$0xff]   ;;  %v5549_v45 = vld [vmem:[%s6110_s17 + $0x34c] ss:$28 sps:$4 sm:$0xff]  }
  0x5e   : > { %3193 = vmatprep.subr.bf16.mxu0 %v5962_v1  ;;  %4979 = vmatprep.subr.bf16.mxu1 %v5962_v1 }
  0x61   : > { %3194 = vmatpush1.bf16.msra.mxu0 %v5490_v46  ;;  %4995 = vmatpush1.bf16.msra.mxu1 %v6052_v8  ;;  %v5588_v8 = vld [vmem:[%s7454_s1 + $0x158] sm:$0xff]   ;;  %v5551_v46 = vld [vmem:[%s6110_s17 + $0x354] ss:$28 sps:$4 sm:$0xff]  }
  0x62   : > { %3195 = vmatprep.subr.bf16.mxu0 %v5962_v1  ;;  %4980 = vmatprep.subr.bf16.mxu1 %v5962_v1 }
  0x63   : > { %2530 = vmatmul.mubr.bf16.gmra.mrb[8].mxu1 %v5468_v47  ;;  %2883 = vmatmul.mubr.bf16.gmra.mrb[8].mxu0 %v5469_v48  ;;  %v5553_v47 = vld [vmem:[%s6110_s17 + $0x348] ss:$28 sps:$4 sm:$0xff]   ;;  %v5554_v48 = vld [vmem:[%s6110_s17 + $0x350] ss:$28 sps:$4 sm:$0xff]  }
  0x64   : > { %2537 = vmatprep.mubr.bf16.mxu1 %v5471_v49  ;;  %2890 = vmatprep.mubr.bf16.mxu0 %v5473_v50  ;;  %v5556_v49 = vld [vmem:[%s6110_s17 + $0x384] ss:$28 sps:$4 sm:$0xff]   ;;  %v5558_v50 = vld [vmem:[%s6110_s17 + $0x38c] ss:$28 sps:$4 sm:$0xff]  }
  0x65   : > { %3196 = vmatpush1.bf16.msra.mxu0 %v5503_v51  ;;  %4996 = vmatpush1.bf16.msra.mxu1 %v6066_v10  ;;  %v5497_v10 = vld [vmem:[%s6110_s17 + $0x18c] ss:$28 sps:$4 sm:$0xff]   ;;  %v5560_v51 = vld [vmem:[%s6110_s17 + $0x380] ss:$28 sps:$4 sm:$0xff]  }
  0x66   : > { %3197 = vmatprep.subr.bf16.mxu0 %v5962_v1  ;;  %4981 = vmatprep.subr.bf16.mxu1 %v5962_v1 }
  0x69   : > { %3198 = vmatpush1.bf16.msra.mxu0 %v5516_v52  ;;  %4997 = vmatpush1.bf16.msra.mxu1 %v6078_v12  ;;  %v5601_v12 = vld [vmem:[%s7454_s1 + $0x160] sm:$0xff]  }
  0x6a   : > { %3199 = vmatprep.subr.bf16.mxu0 %v5962_v1  ;;  %4982 = vmatprep.subr.bf16.mxu1 %v5962_v1  ;;  %v5561_v52 = vld [vmem:[%s6110_s17 + $0x388] ss:$28 sps:$4 sm:$0xff]  }
  0x6b   : > { %2538 = vmatmul.mubr.bf16.gmra.mrb[12].mxu1 %v5475_v53  ;;  %2891 = vmatmul.mubr.bf16.gmra.mrb[12].mxu0 %v5476_v54  ;;  %v5562_v53 = vld [vmem:[%s6110_s17 + $0x3bc] ss:$28 sps:$4 sm:$0xff]   ;;  %v5564_v54 = vld [vmem:[%s6110_s17 + $0x3c4] ss:$28 sps:$4 sm:$0xff]  }
  0x6c   : > { %2545 = vmatprep.mubr.bf16.mxu1 %v5477_v55  ;;  %2898 = vmatprep.mubr.bf16.mxu0 %v5479_v56  ;;  %v5566_v55 = vld [vmem:[%s6110_s17 + $0x3b8] ss:$28 sps:$4 sm:$0xff]   ;;  %v5567_v56 = vld [vmem:[%s6110_s17 + $0x3c0] ss:$28 sps:$4 sm:$0xff]  }
  0x6d   : > { %3200 = vmatpush1.bf16.msra.mxu0 %v5529_v57  ;;  %4998 = vmatpush1.bf16.msra.mxu1 %v6090_v14  ;;  %v5502_v14 = vld [vmem:[%s6110_s17 + $0x190] ss:$28 sps:$4 sm:$0xff]  }
  0x6e   : > { %3201 = vmatprep.subr.bf16.mxu0 %v5962_v1  ;;  %4983 = vmatprep.subr.bf16.mxu1 %v5962_v1  ;;  %v5569_v57 = vld [vmem:[%s6110_s17 + $0x3f4] ss:$28 sps:$4 sm:$0xff]  }
  0x71   : > { %3202 = vmatpush1.bf16.msra.mxu0 %v5542_v58  ;;  %4999 = vmatpush1.bf16.msra.mxu1 %v6101_v16  ;;  %v5506_v16 = vld [vmem:[%s6110_s17 + $0x1cc] ss:$28 sps:$4 sm:$0xff]   ;;  %v5571_v58 = vld [vmem:[%s6110_s17 + $0x3fc] ss:$28 sps:$4 sm:$0xff]  }
  0x72   : > { %3203 = vmatprep.subr.bf16.mxu0 %v5962_v1  ;;  %4984 = vmatprep.subr.bf16.mxu1 %v5962_v1 }
  0x73   : > { %2546 = vmatmul.mubr.bf16.gmra.mrb[16].mxu1 %v5482_v59  ;;  %2899 = vmatmul.mubr.bf16.gmra.mrb[16].mxu0 %v5483_v60  ;;  %v5573_v59 = vld [vmem:[%s6110_s17 + $0x3f0] ss:$28 sps:$4 sm:$0xff]   ;;  %v5574_v60 = vld [vmem:[%s6110_s17 + $0x3f8] ss:$28 sps:$4 sm:$0xff]  }
  0x74   : > { %2553 = vmatprep.mubr.bf16.mxu1 %v5484_v61  ;;  %2906 = vmatprep.mubr.bf16.mxu0 %v5486_v62  ;;  %v5575_v61 = vld [vmem:[%s6110_s17 + $0x42c] ss:$28 sps:$4 sm:$0xff]   ;;  %v5577_v62 = vld [vmem:[%s6110_s17 + $0x434] ss:$28 sps:$4 sm:$0xff]  }
  0x75   : > { %3204 = vmatpush1.bf16.msra.mxu0 %v5555_v63  ;;  %5000 = vmatpush1.bf16.msra.mxu1 %v6117_v18  ;;  %v5509_v18 = vld [vmem:[%s6110_s17 + $0x1c8] ss:$28 sps:$4 sm:$0xff]  }
  0x76   : > { %3205 = vmatprep.subr.bf16.mxu0 %v5962_v1  ;;  %4985 = vmatprep.subr.bf16.mxu1 %v5962_v1  ;;  %v5580_v63 = vld [vmem:[%s6110_s17 + $0x428] ss:$28 sps:$4 sm:$0xff]  }
  0x79   : > { %3206 = vmatpush1.bf16.msra.mxu0 %v5568_v2  ;;  %5001 = vmatpush1.bf16.msra.mxu1 %v6130_v22  ;;  %v5514_v22 = vld [vmem:[%s6110_s17 + $0x1f8] ss:$28 sps:$4 sm:$0xff]   ;;  %v5582_v2 = vld [vmem:[%s6110_s17 + $0x464] ss:$28 sps:$4 sm:$0xff]  }
  0x7a   : > { %3207 = vmatprep.subr.bf16.mxu0 %v5962_v1  ;;  %4986 = vmatprep.subr.bf16.mxu1 %v5962_v1 }
  0x7b   : > { %2554 = vmatmul.mubr.bf16.gmra.mrb[20].mxu1 %v5488_v0  ;;  %2907 = vmatmul.mubr.bf16.gmra.mrb[20].mxu0 %v5489_v3  ;;  %v5581_v0 = vld [vmem:[%s6110_s17 + $0x430] ss:$28 sps:$4 sm:$0xff]  }
  0x7c   : > { %2561 = vmatprep.mubr.bf16.mxu1 %v5491_v4  ;;  %2914 = vmatprep.mubr.bf16.mxu0 %v5493_v5  ;;  %v5584_v3 = vld [vmem:[%s6110_s17 + $0x46c] ss:$28 sps:$4 sm:$0xff]   ;;  %v5586_v4 = vld [vmem:[%s6110_s17 + $0x460] ss:$28 sps:$4 sm:$0xff]  }
  0x7d   : > { %3208 = vmatpush1.bf16.msra.mxu0 %v5579_v6  ;;  %5002 = vmatpush1.bf16.msra.mxu1 %v6141_v24  ;;  %v5517_v24 = vld [vmem:[%s6110_s17 + $0x234] ss:$28 sps:$4 sm:$0xff]   ;;  %v5587_v5 = vld [vmem:[%s6110_s17 + $0x468] ss:$28 sps:$4 sm:$0xff]   ;;  %v5589_v6 = vld [vmem:[%s6110_s17 + $0x49c] ss:$28 sps:$4 sm:$0xff]  }
  0x7e   : > { %3209 = vmatprep.subr.bf16.mxu0 %v5962_v1  ;;  %4987 = vmatprep.subr.bf16.mxu1 %v5962_v1 }
  0x81   : > { %3210 = vmatpush1.bf16.msra.mxu0 %v5588_v8  ;;  %5003 = vmatpush1.bf16.msra.mxu1 %v6152_v26  ;;  %v5521_v26 = vld [vmem:[%s6110_s17 + $0x230] ss:$28 sps:$4 sm:$0xff]   ;;  %v5593_v8 = vld [vmem:[%s6110_s17 + $0x498] ss:$28 sps:$4 sm:$0xff]  }
  0x82   : > { %3211 = vmatprep.subr.bf16.mxu0 %v5962_v1  ;;  %4988 = vmatprep.subr.bf16.mxu1 %v5962_v1 }
  0x83   : > { %2562 = vmatmul.mubr.bf16.gmra.mrb[24].mxu1 %v5495_v7  ;;  %2915 = vmatmul.mubr.bf16.gmra.mrb[24].mxu0 %v5496_v9  ;;  %v5591_v7 = vld [vmem:[%s6110_s17 + $0x4a4] ss:$28 sps:$4 sm:$0xff]  }
  0x84   : > { %2569 = vmatprep.mubr.bf16.mxu1 %v5497_v10  ;;  %2922 = vmatprep.mubr.bf16.mxu0 %v5499_v11  ;;  %v5594_v9 = vld [vmem:[%s6110_s17 + $0x4a0] ss:$28 sps:$4 sm:$0xff]   ;;  %v5595_v10 = vld [vmem:[%s6110_s17 + $0x4d4] ss:$28 sps:$4 sm:$0xff]  }
  0x85   : > { %3212 = vmatpush1.bf16.msra.mxu0 %v5601_v12  ;;  %5004 = vmatpush1.bf16.msra.mxu1 %v6163_v28  ;;  %v5523_v28 = vld [vmem:[%s6110_s17 + $0x26c] ss:$28 sps:$4 sm:$0xff]   ;;  %v5597_v11 = vld [vmem:[%s6110_s17 + $0x4dc] ss:$28 sps:$4 sm:$0xff]  }
  0x86   : > { %3213 = vmatprep.subr.bf16.mxu0 %v5962_v1  ;;  %4989 = vmatprep.subr.bf16.mxu1 %v5962_v1  ;;  %v5599_v12 = vld [vmem:[%s6110_s17 + $0x4d0] ss:$28 sps:$4 sm:$0xff]  }
  0x89   : > { %5005 = vmatpush1.bf16.msra.mxu1 %v6174_v30  ;;  %3214 = vmatpush1.bf16.msra.mxu0 %v5614_v21  ;;  %v5527_v30 = vld [vmem:[%s6110_s17 + $0x268] ss:$28 sps:$4 sm:$0xff]  }
  0x8a   : > { %4990 = vmatprep.subr.bf16.mxu1 %v5962_v1  ;;  %3215 = vmatprep.subr.bf16.mxu0 %v5962_v1  ;;  %v5613_v21 = vld [vmem:[%s6110_s17 + $0x548] ss:$28 sps:$4 sm:$0xff]  }
  0x8b   : > { %2570 = vmatmul.mubr.bf16.gmra.mrb[28].mxu1 %v5501_v13  ;;  %2923 = vmatmul.mubr.bf16.gmra.mrb[28].mxu0 %v5502_v14  ;;  %v5600_v13 = vld [vmem:[%s6110_s17 + $0x4d8] ss:$28 sps:$4 sm:$0xff]   ;;  %v5602_v14 = vld [vmem:[%s6110_s17 + $0x50c] ss:$28 sps:$4 sm:$0xff]  }
  0x8c   : > { %2577 = vmatprep.mubr.bf16.mxu1 %v5504_v15  ;;  %2930 = vmatprep.mubr.bf16.mxu0 %v5506_v16  ;;  %v5604_v15 = vld [vmem:[%s6110_s17 + $0x514] ss:$28 sps:$4 sm:$0xff]   ;;  %v5606_v16 = vld [vmem:[%s6110_s17 + $0x508] ss:$28 sps:$4 sm:$0xff]  }
  0x8d   : > { %5006 = vmatpush1.bf16.msra.mxu1 %v6185_v32  ;;  %v5530_v32 = vld [vmem:[%s6110_s17 + $0x2a4] ss:$28 sps:$4 sm:$0xff]   ;;  %3216 = vmatpush1.bf16.msra.mxu0 %v5627_v33 }
  0x8e   : > { %4991 = vmatprep.subr.bf16.mxu1 %v5962_v1  ;;  %3217 = vmatprep.subr.bf16.mxu0 %v5962_v1  ;;  %v5640_v1 = vld [vmem:[%s7454_s1 + $0x178] sm:$0xff]  }
  0x91   : > { %5007 = vmatpush1.bf16.msra.mxu1 %v6196_v34  ;;  %v5532_v34 = vld [vmem:[%s6110_s17 + $0x2ac] ss:$28 sps:$4 sm:$0xff]   ;;  %3218 = vmatpush1.bf16.msra.mxu0 %v5640_v1 }
  0x93   : > { %2578 = vmatmul.mubr.bf16.gmra.mrb[32].mxu1 %v5508_v17  ;;  %2931 = vmatmul.mubr.bf16.gmra.mrb[32].mxu0 %v5509_v18  ;;  %v5607_v17 = vld [vmem:[%s6110_s17 + $0x510] ss:$28 sps:$4 sm:$0xff]   ;;  %v5608_v18 = vld [vmem:[%s6110_s17 + $0x544] ss:$28 sps:$4 sm:$0xff]  }
  0x94   : > { %2585 = vmatprep.mubr.bf16.mxu1 %v5510_v19  ;;  %2938 = vmatprep.mubr.bf16.mxu0 %v5512_v20  ;;  %v5610_v19 = vld [vmem:[%s6110_s17 + $0x54c] ss:$28 sps:$4 sm:$0xff]   ;;  %v5612_v20 = vld [vmem:[%s6110_s17 + $0x540] ss:$28 sps:$4 sm:$0xff]  }
  0x9b   : > { %2586 = vmatmul.mubr.bf16.gmra.mrb[36].mxu1 %v5514_v22  ;;  %2939 = vmatmul.mubr.bf16.gmra.mrb[36].mxu0 %v5515_v23  ;;  %v5615_v22 = vld [vmem:[%s6110_s17 + $0x57c] ss:$28 sps:$4 sm:$0xff]   ;;  %v5617_v23 = vld [vmem:[%s6110_s17 + $0x584] ss:$28 sps:$4 sm:$0xff]  }
  0x9c   : > { %2593 = vmatprep.mubr.bf16.mxu1 %v5517_v24  ;;  %2946 = vmatprep.mubr.bf16.mxu0 %v5519_v25  ;;  %v6399_v24 = vld [vmem:[%s7454_s1 + $0x180] sm:$0xff]   ;;  %v5619_v25 = vld [vmem:[%s6110_s17 + $0x578] ss:$28 sps:$4 sm:$0xff]  }
  0x9d   : > { %4884 = vmatprep.subr.bf16.mxu1 %v6399_v24 }
  0xa3   : > { %2594 = vmatmul.mubr.bf16.gmra.mrb[40].mxu1 %v5521_v26  ;;  %2947 = vmatmul.mubr.bf16.gmra.mrb[40].mxu0 %v5522_v27  ;;  %v5620_v26 = vld [vmem:[%s6110_s17 + $0x580] ss:$28 sps:$4 sm:$0xff]   ;;  %v5621_v27 = vld [vmem:[%s6110_s17 + $0x5b4] ss:$28 sps:$4 sm:$0xff]  }
  0xa4   : > { %2601 = vmatprep.mubr.bf16.mxu1 %v5523_v28  ;;  %2954 = vmatprep.mubr.bf16.mxu0 %v5525_v29  ;;  %v5623_v28 = vld [vmem:[%s6110_s17 + $0x5bc] ss:$28 sps:$4 sm:$0xff]   ;;  %v5625_v29 = vld [vmem:[%s6110_s17 + $0x5b0] ss:$28 sps:$4 sm:$0xff]  }
  0xab   : > { %2602 = vmatmul.mubr.bf16.gmra.mrb[44].mxu1 %v5527_v30  ;;  %2955 = vmatmul.mubr.bf16.gmra.mrb[44].mxu0 %v5528_v31  ;;  %v5626_v30 = vld [vmem:[%s6110_s17 + $0x5b8] ss:$28 sps:$4 sm:$0xff]   ;;  %v5628_v31 = vld [vmem:[%s6110_s17 + $0x5ec] ss:$28 sps:$4 sm:$0xff]  }
  0xac   : > { %2609 = vmatprep.mubr.bf16.mxu1 %v5530_v32  ;;  %2962 = vmatprep.mubr.bf16.mxu0 %v5532_v34  ;;  %v5630_v32 = vld [vmem:[%s6110_s17 + $0x5f4] ss:$28 sps:$4 sm:$0xff]  }
  0xb3   : > { %2610 = vmatmul.mubr.bf16.gmra.mrb[48].mxu1 %v5534_v35  ;;  %2963 = vmatmul.mubr.bf16.gmra.mrb[48].mxu0 %v5535_v36  ;;  %v5632_v35 = vld [vmem:[%s6110_s17 + $0x5e8] ss:$28 sps:$4 sm:$0xff]  }
  0xb4   : > { %2617 = vmatprep.mubr.bf16.mxu1 %v5536_v37  ;;  %2970 = vmatprep.mubr.bf16.mxu0 %v5538_v38  ;;  %v5633_v37 = vld [vmem:[%s6110_s17 + $0x5f0] ss:$28 sps:$4 sm:$0xff]   ;;  %v5634_v38 = vld [vmem:[%s6110_s17 + $0x624] ss:$28 sps:$4 sm:$0xff]  }
  0xbb   : > { %2618 = vmatmul.mubr.bf16.gmra.mrb[52].mxu1 %v5540_v39  ;;  %2971 = vmatmul.mubr.bf16.gmra.mrb[52].mxu0 %v5541_v40  ;;  %v5636_v39 = vld [vmem:[%s6110_s17 + $0x62c] ss:$28 sps:$4 sm:$0xff]  }
  0xbc   : > { %2625 = vmatprep.mubr.bf16.mxu1 %v5543_v41  ;;  %2978 = vmatprep.mubr.bf16.mxu0 %v5545_v42  ;;  %v5638_v42 = vld [vmem:[%s6110_s17 + $0x620] ss:$28 sps:$4 sm:$0xff]  }
  0xc3   : > { %2626 = vmatmul.mubr.bf16.gmra.mrb[56].mxu1 %v5547_v43  ;;  %2979 = vmatmul.mubr.bf16.gmra.mrb[56].mxu0 %v5548_v44  ;;  %v5639_v44 = vld [vmem:[%s6110_s17 + $0x628] ss:$28 sps:$4 sm:$0xff]  }
  0xc4   : > { %2633 = vmatprep.mubr.bf16.mxu1 %v5549_v45  ;;  %2986 = vmatprep.mubr.bf16.mxu0 %v5551_v46  ;;  %v5641_v45 = vld [vmem:[%s6110_s17 + $0x65c] ss:$28 sps:$4 sm:$0xff]  }
  0xcb   : > { %2634 = vmatmul.mubr.bf16.gmra.mrb[60].mxu1 %v5553_v47  ;;  %2987 = vmatmul.mubr.bf16.gmra.mrb[60].mxu0 %v5554_v48  ;;  %v5643_v47 = vld [vmem:[%s6110_s17 + $0x664] ss:$28 sps:$4 sm:$0xff]  }
  0xcc   : > { %2641 = vmatprep.mubr.bf16.mxu1 %v5556_v49  ;;  %2994 = vmatprep.mubr.bf16.mxu0 %v5558_v50  ;;  %v5645_v50 = vld [vmem:[%s6110_s17 + $0x658] ss:$28 sps:$4 sm:$0xff]  }
  0xd3   : > { %2642 = vmatmul.mubr.bf16.gmra.mrb[64].mxu1 %v5560_v51  ;;  %2995 = vmatmul.mubr.bf16.gmra.mrb[64].mxu0 %v5561_v52  ;;  %v5646_v52 = vld [vmem:[%s6110_s17 + $0x660] ss:$28 sps:$4 sm:$0xff]  }
  0xd4   : > { %2649 = vmatprep.mubr.bf16.mxu1 %v5562_v53  ;;  %3002 = vmatprep.mubr.bf16.mxu0 %v5564_v54  ;;  %v5647_v53 = vld [vmem:[%s6110_s17 + $0x694] ss:$28 sps:$4 sm:$0xff]  }
  0xdb   : > { %2650 = vmatmul.mubr.bf16.gmra.mrb[68].mxu1 %v5566_v55  ;;  %3003 = vmatmul.mubr.bf16.gmra.mrb[68].mxu0 %v5567_v56  ;;  %v5651_v55 = vld [vmem:[%s6110_s17 + $0x14] ss:$28 sps:$4 sm:$0xff]  }
  0xdc   : > { %2657 = vmatprep.mubr.bf16.mxu1 %v5569_v57  ;;  %3010 = vmatprep.mubr.bf16.mxu0 %v5571_v58  ;;  %v5652_v58 = vld [vmem:[%s6110_s17 + $0x690] ss:$28 sps:$4 sm:$0xff]  }
  0xe3   : > { %2658 = vmatmul.mubr.bf16.gmra.mrb[72].mxu1 %v5573_v59  ;;  %3011 = vmatmul.mubr.bf16.gmra.mrb[72].mxu0 %v5574_v60  ;;  %v5649_v60 = vld [vmem:[%s6110_s17 + $0x10] ss:$28 sps:$4 sm:$0xff]  }
  0xe4   : > { %2665 = vmatprep.mubr.bf16.mxu1 %v5575_v61  ;;  %3018 = vmatprep.mubr.bf16.mxu0 %v5577_v62  ;;  %v5653_v61 = vld [vmem:[%s6110_s17 + $0x6cc] ss:$28 sps:$4 sm:$0xff]  }
  0xeb   : > { %2666 = vmatmul.mubr.bf16.gmra.mrb[76].mxu1 %v5580_v63  ;;  %3019 = vmatmul.mubr.bf16.gmra.mrb[76].mxu0 %v5581_v0  ;;  %v5655_v63 = vld [vmem:[%s6110_s17 + $0x4c] ss:$28 sps:$4 sm:$0xff]  }
  0xec   : > { %2673 = vmatprep.mubr.bf16.mxu1 %v5582_v2  ;;  %3026 = vmatprep.mubr.bf16.mxu0 %v5584_v3  ;;  %v5657_v3 = vld [vmem:[%s6110_s17 + $0x6c8] ss:$28 sps:$4 sm:$0xff]  }
  0xf3   : > { %2674 = vmatmul.mubr.bf16.gmra.mrb[80].mxu1 %v5586_v4  ;;  %3027 = vmatmul.mubr.bf16.gmra.mrb[80].mxu0 %v5587_v5  ;;  %v5658_v5 = vld [vmem:[%s6110_s17 + $0x48] ss:$28 sps:$4 sm:$0xff]  }
  0xf4   : > { %2681 = vmatprep.mubr.bf16.mxu1 %v5589_v6  ;;  %3034 = vmatprep.mubr.bf16.mxu0 %v5591_v7  ;;  %v5659_v6 = vld [vmem:[%s6110_s17 + $0x704] ss:$28 sps:$4 sm:$0xff]  }
  0xfb   : > { %2682 = vmatmul.mubr.bf16.gmra.mrb[84].mxu1 %v5593_v8  ;;  %3035 = vmatmul.mubr.bf16.gmra.mrb[84].mxu0 %v5594_v9  ;;  %v5661_v8 = vld [vmem:[%s6110_s17 + $0x84] ss:$28 sps:$4 sm:$0xff]  }
  0xfc   : > { %2689 = vmatprep.mubr.bf16.mxu1 %v5595_v10  ;;  %3042 = vmatprep.mubr.bf16.mxu0 %v5597_v11  ;;  %v5663_v11 = vld [vmem:[%s6110_s17 + $0x700] ss:$28 sps:$4 sm:$0xff]  }
 0x103   : > { %2690 = vmatmul.mubr.bf16.gmra.mrb[88].mxu1 %v5599_v12  ;;  %3043 = vmatmul.mubr.bf16.gmra.mrb[88].mxu0 %v5600_v13  ;;  %v5664_v13 = vld [vmem:[%s6110_s17 + $0x80] ss:$28 sps:$4 sm:$0xff]  }
 0x104   : > { %2697 = vmatprep.mubr.bf16.mxu1 %v5602_v14  ;;  %3050 = vmatprep.mubr.bf16.mxu0 %v5604_v15  ;;  %v5665_v14 = vld [vmem:[%s6110_s17 + $0x73c] ss:$28 sps:$4 sm:$0xff]  }
 0x10b   : > { %2698 = vmatmul.mubr.bf16.gmra.mrb[92].mxu1 %v5606_v16  ;;  %3051 = vmatmul.mubr.bf16.gmra.mrb[92].mxu0 %v5607_v17  ;;  %v5667_v16 = vld [vmem:[%s6110_s17 + $0xbc] ss:$28 sps:$4 sm:$0xff]  }
 0x10c   : > { %2705 = vmatprep.mubr.bf16.mxu1 %v5608_v18  ;;  %3058 = vmatprep.mubr.bf16.mxu0 %v5610_v19  ;;  %v5669_v19 = vld [vmem:[%s6110_s17 + $0x738] ss:$28 sps:$4 sm:$0xff]  }
 0x113   : > { %2706 = vmatmul.mubr.bf16.gmra.mrb[96].mxu1 %v5612_v20  ;;  %3059 = vmatmul.mubr.bf16.gmra.mrb[96].mxu0 %v5613_v21  ;;  %v5670_v21 = vld [vmem:[%s6110_s17 + $0xb8] ss:$28 sps:$4 sm:$0xff]  }
 0x114   : > { %2713 = vmatprep.mubr.bf16.mxu1 %v5615_v22  ;;  %3066 = vmatprep.mubr.bf16.mxu0 %v5617_v23  ;;  %v5671_v22 = vld [vmem:[%s6110_s17 + $0x774] ss:$28 sps:$4 sm:$0xff]  }
 0x11b   : > { %2714 = vmatmul.mubr.bf16.gmra.mrb[100].mxu1 %v5619_v25  ;;  %3067 = vmatmul.mubr.bf16.gmra.mrb[100].mxu0 %v5620_v26  ;;  %v5673_v25 = vld [vmem:[%s6110_s17 + $0xf4] ss:$28 sps:$4 sm:$0xff]  }
 0x11c   : > { %2721 = vmatprep.mubr.bf16.mxu1 %v5621_v27  ;;  %3074 = vmatprep.mubr.bf16.mxu0 %v5623_v28  ;;  %v5675_v28 = vld [vmem:[%s6110_s17 + $0x770] ss:$28 sps:$4 sm:$0xff]  }
 0x123   : > { %2722 = vmatmul.mubr.bf16.gmra.mrb[104].mxu1 %v5625_v29  ;;  %3075 = vmatmul.mubr.bf16.gmra.mrb[104].mxu0 %v5626_v30  ;;  %v5676_v30 = vld [vmem:[%s6110_s17 + $0xf0] ss:$28 sps:$4 sm:$0xff]  }
 0x124   : > { %2729 = vmatprep.mubr.bf16.mxu1 %v5628_v31  ;;  %3082 = vmatprep.mubr.bf16.mxu0 %v5630_v32  ;;  %v5677_v31 = vld [vmem:[%s6110_s17 + $0x7ac] ss:$28 sps:$4 sm:$0xff]  }
 0x126   : > { %v6410_v33 = vpop.f32.mrb[0].mxu1 }
 0x127   : > { %v2517_v34 = vpop.f32.mrb[1].mxu1 }
 0x128   : > { %v6413_v36 = vpop.f32.mrb[2].mxu1  ;;  %v5679_v34 = vld [vmem:[%s6110_s17 + $0x12c] ss:$28 sps:$4 sm:$0xff]  }
 0x129   : > { %v2520_v1 = vpop.f32.mrb[3].mxu1 }
 0x12b   : > { %2730 = vmatmul.mubr.bf16.gmra.mrb[108].mxu1 %v5632_v35  ;;  %3083 = vmatmul.mubr.bf16.gmra.mrb[108].mxu0 %v5633_v37 }
 0x12c   : > { %2737 = vmatprep.mubr.bf16.mxu1 %v5634_v38  ;;  %3090 = vmatprep.mubr.bf16.mxu0 %v5636_v39  ;;  %v5681_v38 = vld [vmem:[%s6110_s17 + $0x7a8] ss:$28 sps:$4 sm:$0xff]  }
 0x12d   : > { %v5682_v39 = vld [vmem:[%s6110_s17 + $0x128] ss:$28 sps:$4 sm:$0xff]  }
 0x12e   : > { %v6418_v40 = vpop.f32.mrb[4].mxu1 }
 0x12f   : > { %v2525_v41 = vpop.f32.mrb[5].mxu1 }
 0x130   : > { %v6421_v43 = vpop.f32.mrb[6].mxu1  ;;  %v5683_v41 = vld [vmem:[%s6110_s17 + $0x7e4] ss:$28 sps:$4 sm:$0xff]  }
 0x131   : > { %v2528_v46 = vpop.f32.mrb[7].mxu1 }
 0x133   : > { %2738 = vmatmul.mubr.bf16.gmra.mrb[112].mxu1 %v5638_v42  ;;  %3091 = vmatmul.mubr.bf16.gmra.mrb[112].mxu0 %v5639_v44  ;;  %v5685_v44 = vld [vmem:[%s6110_s17 + $0x164] ss:$28 sps:$4 sm:$0xff]  }
 0x134   : > { %2745 = vmatprep.mubr.bf16.mxu1 %v5641_v45  ;;  %3098 = vmatprep.mubr.bf16.mxu0 %v5643_v47  ;;  %v5687_v47 = vld [vmem:[%s6110_s17 + $0x7e0] ss:$28 sps:$4 sm:$0xff]  }
 0x136   : > { %v6426_v48 = vpop.f32.mrb[8].mxu1 }
 0x137   : > { %v2533_v49 = vpop.f32.mrb[9].mxu1 }
 0x138   : > { %v6429_v51 = vpop.f32.mrb[10].mxu1 }
 0x139   : > { %v2536_v54 = vpop.f32.mrb[11].mxu1 }
 0x13a   : > { %v5691_v54 = vld [vmem:[%s6110_s17 + $0x19c] ss:$28 sps:$4 sm:$0xff]  }
 0x13b   : > { %2746 = vmatmul.mubr.bf16.gmra.mrb[116].mxu1 %v5645_v50  ;;  %3099 = vmatmul.mubr.bf16.gmra.mrb[116].mxu0 %v5646_v52  ;;  %v5688_v50 = vld [vmem:[%s6110_s17 + $0x160] ss:$28 sps:$4 sm:$0xff]  }
 0x13c   : > { %2753 = vmatprep.mubr.bf16.mxu1 %v5647_v53  ;;  %3219 = vmatprep.mubr.bf16.mxu0 %v5651_v55  ;;  %v5689_v52 = vld [vmem:[%s6110_s17 + $0x81c] ss:$28 sps:$4 sm:$0xff]  }
 0x13e   : > { %v6434_v56 = vpop.f32.mrb[12].mxu1 }
 0x13f   : > { %v2541_v57 = vpop.f32.mrb[13].mxu1 }
 0x140   : > { %v6437_v59 = vpop.f32.mrb[14].mxu1 }
 0x141   : > { %v2544_v62 = vpop.f32.mrb[15].mxu1 }
 0x142   : > { %v5695_v62 = vld [vmem:[%s6110_s17 + $0x854] ss:$28 sps:$4 sm:$0xff]  }
 0x143   : > { %2754 = vmatmul.mubr.bf16.gmra.mrb[120].mxu1 %v5652_v58  ;;  %3220 = vmatmul.mubr.bf16.vlgmr.msra.gmra.mrb[0].mxu0 %v5649_v60  ;;  %v5693_v58 = vld [vmem:[%s6110_s17 + $0x818] ss:$28 sps:$4 sm:$0xff]  }
 0x144   : > { %2761 = vmatprep.mubr.bf16.mxu1 %v5653_v61  ;;  %3227 = vmatprep.mubr.bf16.mxu0 %v5655_v63  ;;  %v5694_v61 = vld [vmem:[%s6110_s17 + $0x198] ss:$28 sps:$4 sm:$0xff]  }
 0x146   : > { %v6442_v0 = vpop.f32.mrb[16].mxu1 }
 0x147   : > { %v2549_v2 = vpop.f32.mrb[17].mxu1 }
 0x148   : > { %v6445_v4 = vpop.f32.mrb[18].mxu1  ;;  %v5697_v2 = vld [vmem:[%s6110_s17 + $0x1d4] ss:$28 sps:$4 sm:$0xff]  }
 0x149   : > { %v2552_v7 = vpop.f32.mrb[19].mxu1 }
 0x14b   : > { %2762 = vmatmul.mubr.bf16.gmra.mrb[124].mxu1 %v5657_v3  ;;  %3228 = vmatmul.mubr.bf16.gmra.mrb[4].mxu0 %v5658_v5 }
 0x14c   : > { %2769 = vmatprep.mubr.bf16.mxu1 %v5659_v6  ;;  %3235 = vmatprep.mubr.bf16.mxu0 %v5661_v8  ;;  %v5699_v6 = vld [vmem:[%s6110_s17 + $0x850] ss:$28 sps:$4 sm:$0xff]  }
 0x14d   : > { %v5700_v8 = vld [vmem:[%s6110_s17 + $0x1d0] ss:$28 sps:$4 sm:$0xff]  }
 0x14e   : > { %v6450_v9 = vpop.f32.mrb[20].mxu1 }
 0x14f   : > { %v2557_v10 = vpop.f32.mrb[21].mxu1 }
 0x150   : > { %v6453_v12 = vpop.f32.mrb[22].mxu1  ;;  %v5701_v10 = vld [vmem:[%s6110_s17 + $0x88c] ss:$28 sps:$4 sm:$0xff]  }
 0x151   : > { %v2560_v15 = vpop.f32.mrb[23].mxu1 }
 0x153   : > { %2770 = vmatmul.mubr.bf16.gmra.mrb[128].mxu1 %v5663_v11  ;;  %3236 = vmatmul.mubr.bf16.gmra.mrb[8].mxu0 %v5664_v13  ;;  %v5703_v13 = vld [vmem:[%s6110_s17 + $0x20c] ss:$28 sps:$4 sm:$0xff]  }
 0x154   : > { %2777 = vmatprep.mubr.bf16.mxu1 %v5665_v14  ;;  %3243 = vmatprep.mubr.bf16.mxu0 %v5667_v16  ;;  %v5705_v16 = vld [vmem:[%s6110_s17 + $0x888] ss:$28 sps:$4 sm:$0xff]  }
 0x156   : > { %v6458_v17 = vpop.f32.mrb[24].mxu1 }
 0x157   : > { %v2565_v18 = vpop.f32.mrb[25].mxu1 }
 0x158   : > { %v6461_v20 = vpop.f32.mrb[26].mxu1 }
 0x159   : > { %v2568_v23 = vpop.f32.mrb[27].mxu1 }
 0x15a   : > { %v5710_v23 = vld [vmem:[%s6110_s17 + $0x244] ss:$28 sps:$4 sm:$0xff]  }
 0x15b   : > { %2778 = vmatmul.mubr.bf16.gmra.mrb[132].mxu1 %v5669_v19  ;;  %3244 = vmatmul.mubr.bf16.gmra.mrb[12].mxu0 %v5670_v21  ;;  %v5706_v19 = vld [vmem:[%s6110_s17 + $0x208] ss:$28 sps:$4 sm:$0xff]   ;;  %v5709_v21 = vld [vmem:[%s6110_s17 + $0x69c] ss:$28 sps:$4 sm:$0xff]  }
 0x15c   : > { %2785 = vmatprep.mubr.bf16.mxu1 %v5671_v22  ;;  %3251 = vmatprep.mubr.bf16.mxu0 %v5673_v25 }
 0x15e   : > { %v6466_v26 = vpop.f32.mrb[28].mxu1 }
 0x15f   : > { %v2573_v27 = vpop.f32.mrb[29].mxu1 }
 0x160   : > { %v6469_v29 = vpop.f32.mrb[30].mxu1 }
 0x161   : > { %v2576_v32 = vpop.f32.mrb[31].mxu1 }
 0x163   : > { %2786 = vmatmul.mubr.bf16.gmra.mrb[136].mxu1 %v5675_v28  ;;  %3252 = vmatmul.mubr.bf16.gmra.mrb[16].mxu0 %v5676_v30  ;;  %v5707_v28 = vld [vmem:[%s6110_s17 + $0x698] ss:$28 sps:$4 sm:$0xff]  }
 0x164   : > { %2793 = vmatprep.mubr.bf16.mxu1 %v5677_v31  ;;  %3259 = vmatprep.mubr.bf16.mxu0 %v5679_v34  ;;  %v5712_v31 = vld [vmem:[%s6110_s17 + $0x240] ss:$28 sps:$4 sm:$0xff]   ;;  %v5714_v34 = vld [vmem:[%s6110_s17 + $0x6d4] ss:$28 sps:$4 sm:$0xff]  }
 0x166   : > { %v6474_v35 = vpop.f32.mrb[32].mxu1 }
 0x167   : > { %v2581_v37 = vpop.f32.mrb[33].mxu1 }
 0x168   : > { %v6477_v1 = vpop.f32.mrb[34].mxu1  ;;  %v5716_v37 = vld [vmem:[%s6110_s17 + $0x27c] ss:$28 sps:$4 sm:$0xff]  }
 0x169   : > { %v2584_v42 = vpop.f32.mrb[35].mxu1 }
 0x16b   : > { %2794 = vmatmul.mubr.bf16.gmra.mrb[140].mxu1 %v5681_v38  ;;  %3260 = vmatmul.mubr.bf16.gmra.mrb[20].mxu0 %v5682_v39  ;;  %v5724_v38 = vld [vmem:[%s7454_s1 + $0x188] sm:$0xff]   ;;  %v5733_v39 = vld [vmem:[%s7454_s1 + $0x190] sm:$0xff]  }
 0x16c   : > { %2801 = vmatprep.mubr.bf16.mxu1 %v5683_v41  ;;  %3267 = vmatprep.mubr.bf16.mxu0 %v5685_v44  ;;  %v5718_v44 = vld [vmem:[%s6110_s17 + $0x6d0] ss:$28 sps:$4 sm:$0xff]  }
 0x16e   : > { %v6482_v45 = vpop.f32.mrb[36].mxu1 }
 0x16f   : > { %v2589_v46 = vpop.f32.mrb[37].mxu1 }
 0x170   : > { %v6485_v49 = vpop.f32.mrb[38].mxu1 }
 0x171   : > { %v2592_v53 = vpop.f32.mrb[39].mxu1 }
 0x172   : > { %v5746_v53 = vld [vmem:[%s7454_s1 + $0x198] sm:$0xff]  }
 0x173   : > { %2802 = vmatmul.mubr.bf16.gmra.mrb[144].mxu1 %v5687_v47  ;;  %3268 = vmatmul.mubr.bf16.gmra.mrb[24].mxu0 %v5688_v50  ;;  %v5719_v47 = vld [vmem:[%s6110_s17 + $0x278] ss:$28 sps:$4 sm:$0xff]   ;;  %v5720_v50 = vld [vmem:[%s6110_s17 + $0x70c] ss:$28 sps:$4 sm:$0xff]  }
 0x174   : > { %2809 = vmatprep.mubr.bf16.mxu1 %v5689_v52  ;;  %3275 = vmatprep.mubr.bf16.mxu0 %v5691_v54 }
 0x176   : > { %v6490_v55 = vpop.f32.mrb[40].mxu1 }
 0x177   : > { %v2597_v57 = vpop.f32.mrb[41].mxu1 }
 0x178   : > { %v6493_v60 = vpop.f32.mrb[42].mxu1  ;;  %v5757_v57 = vld [vmem:[%s7454_s1 + $0x1a0] sm:$0xff]  }
 0x179   : > { %v2600_v63 = vpop.f32.mrb[43].mxu1 }
 0x17a   : > { %v5726_v63 = vld [vmem:[%s6110_s17 + $0x2b0] ss:$28 sps:$4 sm:$0xff]  }
 0x17b   : > { %2810 = vmatmul.mubr.bf16.gmra.mrb[148].mxu1 %v5693_v58  ;;  %3276 = vmatmul.mubr.bf16.gmra.mrb[28].mxu0 %v5694_v61  ;;  %v5725_v61 = vld [vmem:[%s6110_s17 + $0x708] ss:$28 sps:$4 sm:$0xff]  }
 0x17c   : > { %2817 = vmatprep.mubr.bf16.mxu1 %v5695_v62  ;;  %3283 = vmatprep.mubr.bf16.mxu0 %v5697_v2  ;;  %v5727_v2 = vld [vmem:[%s6110_s17 + $0x744] ss:$28 sps:$4 sm:$0xff]  }
 0x17e   : > { %v6498_v3 = vpop.f32.mrb[44].mxu1 }
 0x17f   : > { %v2605_v5 = vpop.f32.mrb[45].mxu1 }
 0x180   : > { %v6501_v7 = vpop.f32.mrb[46].mxu1 }
 0x181   : > { %v2608_v11 = vpop.f32.mrb[47].mxu1 }
 0x183   : > { %2818 = vmatmul.mubr.bf16.gmra.mrb[152].mxu1 %v5699_v6  ;;  %3284 = vmatmul.mubr.bf16.gmra.mrb[32].mxu0 %v5700_v8  ;;  %v5729_v6 = vld [vmem:[%s6110_s17 + $0x2ec] ss:$28 sps:$4 sm:$0xff]  }
 0x184   : > { %2825 = vmatprep.mubr.bf16.mxu1 %v5701_v10  ;;  %3291 = vmatprep.mubr.bf16.mxu0 %v5703_v13  ;;  %v5766_v8 = vld [vmem:[%s7454_s1 + $0x1a8] sm:$0xff]   ;;  %v5731_v13 = vld [vmem:[%s6110_s17 + $0x740] ss:$28 sps:$4 sm:$0xff]  }
 0x186   : > { %v6506_v14 = vpop.f32.mrb[48].mxu1 }
 0x187   : > { %v2613_v15 = vpop.f32.mrb[49].mxu1 }
 0x188   : > { %v6509_v18 = vpop.f32.mrb[50].mxu1 }
 0x189   : > { %v2616_v22 = vpop.f32.mrb[51].mxu1 }
 0x18a   : > { %v5736_v22 = vld [vmem:[%s6110_s17 + $0x324] ss:$28 sps:$4 sm:$0xff]  }
 0x18b   : > { %2826 = vmatmul.mubr.bf16.gmra.mrb[156].mxu1 %v5705_v16  ;;  %3292 = vmatmul.mubr.bf16.gmra.mrb[36].mxu0 %v5706_v19  ;;  %v5732_v16 = vld [vmem:[%s6110_s17 + $0x2e8] ss:$28 sps:$4 sm:$0xff]   ;;  %v5734_v19 = vld [vmem:[%s6110_s17 + $0x77c] ss:$28 sps:$4 sm:$0xff]  }
 0x18c   : > { %3106 = vmatprep.mubr.bf16.mxu1 %v5709_v21  ;;  %3299 = vmatprep.mubr.bf16.mxu0 %v5710_v23 }
 0x18e   : > { %v6514_v25 = vpop.f32.mrb[52].mxu1 }
 0x18f   : > { %v2621_v27 = vpop.f32.mrb[53].mxu1 }
 0x190   : > { %v6517_v30 = vpop.f32.mrb[54].mxu1 }
 0x191   : > { %v2624_v32 = vpop.f32.mrb[55].mxu1 }
 0x192   : > { %v5739_v32 = vld [vmem:[%s6110_s17 + $0x320] ss:$28 sps:$4 sm:$0xff]  }
 0x193   : > { %3107 = vmatmul.mubr.bf16.vlgmr.msra.gmra.mrb[120].mxu1 %v5707_v28  ;;  %3300 = vmatmul.mubr.bf16.gmra.mrb[40].mxu0 %v5712_v31  ;;  %v5738_v28 = vld [vmem:[%s6110_s17 + $0x778] ss:$28 sps:$4 sm:$0xff]  }
 0x194   : > { %4885 = vmatpush3.bf16.msra.mxu1 %v6399_v24  ;;  %3114 = vmatprep.mubr.bf16.mxu1 %v5714_v34  ;;  %v5722_v24 = vld [vmem:[%s6110_s17 + $0x2b4] ss:$28 sps:$4 sm:$0xff]  }
 0x195   : > { %3307 = vmatprep.mubr.bf16.mxu0 %v5716_v37  ;;  %4886 = vmatprep.subr.bf16.mxu1 %v5724_v38  ;;  %v5740_v34 = vld [vmem:[%s6110_s17 + $0x7b4] ss:$28 sps:$4 sm:$0xff]  }
 0x196   : > { %v6529_v41 = vpop.f32.mrb[56].mxu1 }
 0x197   : > { %v2629_v42 = vpop.f32.mrb[57].mxu1 }
 0x198   : > { %v6532_v46 = vpop.f32.mrb[58].mxu1  ;;  %4887 = vmatpush3.bf16.msra.mxu1 %v5724_v38  ;;  %v5742_v38 = vld [vmem:[%s6110_s17 + $0x35c] ss:$28 sps:$4 sm:$0xff]  }
 0x199   : > { %v2632_v52 = vpop.f32.mrb[59].mxu1  ;;  %4888 = vmatprep.subr.bf16.mxu1 %v5733_v39 }
 0x19a   : > { %v5747_v52 = vld [vmem:[%s6110_s17 + $0x7ec] ss:$28 sps:$4 sm:$0xff]  }
 0x19b   : > { %3115 = vmatmul.mubr.bf16.gmra.mrb[124].mxu1 %v5718_v44  ;;  %3308 = vmatmul.mubr.bf16.gmra.mrb[44].mxu0 %v5719_v47  ;;  %v5744_v44 = vld [vmem:[%s6110_s17 + $0x7b0] ss:$28 sps:$4 sm:$0xff]  }
 0x19c   : > { %3122 = vmatprep.mubr.bf16.mxu1 %v5720_v50  ;;  %3315 = vmatprep.mubr.bf16.mxu0 %v5722_v24  ;;  %v5745_v50 = vld [vmem:[%s6110_s17 + $0x358] ss:$28 sps:$4 sm:$0xff]  }
 0x19d   : > { %4889 = vmatpush3.bf16.msra.mxu1 %v5733_v39 }
 0x19e   : > { %v6540_v54 = vpop.f32.mrb[60].mxu1  ;;  %4890 = vmatprep.subr.bf16.mxu1 %v5746_v53 }
 0x19f   : > { %v2637_v58 = vpop.f32.mrb[61].mxu1 }
 0x1a0   : > { %v6546_v62 = vpop.f32.mrb[62].mxu1 }
 0x1a1   : > { %v2640_v5 = vpop.f32.mrb[63].mxu1  ;;  %4891 = vmatpush3.bf16.msra.mxu1 %v5746_v53  ;;  %v5749_v53 = vld [vmem:[%s6110_s17 + $0x394] ss:$28 sps:$4 sm:$0xff]  }
 0x1a2   : > { %4892 = vmatprep.subr.bf16.mxu1 %v5757_v57  ;;  %v5753_v5 = vld [vmem:[%s6110_s17 + $0x824] ss:$28 sps:$4 sm:$0xff]  }
 0x1a3   : > { %3123 = vmatmul.mubr.bf16.gmra.mrb[128].mxu1 %v5725_v61  ;;  %3316 = vmatmul.mubr.bf16.gmra.mrb[48].mxu0 %v5726_v63  ;;  %v5751_v61 = vld [vmem:[%s6110_s17 + $0x7e8] ss:$28 sps:$4 sm:$0xff]  }
 0x1a4   : > { %3130 = vmatprep.mubr.bf16.mxu1 %v5727_v2  ;;  %3323 = vmatprep.mubr.bf16.mxu0 %v5729_v6  ;;  %v5752_v2 = vld [vmem:[%s6110_s17 + $0x390] ss:$28 sps:$4 sm:$0xff]  }
 0x1a5   : > { %4893 = vmatpush3.bf16.msra.mxu1 %v5757_v57 }
 0x1a6   : > { %v6554_v10 = vpop.f32.mrb[64].mxu1  ;;  %4894 = vmatprep.subr.bf16.mxu1 %v5766_v8 }
 0x1a7   : > { %v2645_v11 = vpop.f32.mrb[65].mxu1 }
 0x1a8   : > { %v6557_v15 = vpop.f32.mrb[66].mxu1 }
 0x1a9   : > { %v2648_v21 = vpop.f32.mrb[67].mxu1  ;;  %4895 = vmatpush3.bf16.msra.mxu1 %v5766_v8  ;;  %v5755_v8 = vld [vmem:[%s6110_s17 + $0x3cc] ss:$28 sps:$4 sm:$0xff]  }
 0x1aa   : > { %v5759_v21 = vld [vmem:[%s6110_s17 + $0x3c8] ss:$28 sps:$4 sm:$0xff]  }
 0x1ab   : > { %3131 = vmatmul.mubr.bf16.gmra.mrb[132].mxu1 %v5731_v13  ;;  %3324 = vmatmul.mubr.bf16.gmra.mrb[52].mxu0 %v5732_v16  ;;  %v5758_v16 = vld [vmem:[%s6110_s17 + $0x820] ss:$28 sps:$4 sm:$0xff]  }
 0x1ac   : > { %3138 = vmatprep.mubr.bf16.mxu1 %v5734_v19  ;;  %3331 = vmatprep.mubr.bf16.mxu0 %v5736_v22  ;;  %v5760_v22 = vld [vmem:[%s6110_s17 + $0x85c] ss:$28 sps:$4 sm:$0xff]  }
 0x1ae   : > { %v6562_v23 = vpop.f32.mrb[68].mxu1 }
 0x1af   : > { %v2653_v27 = vpop.f32.mrb[69].mxu1 }
 0x1b0   : > { %v6565_v31 = vpop.f32.mrb[70].mxu1 }
 0x1b1   : > { %v2656_v37 = vpop.f32.mrb[71].mxu1 }
 0x1b2   : > { %v5764_v37 = vld [vmem:[%s6110_s17 + $0x858] ss:$28 sps:$4 sm:$0xff]  }
 0x1b3   : > { %3139 = vmatmul.mubr.bf16.gmra.mrb[136].mxu1 %v5738_v28  ;;  %3332 = vmatmul.mubr.bf16.gmra.mrb[56].mxu0 %v5739_v32  ;;  %v5762_v28 = vld [vmem:[%s6110_s17 + $0x404] ss:$28 sps:$4 sm:$0xff]  }
 0x1b4   : > { %3146 = vmatprep.mubr.bf16.mxu1 %v5740_v34  ;;  %3339 = vmatprep.mubr.bf16.mxu0 %v5742_v38 }
 0x1b6   : > { %v6570_v39 = vpop.f32.mrb[72].mxu1 }
 0x1b7   : > { %v2661_v42 = vpop.f32.mrb[73].mxu1 }
 0x1b8   : > { %v6573_v47 = vpop.f32.mrb[74].mxu1  ;;  %v5765_v42 = vld [vmem:[%s6110_s17 + $0x400] ss:$28 sps:$4 sm:$0xff]  }
 0x1b9   : > { %v2664_v24 = vpop.f32.mrb[75].mxu1 }
 0x1bb   : > { %3147 = vmatmul.mubr.bf16.gmra.mrb[140].mxu1 %v5744_v44  ;;  %3340 = vmatmul.mubr.bf16.gmra.mrb[60].mxu0 %v5745_v50  ;;  %v5767_v44 = vld [vmem:[%s6110_s17 + $0x894] ss:$28 sps:$4 sm:$0xff]  }
 0x1bc   : > { %3154 = vmatprep.mubr.bf16.mxu1 %v5747_v52  ;;  %3347 = vmatprep.mubr.bf16.mxu0 %v5749_v53  ;;  %v5769_v52 = vld [vmem:[%s6110_s17 + $0x43c] ss:$28 sps:$4 sm:$0xff]  }
 0x1be   : > { %v6578_v57 = vpop.f32.mrb[76].mxu1 }
 0x1bf   : > { %v2669_v58 = vpop.f32.mrb[77].mxu1 }
 0x1c0   : > { %v6581_v63 = vpop.f32.mrb[78].mxu1  ;;  %v5771_v58 = vld [vmem:[%s6110_s17 + $0x890] ss:$28 sps:$4 sm:$0xff]  }
 0x1c1   : > { %v2672_v6 = vpop.f32.mrb[79].mxu1 }
 0x1c3   : > { %3155 = vmatmul.mubr.bf16.gmra.mrb[144].mxu1 %v5751_v61  ;;  %3348 = vmatmul.mubr.bf16.gmra.mrb[64].mxu0 %v5752_v2  ;;  %v5772_v2 = vld [vmem:[%s6110_s17 + $0x438] ss:$28 sps:$4 sm:$0xff]  }
 0x1c4   : > { %3162 = vmatprep.mubr.bf16.mxu1 %v5753_v5  ;;  %3355 = vmatprep.mubr.bf16.mxu0 %v5755_v8  ;;  %v5775_v5 = vld [vmem:[%s6110_s17 + $0x18] ss:$28 sps:$4 sm:$0xff]  }
 0x1c5   : > { %v5773_v8 = vld [vmem:[%s6110_s17 + $0x474] ss:$28 sps:$4 sm:$0xff]  }
 0x1c6   : > { %v6586_v11 = vpop.f32.mrb[80].mxu1 }
 0x1c7   : > { %v2677_v13 = vpop.f32.mrb[81].mxu1 }
 0x1c8   : > { %v6589_v19 = vpop.f32.mrb[82].mxu1 }
 0x1c9   : > { %v2680_v27 = vpop.f32.mrb[83].mxu1 }
 0x1ca   : > { %v5776_v27 = vld [vmem:[%s6110_s17 + $0x470] ss:$28 sps:$4 sm:$0xff]  }
 0x1cb   : > { %3163 = vmatmul.mubr.bf16.gmra.mrb[148].mxu1 %v5758_v16  ;;  %3356 = vmatmul.mubr.bf16.gmra.mrb[68].mxu0 %v5759_v21  ;;  %v5777_v21 = vld [vmem:[%s6110_s17 + $0x50] ss:$28 sps:$4 sm:$0xff]  }
 0x1cc   : > { %3170 = vmatprep.mubr.bf16.mxu1 %v5760_v22  ;;  %3363 = vmatprep.mubr.bf16.mxu0 %v5762_v28  ;;  %v5780_v28 = vld [vmem:[%s6110_s17 + $0x88] ss:$28 sps:$4 sm:$0xff]  }
 0x1ce   : > { %v6594_v32 = vpop.f32.mrb[84].mxu1 }
 0x1cf   : > { %v2685_v34 = vpop.f32.mrb[85].mxu1 }
 0x1d0   : > { %v6597_v38 = vpop.f32.mrb[86].mxu1 }
 0x1d1   : > { %v2688_v50 = vpop.f32.mrb[87].mxu1 }
 0x1d2   : > { %v5782_v50 = vld [vmem:[%s6110_s17 + $0xc0] ss:$28 sps:$4 sm:$0xff]  }
 0x1d3   : > { %3171 = vmatmul.mubr.bf16.gmra.mrb[152].mxu1 %v5764_v37  ;;  %3364 = vmatmul.mubr.bf16.gmra.mrb[72].mxu0 %v5765_v42  ;;  %v5778_v37 = vld [vmem:[%s6110_s17 + $0x4ac] ss:$28 sps:$4 sm:$0xff]  }
 0x1d4   : > { %3178 = vmatprep.mubr.bf16.mxu1 %v5767_v44  ;;  %3371 = vmatprep.mubr.bf16.mxu0 %v5769_v52 }
 0x1d6   : > { %v6602_v24 = vpop.f32.mrb[88].mxu1 }
 0x1d7   : > { %v2693_v53 = vpop.f32.mrb[89].mxu1 }
 0x1d8   : > { %v6605_v61 = vpop.f32.mrb[90].mxu1  ;;  %v5781_v53 = vld [vmem:[%s6110_s17 + $0x4a8] ss:$28 sps:$4 sm:$0xff]  }
 0x1d9   : > { %v2696_v6 = vpop.f32.mrb[91].mxu1 }
 0x1db   : > { %3179 = vmatmul.mubr.bf16.gmra.mrb[156].mxu1 %v5771_v58  ;;  %3372 = vmatmul.mubr.bf16.gmra.mrb[76].mxu0 %v5772_v2  ;;  %v5785_v58 = vld [vmem:[%s6110_s17 + $0xf8] ss:$28 sps:$4 sm:$0xff]  }
 0x1dc   : > { %4896 = vmatprep.mubr.msk.bf16.mxu1 %vm2360_vm0, %v5775_v5  ;;  %3379 = vmatprep.mubr.bf16.mxu0 %v5773_v8  ;;  %v5783_v5 = vld [vmem:[%s6110_s17 + $0x4e4] ss:$28 sps:$4 sm:$0xff]  }
 0x1de   : > { %v6611_v13 = vpop.f32.mrb[92].mxu1 }
 0x1df   : > { %v2701_v16 = vpop.f32.mrb[93].mxu1 }
 0x1e0   : > { %v6614_v22 = vpop.f32.mrb[94].mxu1  ;;  %v5787_v16 = vld [vmem:[%s6110_s17 + $0x130] ss:$28 sps:$4 sm:$0xff]  }
 0x1e1   : > { %v2704_v34 = vpop.f32.mrb[95].mxu1 }
 0x1e3   : > { %4897 = vmatmul.mubr.msk.bf16.vlgmr.msra.gmra.mrb[160].mxu1 %vm2360_vm0, %v5777_v21  ;;  %3380 = vmatmul.mubr.bf16.gmra.mrb[80].mxu0 %v5776_v27  ;;  %v5786_v27 = vld [vmem:[%s6110_s17 + $0x4e0] ss:$28 sps:$4 sm:$0xff]  }
 0x1e4   : > { %4900 = vmatprep.mubr.msk.bf16.mxu1 %vm2360_vm0, %v5780_v28  ;;  %3387 = vmatprep.mubr.bf16.mxu0 %v5778_v37  ;;  %v5790_v28 = vld [vmem:[%s6110_s17 + $0x168] ss:$28 sps:$4 sm:$0xff]   ;;  %v5788_v37 = vld [vmem:[%s6110_s17 + $0x51c] ss:$28 sps:$4 sm:$0xff]  }
 0x1e6   : > { %v6621_v42 = vpop.f32.mrb[96].mxu1 }
 0x1e7   : > { %v2709_v44 = vpop.f32.mrb[97].mxu1 }
 0x1e8   : > { %v6624_v52 = vpop.f32.mrb[98].mxu1 }
 0x1e9   : > { %v2712_v2 = vpop.f32.mrb[99].mxu1 }
 0x1ea   : > { %v5791_v2 = vld [vmem:[%s6110_s17 + $0x518] ss:$28 sps:$4 sm:$0xff]  }
 0x1eb   : > { %4901 = vmatmul.mubr.msk.bf16.gmra.mrb[164].mxu1 %vm2360_vm0, %v5782_v50  ;;  %3388 = vmatmul.mubr.bf16.gmra.mrb[84].mxu0 %v5781_v53  ;;  %v5792_v53 = vld [vmem:[%s6110_s17 + $0x1a0] ss:$28 sps:$4 sm:$0xff]  }
 0x1ec   : > { %4904 = vmatprep.mubr.msk.bf16.mxu1 %vm2360_vm0, %v5785_v58  ;;  %3395 = vmatprep.mubr.bf16.mxu0 %v5783_v5  ;;  %v5795_v5 = vld [vmem:[%s6110_s17 + $0x1d8] ss:$28 sps:$4 sm:$0xff]  }
 0x1ee   : > { %v6631_v6 = vpop.f32.mrb[100].mxu1 }
 0x1ef   : > { %7458 = vst [vmem:[#allocation3_spill] sm:$0xff] %v6631_v6  ;;  %v2717_v8 = vpop.f32.mrb[101].mxu1 }
 0x1f0   : > { %v6634_v21 = vpop.f32.mrb[102].mxu1 }
 0x1f1   : > { %7459 = vst [vmem:[#allocation4_spill] sm:$0xff] %v6634_v21  ;;  %v2720_v34 = vpop.f32.mrb[103].mxu1  ;;  %v5815_v21 = vld [vmem:[%s6110_s17 + $0x398] ss:$28 sps:$4 sm:$0xff]  }
 0x1f2   : > { %v5793_v34 = vld [vmem:[%s6110_s17 + $0x554] ss:$28 sps:$4 sm:$0xff]  }
 0x1f3   : > { %4905 = vmatmul.mubr.msk.bf16.gmra.mrb[168].mxu1 %vm2360_vm0, %v5787_v16  ;;  %3396 = vmatmul.mubr.bf16.gmra.mrb[88].mxu0 %v5786_v27 }
 0x1f4   : > { %4908 = vmatprep.mubr.msk.bf16.mxu1 %vm2360_vm0, %v5790_v28  ;;  %3403 = vmatprep.mubr.bf16.mxu0 %v5788_v37  ;;  %v5797_v28 = vld [vmem:[%s6110_s17 + $0x210] ss:$28 sps:$4 sm:$0xff]  }
 0x1f6   : > { %v6641_v44 = vpop.f32.mrb[104].mxu1 }
 0x1f7   : > { %7460 = vst [vmem:[#allocation5_spill] sm:$0xff] %v6641_v44  ;;  %v2725_v50 = vpop.f32.mrb[105].mxu1  ;;  %v5798_v44 = vld [vmem:[%s6110_s17 + $0x58c] ss:$28 sps:$4 sm:$0xff]  }
 0x1f8   : > { %v6644_v58 = vpop.f32.mrb[106].mxu1  ;;  %v5796_v50 = vld [vmem:[%s6110_s17 + $0x550] ss:$28 sps:$4 sm:$0xff]  }
 0x1f9   : > { %7461 = vst [vmem:[#allocation6_spill] sm:$0xff] %v6644_v58  ;;  %v2728_v8 = vpop.f32.mrb[107].mxu1  ;;  %v5800_v58 = vld [vmem:[%s6110_s17 + $0x248] ss:$28 sps:$4 sm:$0xff]  }
 0x1fb   : > { %4909 = vmatmul.mubr.msk.bf16.gmra.mrb[172].mxu1 %vm2360_vm0, %v5792_v53  ;;  %3404 = vmatmul.mubr.bf16.gmra.mrb[92].mxu0 %v5791_v2 }
 0x1fc   : > { %4912 = vmatprep.mubr.msk.bf16.mxu1 %vm2360_vm0, %v5795_v5  ;;  %3411 = vmatprep.mubr.bf16.mxu0 %v5793_v34  ;;  %v5802_v5 = vld [vmem:[%s6110_s17 + $0x280] ss:$28 sps:$4 sm:$0xff]  }
 0x1fe   : > { %v6651_v16 = vpop.f32.mrb[108].mxu1 }
 0x1ff   : > { %7462 = vst [vmem:[#allocation7_spill] sm:$0xff] %v6651_v16  ;;  %v2733_v27 = vpop.f32.mrb[109].mxu1  ;;  %v5803_v16 = vld [vmem:[%s6110_s17 + $0x5c4] ss:$28 sps:$4 sm:$0xff]  }
 0x200   : > { %v6654_v37 = vpop.f32.mrb[110].mxu1  ;;  %v5801_v27 = vld [vmem:[%s6110_s17 + $0x588] ss:$28 sps:$4 sm:$0xff]  }
 0x201   : > { %7463 = vst [vmem:[#allocation8_spill] sm:$0xff] %v6654_v37  ;;  %v2736_v8 = vpop.f32.mrb[111].mxu1  ;;  %v5805_v37 = vld [vmem:[%s6110_s17 + $0x2b8] ss:$28 sps:$4 sm:$0xff]  }
 0x203   : > { %4913 = vmatmul.mubr.msk.bf16.gmra.mrb[176].mxu1 %vm2360_vm0, %v5797_v28  ;;  %3412 = vmatmul.mubr.bf16.gmra.mrb[96].mxu0 %v5796_v50  ;;  %v5807_v28 = vld [vmem:[%s6110_s17 + $0x2f0] ss:$28 sps:$4 sm:$0xff]  }
 0x204   : > { %4916 = vmatprep.mubr.msk.bf16.mxu1 %vm2360_vm0, %v5800_v58  ;;  %3419 = vmatprep.mubr.bf16.mxu0 %v5798_v44 }
 0x206   : > { %v6661_v53 = vpop.f32.mrb[112].mxu1 }
 0x207   : > { %7464 = vst [vmem:[#allocation9_spill] sm:$0xff] %v6661_v53  ;;  %v2741_v2 = vpop.f32.mrb[113].mxu1 }
 0x208   : > { %v6664_v34 = vpop.f32.mrb[114].mxu1  ;;  %v5806_v2 = vld [vmem:[%s6110_s17 + $0x5c0] ss:$28 sps:$4 sm:$0xff]  }
 0x209   : > { %7465 = vst [vmem:[#allocation10_spill] sm:$0xff] %v6664_v34  ;;  %v2744_v8 = vpop.f32.mrb[115].mxu1  ;;  %v5810_v34 = vld [vmem:[%s6110_s17 + $0x328] ss:$28 sps:$4 sm:$0xff]  }
 0x20a   : > { %v5808_v8 = vld [vmem:[%s6110_s17 + $0x5fc] ss:$28 sps:$4 sm:$0xff]  }
 0x20b   : > { %4917 = vmatmul.mubr.msk.bf16.gmra.mrb[180].mxu1 %vm2360_vm0, %v5802_v5  ;;  %3420 = vmatmul.mubr.bf16.gmra.mrb[100].mxu0 %v5801_v27  ;;  %v6682_v5 = vld [vmem:[%s7455_s2] ss:$0 sm:$0xff] }
 0x20c   : > { %4920 = vmatprep.mubr.msk.bf16.mxu1 %vm2360_vm0, %v5805_v37  ;;  %3427 = vmatprep.mubr.bf16.mxu0 %v5803_v16  ;;  %v2516_v16 = vadd.f32 %v6682_v5, %v6410_v33  ;;  %v5812_v27 = vld [vmem:[%s6110_s17 + $0x360] ss:$28 sps:$4 sm:$0xff]   ;;  %v2524_v33 = vadd.f32 %v6682_v5, %v6418_v40  ;;  %v2532_v40 = vadd.f32 %v6682_v5, %v6426_v48 }
 0x20d   : > { %v2540_v48 = vadd.f32 %v6682_v5, %v6434_v56  ;;  %v2548_v56 = vadd.f32 %v6682_v5, %v6442_v0  ;;  %v2556_v0 = vadd.f32 %v6682_v5, %v6450_v9  ;;  %v2564_v9 = vadd.f32 %v6682_v5, %v6458_v17 }
 0x20e   : > { %v6671_v44 = vpop.f32.mrb[116].mxu1  ;;  %v2572_v17 = vadd.f32 %v6682_v5, %v6466_v26  ;;  %v2580_v26 = vadd.f32 %v6682_v5, %v6474_v35  ;;  %v2588_v35 = vadd.f32 %v6682_v5, %v6482_v45  ;;  %v2596_v45 = vadd.f32 %v6682_v5, %v6490_v55 }
 0x20f   : > { %7466 = vst [vmem:[#allocation11_spill] sm:$0xff] %v6671_v44  ;;  %v2749_v58 = vpop.f32.mrb[117].mxu1  ;;  %v5811_v44 = vld [vmem:[%s6110_s17 + $0x5f8] ss:$28 sps:$4 sm:$0xff]  }
 0x210   : > { %v6674_v50 = vpop.f32.mrb[118].mxu1 }
 0x211   : > { %7467 = vst [vmem:[#allocation12_spill] sm:$0xff] %v6674_v50  ;;  %v2752_v53 = vpop.f32.mrb[119].mxu1 }
 0x212   : > { %v2519_v53 = vadd.f32 %v6682_v5, %v6413_v36 }
 0x213   : > { %4921 = vmatmul.mubr.msk.bf16.gmra.mrb[184].mxu1 %vm2360_vm0, %v5807_v28  ;;  %3428 = vmatmul.mubr.bf16.gmra.mrb[104].mxu0 %v5806_v2  ;;  %v5813_v2 = vld [vmem:[%s6110_s17 + $0x634] ss:$28 sps:$4 sm:$0xff]  }
 0x214   : > { %4924 = vmatprep.mubr.msk.bf16.mxu1 %vm2360_vm0, %v5810_v34  ;;  %3435 = vmatprep.mubr.bf16.mxu0 %v5808_v8 }
 0x216   : > { %v3221_v37 = vpop.f32.mrb[0].mxu0 }
 0x217   : > { %v6691_v58 = vadd.f32 %v3221_v37, %v2516_v16  ;;  %v3223_v50 = vpop.f32.mrb[1].mxu0  ;;  %v2527_v16 = vadd.f32 %v6682_v5, %v6421_v43 }
 0x218   : > { %v3224_v28 = vpop.f32.mrb[2].mxu0  ;;  %v5817_v50 = vld [vmem:[%s6110_s17 + $0x3d0] ss:$28 sps:$4 sm:$0xff]  }
 0x219   : > { %v6696_v34 = vadd.f32 %v3224_v28, %v2519_v53  ;;  %v3226_v8 = vpop.f32.mrb[3].mxu0  ;;  %v5816_v28 = vld [vmem:[%s6110_s17 + $0x630] ss:$28 sps:$4 sm:$0xff]  }
 0x21a   : > { %v5820_v8 = vld [vmem:[%s6110_s17 + $0x408] ss:$28 sps:$4 sm:$0xff]  }
 0x21b   : > { %4925 = vmatmul.mubr.msk.bf16.gmra.mrb[188].mxu1 %vm2360_vm0, %v5812_v27  ;;  %3436 = vmatmul.mubr.bf16.gmra.mrb[108].mxu0 %v5811_v44  ;;  %v5818_v27 = vld [vmem:[%s6110_s17 + $0x66c] ss:$28 sps:$4 sm:$0xff]  }
 0x21c   : > { %4928 = vmatprep.mubr.msk.bf16.mxu1 %vm2360_vm0, %v5815_v21  ;;  %3443 = vmatprep.mubr.bf16.mxu0 %v5813_v2 }
 0x21e   : > { %v3229_v36 = vpop.f32.mrb[4].mxu0 }
 0x21f   : > { %v6705_v37 = vadd.f32 %v3229_v36, %v2524_v33  ;;  %v3231_v53 = vpop.f32.mrb[5].mxu0  ;;  %v5822_v33 = vld [vmem:[%s6110_s17 + $0x440] ss:$28 sps:$4 sm:$0xff]   ;;  %v2535_v36 = vadd.f32 %v6682_v5, %v6429_v51 }
 0x220   : > { %v3232_v44 = vpop.f32.mrb[6].mxu0 }
 0x221   : > { %v6710_v21 = vadd.f32 %v3232_v44, %v2527_v16  ;;  %v3234_v2 = vpop.f32.mrb[7].mxu0  ;;  %v5821_v44 = vld [vmem:[%s6110_s17 + $0x668] ss:$28 sps:$4 sm:$0xff]  }
 0x222   : > { %v5825_v2 = vld [vmem:[%s6110_s17 + $0x478] ss:$28 sps:$4 sm:$0xff]  }
 0x223   : > { %4929 = vmatmul.mubr.msk.bf16.gmra.mrb[192].mxu1 %vm2360_vm0, %v5817_v50  ;;  %3444 = vmatmul.mubr.bf16.gmra.mrb[112].mxu0 %v5816_v28  ;;  %v5823_v28 = vld [vmem:[%s6110_s17 + $0x6a4] ss:$28 sps:$4 sm:$0xff]  }
 0x224   : > { %4932 = vmatprep.mubr.msk.bf16.mxu1 %vm2360_vm0, %v5820_v8  ;;  %3451 = vmatprep.mubr.bf16.mxu0 %v5818_v27 }
 0x226   : > { %v3237_v43 = vpop.f32.mrb[8].mxu0 }
 0x227   : > { %v6719_v53 = vadd.f32 %v3237_v43, %v2532_v40  ;;  %v3239_v16 = vpop.f32.mrb[9].mxu0  ;;  %v5827_v40 = vld [vmem:[%s6110_s17 + $0x4b0] ss:$28 sps:$4 sm:$0xff]   ;;  %v2543_v43 = vadd.f32 %v6682_v5, %v6437_v59 }
 0x228   : > { %v3240_v50 = vpop.f32.mrb[10].mxu0 }
 0x229   : > { %v6724_v8 = vadd.f32 %v3240_v50, %v2535_v36  ;;  %v3242_v27 = vpop.f32.mrb[11].mxu0  ;;  %v5826_v50 = vld [vmem:[%s6110_s17 + $0x6a0] ss:$28 sps:$4 sm:$0xff]  }
 0x22a   : > { %v5830_v27 = vld [vmem:[%s6110_s17 + $0x4e8] ss:$28 sps:$4 sm:$0xff]  }
 0x22b   : > { %4933 = vmatmul.mubr.msk.bf16.gmra.mrb[196].mxu1 %vm2360_vm0, %v5822_v33  ;;  %3452 = vmatmul.mubr.bf16.gmra.mrb[116].mxu0 %v5821_v44  ;;  %v5828_v44 = vld [vmem:[%s6110_s17 + $0x6dc] ss:$28 sps:$4 sm:$0xff]  }
 0x22c   : > { %4936 = vmatprep.mubr.msk.bf16.mxu1 %vm2360_vm0, %v5825_v2  ;;  %3459 = vmatprep.mubr.bf16.mxu0 %v5823_v28 }
 0x22e   : > { %v3245_v51 = vpop.f32.mrb[12].mxu0 }
 0x22f   : > { %v6733_v16 = vadd.f32 %v3245_v51, %v2540_v48  ;;  %v3247_v36 = vpop.f32.mrb[13].mxu0  ;;  %v5832_v48 = vld [vmem:[%s6110_s17 + $0x520] ss:$28 sps:$4 sm:$0xff]   ;;  %v2551_v51 = vadd.f32 %v6682_v5, %v6445_v4 }
 0x230   : > { %v3248_v33 = vpop.f32.mrb[14].mxu0 }
 0x231   : > { %v6738_v2 = vadd.f32 %v3248_v33, %v2543_v43  ;;  %v3250_v28 = vpop.f32.mrb[15].mxu0  ;;  %v5831_v33 = vld [vmem:[%s6110_s17 + $0x6d8] ss:$28 sps:$4 sm:$0xff]  }
 0x232   : > { %v5835_v28 = vld [vmem:[%s6110_s17 + $0x558] ss:$28 sps:$4 sm:$0xff]  }
 0x233   : > { %4937 = vmatmul.mubr.msk.bf16.gmra.mrb[200].mxu1 %vm2360_vm0, %v5827_v40  ;;  %3460 = vmatmul.mubr.bf16.gmra.mrb[120].mxu0 %v5826_v50  ;;  %v5833_v50 = vld [vmem:[%s6110_s17 + $0x714] ss:$28 sps:$4 sm:$0xff]  }
 0x234   : > { %4940 = vmatprep.mubr.msk.bf16.mxu1 %vm2360_vm0, %v5830_v27  ;;  %3467 = vmatprep.mubr.bf16.mxu0 %v5828_v44 }
 0x236   : > { %v3253_v59 = vpop.f32.mrb[16].mxu0 }
 0x237   : > { %v6747_v36 = vadd.f32 %v3253_v59, %v2548_v56  ;;  %v3255_v43 = vpop.f32.mrb[17].mxu0  ;;  %v5837_v56 = vld [vmem:[%s6110_s17 + $0x590] ss:$28 sps:$4 sm:$0xff]   ;;  %v2559_v59 = vadd.f32 %v6682_v5, %v6453_v12 }
 0x238   : > { %v3256_v40 = vpop.f32.mrb[18].mxu0 }
 0x239   : > { %v6752_v27 = vadd.f32 %v3256_v40, %v2551_v51  ;;  %v3258_v44 = vpop.f32.mrb[19].mxu0  ;;  %v5836_v40 = vld [vmem:[%s6110_s17 + $0x710] ss:$28 sps:$4 sm:$0xff]  }
 0x23a   : > { %v5840_v44 = vld [vmem:[%s6110_s17 + $0x5c8] ss:$28 sps:$4 sm:$0xff]  }
 0x23b   : > { %4941 = vmatmul.mubr.msk.bf16.gmra.mrb[204].mxu1 %vm2360_vm0, %v5832_v48  ;;  %3468 = vmatmul.mubr.bf16.gmra.mrb[124].mxu0 %v5831_v33  ;;  %v5838_v33 = vld [vmem:[%s6110_s17 + $0x74c] ss:$28 sps:$4 sm:$0xff]  }
 0x23c   : > { %4944 = vmatprep.mubr.msk.bf16.mxu1 %vm2360_vm0, %v5835_v28  ;;  %3475 = vmatprep.mubr.bf16.mxu0 %v5833_v50 }
 0x23e   : > { %v3261_v4 = vpop.f32.mrb[20].mxu0 }
 0x23f   : > { %v6761_v43 = vadd.f32 %v3261_v4, %v2556_v0  ;;  %v3263_v51 = vpop.f32.mrb[21].mxu0  ;;  %v5842_v0 = vld [vmem:[%s6110_s17 + $0x600] ss:$28 sps:$4 sm:$0xff]   ;;  %v2567_v4 = vadd.f32 %v6682_v5, %v6461_v20 }
 0x240   : > { %v3264_v48 = vpop.f32.mrb[22].mxu0 }
 0x241   : > { %v6766_v28 = vadd.f32 %v3264_v48, %v2559_v59  ;;  %v3266_v50 = vpop.f32.mrb[23].mxu0  ;;  %v5841_v48 = vld [vmem:[%s6110_s17 + $0x748] ss:$28 sps:$4 sm:$0xff]  }
 0x242   : > { %v5845_v50 = vld [vmem:[%s6110_s17 + $0x638] ss:$28 sps:$4 sm:$0xff]  }
 0x243   : > { %4945 = vmatmul.mubr.msk.bf16.gmra.mrb[208].mxu1 %vm2360_vm0, %v5837_v56  ;;  %3476 = vmatmul.mubr.bf16.gmra.mrb[128].mxu0 %v5836_v40  ;;  %v5843_v40 = vld [vmem:[%s6110_s17 + $0x784] ss:$28 sps:$4 sm:$0xff]  }
 0x244   : > { %4948 = vmatprep.mubr.msk.bf16.mxu1 %vm2360_vm0, %v5840_v44  ;;  %3483 = vmatprep.mubr.bf16.mxu0 %v5838_v33 }
 0x246   : > { %v3269_v12 = vpop.f32.mrb[24].mxu0 }
 0x247   : > { %v6775_v51 = vadd.f32 %v3269_v12, %v2564_v9  ;;  %v3271_v59 = vpop.f32.mrb[25].mxu0  ;;  %v5847_v9 = vld [vmem:[%s6110_s17 + $0x670] ss:$28 sps:$4 sm:$0xff]   ;;  %v2575_v12 = vadd.f32 %v6682_v5, %v6469_v29 }
 0x248   : > { %v3272_v56 = vpop.f32.mrb[26].mxu0 }
 0x249   : > { %v6780_v44 = vadd.f32 %v3272_v56, %v2567_v4  ;;  %v3274_v33 = vpop.f32.mrb[27].mxu0  ;;  %v5846_v56 = vld [vmem:[%s6110_s17 + $0x780] ss:$28 sps:$4 sm:$0xff]  }
 0x24a   : > { %v5850_v33 = vld [vmem:[%s6110_s17 + $0x6a8] ss:$28 sps:$4 sm:$0xff]  }
 0x24b   : > { %4949 = vmatmul.mubr.msk.bf16.gmra.mrb[212].mxu1 %vm2360_vm0, %v5842_v0  ;;  %3484 = vmatmul.mubr.bf16.gmra.mrb[132].mxu0 %v5841_v48  ;;  %v5848_v48 = vld [vmem:[%s6110_s17 + $0x7bc] ss:$28 sps:$4 sm:$0xff]  }
 0x24c   : > { %4952 = vmatprep.mubr.msk.bf16.mxu1 %vm2360_vm0, %v5845_v50  ;;  %3491 = vmatprep.mubr.bf16.mxu0 %v5843_v40 }
 0x24e   : > { %v3277_v20 = vpop.f32.mrb[28].mxu0 }
 0x24f   : > { %v6789_v59 = vadd.f32 %v3277_v20, %v2572_v17  ;;  %v3279_v4 = vpop.f32.mrb[29].mxu0  ;;  %v5852_v17 = vld [vmem:[%s6110_s17 + $0x6e0] ss:$28 sps:$4 sm:$0xff]   ;;  %v2583_v20 = vadd.f32 %v6682_v5, %v6477_v1 }
 0x250   : > { %v3280_v0 = vpop.f32.mrb[30].mxu0 }
 0x251   : > { %v6794_v50 = vadd.f32 %v3280_v0, %v2575_v12  ;;  %v3282_v40 = vpop.f32.mrb[31].mxu0  ;;  %v5851_v0 = vld [vmem:[%s6110_s17 + $0x7b8] ss:$28 sps:$4 sm:$0xff]  }
 0x252   : > { %v5855_v40 = vld [vmem:[%s6110_s17 + $0x718] ss:$28 sps:$4 sm:$0xff]  }
 0x253   : > { %4953 = vmatmul.mubr.msk.bf16.gmra.mrb[216].mxu1 %vm2360_vm0, %v5847_v9  ;;  %3492 = vmatmul.mubr.bf16.gmra.mrb[136].mxu0 %v5846_v56  ;;  %v5853_v56 = vld [vmem:[%s6110_s17 + $0x7f4] ss:$28 sps:$4 sm:$0xff]  }
 0x254   : > { %4956 = vmatprep.mubr.msk.bf16.mxu1 %vm2360_vm0, %v5850_v33  ;;  %3499 = vmatprep.mubr.bf16.mxu0 %v5848_v48 }
 0x256   : > { %v3285_v29 = vpop.f32.mrb[32].mxu0 }
 0x257   : > { %v6803_v4 = vadd.f32 %v3285_v29, %v2580_v26  ;;  %v3287_v12 = vpop.f32.mrb[33].mxu0  ;;  %v5857_v26 = vld [vmem:[%s6110_s17 + $0x750] ss:$28 sps:$4 sm:$0xff]   ;;  %v2591_v29 = vadd.f32 %v6682_v5, %v6485_v49 }
 0x258   : > { %v3288_v9 = vpop.f32.mrb[34].mxu0 }
 0x259   : > { %v6808_v33 = vadd.f32 %v3288_v9, %v2583_v20  ;;  %v3290_v48 = vpop.f32.mrb[35].mxu0  ;;  %v5856_v9 = vld [vmem:[%s6110_s17 + $0x7f0] ss:$28 sps:$4 sm:$0xff]  }
 0x25a   : > { %v5860_v48 = vld [vmem:[%s6110_s17 + $0x788] ss:$28 sps:$4 sm:$0xff]  }
 0x25b   : > { %7468 = vst [vmem:[#allocation13_spill] sm:$0xff] %v6808_v33  ;;  %4957 = vmatmul.mubr.msk.bf16.gmra.mrb[220].mxu1 %vm2360_vm0, %v5852_v17  ;;  %3500 = vmatmul.mubr.bf16.gmra.mrb[140].mxu0 %v5851_v0  ;;  %v5858_v17 = vld [vmem:[%s6110_s17 + $0x82c] ss:$28 sps:$4 sm:$0xff]   ;;  %v5863_v33 = vld [vmem:[%s6110_s17 + $0x864] ss:$28 sps:$4 sm:$0xff]  }
 0x25c   : > { %4960 = vmatprep.mubr.msk.bf16.mxu1 %vm2360_vm0, %v5855_v40  ;;  %3507 = vmatprep.mubr.bf16.mxu0 %v5853_v56 }
 0x25e   : > { %v3293_v1 = vpop.f32.mrb[36].mxu0 }
 0x25f   : > { %v6817_v12 = vadd.f32 %v3293_v1, %v2588_v35  ;;  %v3295_v20 = vpop.f32.mrb[37].mxu0  ;;  %v5862_v1 = vld [vmem:[%s6110_s17 + $0x7c0] ss:$28 sps:$4 sm:$0xff]  }
 0x260   : > { %v3296_v6 = vpop.f32.mrb[38].mxu0 }
 0x261   : > { %v6822_v0 = vadd.f32 %v3296_v6, %v2591_v29  ;;  %v3298_v40 = vpop.f32.mrb[39].mxu0  ;;  %v2599_v6 = vadd.f32 %v6682_v5, %v6493_v60  ;;  %v2604_v60 = vadd.f32 %v6682_v5, %v6498_v3 }
 0x263   : > { %4961 = vmatmul.mubr.msk.bf16.gmra.mrb[224].mxu1 %vm2360_vm0, %v5857_v26  ;;  %3508 = vmatmul.mubr.bf16.gmra.mrb[144].mxu0 %v5856_v9  ;;  %v5861_v9 = vld [vmem:[%s6110_s17 + $0x828] ss:$28 sps:$4 sm:$0xff]  }
 0x264   : > { %4964 = vmatprep.mubr.msk.bf16.mxu1 %vm2360_vm0, %v5860_v48  ;;  %3515 = vmatprep.mubr.bf16.mxu0 %v5858_v17  ;;  %v5865_v48 = vld [vmem:[%s6110_s17 + $0x7f8] ss:$28 sps:$4 sm:$0xff]  }
 0x266   : > { %v6828_v49 = vpop.f32.mrb[120].mxu1  ;;  %v3301_v56 = vpop.f32.mrb[40].mxu0 }
 0x267   : > { %7469 = vst [vmem:[#allocation14_spill] sm:$0xff] %v6828_v49  ;;  %v3110_v35 = vpop.f32.mrb[121].mxu1  ;;  %v6833_v29 = vadd.f32 %v3301_v56, %v2596_v45  ;;  %v3303_v20 = vpop.f32.mrb[41].mxu0  ;;  %v5868_v49 = vld [vmem:[%s6110_s17 + $0x89c] ss:$28 sps:$4 sm:$0xff]  }
 0x268   : > { %v6835_v26 = vpop.f32.mrb[122].mxu1  ;;  %v3304_v17 = vpop.f32.mrb[42].mxu0 }
 0x269   : > { %7470 = vst [vmem:[#allocation15_spill] sm:$0xff] %v6835_v26  ;;  %v3113_v40 = vpop.f32.mrb[123].mxu1  ;;  %v6840_v55 = vadd.f32 %v3304_v17, %v2599_v6  ;;  %v3306_v35 = vpop.f32.mrb[43].mxu0  ;;  %v2607_v6 = vadd.f32 %v6682_v5, %v6501_v7  ;;  %v2612_v7 = vadd.f32 %v6682_v5, %v6506_v14  ;;  %v2620_v14 = vadd.f32 %v6682_v5, %v6514_v25 }
 0x26a   : > { %v5867_v40 = vld [vmem:[%s6110_s17 + $0x830] ss:$28 sps:$4 sm:$0xff]   ;;  %v2628_v25 = vadd.f32 %v6682_v5, %v6529_v41  ;;  %v2636_v41 = vadd.f32 %v6682_v5, %v6540_v54  ;;  %v2644_v54 = vadd.f32 %v6682_v5, %v6554_v10  ;;  %v2652_v10 = vadd.f32 %v6682_v5, %v6562_v23 }
 0x26b   : > { %4965 = vmatmul.mubr.msk.bf16.gmra.mrb[228].mxu1 %vm2360_vm0, %v5862_v1  ;;  %3516 = vmatmul.mubr.bf16.gmra.mrb[148].mxu0 %v5861_v9  ;;  %v5866_v9 = vld [vmem:[%s6110_s17 + $0x860] ss:$28 sps:$4 sm:$0xff]   ;;  %v2660_v23 = vadd.f32 %v6682_v5, %v6570_v39  ;;  %v2668_v39 = vadd.f32 %v6682_v5, %v6578_v57  ;;  %v2676_v57 = vadd.f32 %v6682_v5, %v6586_v11 }
 0x26c   : > { %4968 = vmatprep.mubr.msk.bf16.mxu1 %vm2360_vm0, %v5865_v48  ;;  %3523 = vmatprep.mubr.bf16.mxu0 %v5863_v33  ;;  %v5870_v48 = vld [vmem:[%s6110_s17 + $0x868] ss:$28 sps:$4 sm:$0xff]  }
 0x26e   : > { %v6846_v45 = vpop.f32.mrb[124].mxu1  ;;  %v3309_v56 = vpop.f32.mrb[44].mxu0 }
 0x26f   : > { %7471 = vst [vmem:[#allocation16_spill] sm:$0xff] %v6846_v45  ;;  %v3118_v20 = vpop.f32.mrb[125].mxu1  ;;  %v6851_v17 = vadd.f32 %v3309_v56, %v2604_v60  ;;  %v3311_v35 = vpop.f32.mrb[45].mxu0 }
 0x270   : > { %v6853_v1 = vpop.f32.mrb[126].mxu1  ;;  %v3312_v33 = vpop.f32.mrb[46].mxu0  ;;  %v5872_v35 = vld [vmem:[%s6110_s17 + $0x8a0] ss:$28 sps:$4 sm:$0xff]  }
 0x271   : > { %7472 = vst [vmem:[#allocation17_spill] sm:$0xff] %v6853_v1  ;;  %v3121_v26 = vpop.f32.mrb[127].mxu1  ;;  %v6858_v3 = vadd.f32 %v3312_v33, %v2607_v6  ;;  %v3314_v45 = vpop.f32.mrb[47].mxu0 }
 0x272   : > { %v2615_v26 = vadd.f32 %v6682_v5, %v6509_v18 }
 0x273   : > { %4969 = vmatmul.mubr.msk.bf16.gmra.mrb[232].mxu1 %vm2360_vm0, %v5867_v40  ;;  %3524 = vmatmul.mubr.bf16.gmra.mrb[152].mxu0 %v5866_v9  ;;  %v5871_v40 = vld [vmem:[%s6110_s17 + $0x898] ss:$28 sps:$4 sm:$0xff]   ;;  %s175_s17 = sand.u32 1, %s5920_s12  }
 0x274   : > { %4972 = vmatprep.mubr.msk.bf16.mxu1 %vm2360_vm0, %v5870_v48  ;;  %3531 = vmatprep.mubr.bf16.mxu0 %v5868_v49  ;;  %s5328_s18 = smul.u32 640, %s175_s17 }
 0x276   : > { %v6864_v60 = vpop.f32.mrb[128].mxu1  ;;  %v3317_v56 = vpop.f32.mrb[48].mxu0  ;;  %s6970_s12 = scalar_lea.vmem [#allocation2], %s5328_s18  }
 0x277   : > { %7473 = vst [vmem:[#allocation18_spill] sm:$0xff] %v6864_v60  ;;  %v3126_v20 = vpop.f32.mrb[129].mxu1  ;;  %v6869_v6 = vadd.f32 %v3317_v56, %v2612_v7  ;;  %v3319_v45 = vpop.f32.mrb[49].mxu0  ;;  %v2623_v56 = vadd.f32 %v6682_v5, %v6517_v30  ;;  %v2631_v30 = vadd.f32 %v6682_v5, %v6532_v46  ;;  %v2639_v46 = vadd.f32 %v6682_v5, %v6546_v62 }
 0x278   : > { %v6871_v33 = vpop.f32.mrb[130].mxu1  ;;  %v3320_v9 = vpop.f32.mrb[50].mxu0  ;;  %v2647_v62 = vadd.f32 %v6682_v5, %v6557_v15  ;;  %v2655_v15 = vadd.f32 %v6682_v5, %v6565_v31  ;;  %v2663_v31 = vadd.f32 %v6682_v5, %v6573_v47  ;;  %v2671_v47 = vadd.f32 %v6682_v5, %v6581_v63 }
 0x279   : > { %7474 = vst [vmem:[#allocation19_spill] sm:$0xff] %v6871_v33  ;;  %v3129_v48 = vpop.f32.mrb[131].mxu1  ;;  %v6874_v49 = vadd.f32 %v3320_v9, %v2615_v26  ;;  %v3322_v1 = vpop.f32.mrb[51].mxu0  ;;  %v2679_v63 = vadd.f32 %v6682_v5, %v6589_v19 }
 0x27b   : > { %4973 = vmatmul.mubr.msk.bf16.gmra.mrb[236].mxu1 %vm2360_vm0, %v5872_v35  ;;  %3532 = vmatmul.mubr.bf16.gmra.mrb[156].mxu0 %v5871_v40 }
 0x27e   : > { %v6879_v20 = vpop.f32.mrb[132].mxu1  ;;  %v3325_v18 = vpop.f32.mrb[52].mxu0 }
 0x27f   : > { %7475 = vst [vmem:[#allocation20_spill] sm:$0xff] %v6879_v20  ;;  %v3134_v7 = vpop.f32.mrb[133].mxu1  ;;  %v6883_v45 = vadd.f32 %v3325_v18, %v2620_v14  ;;  %v3327_v33 = vpop.f32.mrb[53].mxu0 }
 0x280   : > { %v6885_v48 = vpop.f32.mrb[134].mxu1  ;;  %v3328_v26 = vpop.f32.mrb[54].mxu0 }
 0x281   : > { %7476 = vst [vmem:[#allocation21_spill] sm:$0xff] %v6885_v48  ;;  %v3137_v1 = vpop.f32.mrb[135].mxu1  ;;  %v6887_v9 = vadd.f32 %v3328_v26, %v2623_v56  ;;  %v3330_v35 = vpop.f32.mrb[55].mxu0 }
 0x286   : > { %v6891_v40 = vpop.f32.mrb[136].mxu1  ;;  %v3333_v20 = vpop.f32.mrb[56].mxu0 }
 0x287   : > { %7477 = vst [vmem:[#allocation22_spill] sm:$0xff] %v6891_v40  ;;  %v3142_v7 = vpop.f32.mrb[137].mxu1  ;;  %v6895_v14 = vadd.f32 %v3333_v20, %v2628_v25  ;;  %v3335_v33 = vpop.f32.mrb[57].mxu0 }
 0x288   : > { %v6897_v18 = vpop.f32.mrb[138].mxu1  ;;  %v3336_v48 = vpop.f32.mrb[58].mxu0 }
 0x289   : > { %7478 = vst [vmem:[#allocation23_spill] sm:$0xff] %v6897_v18  ;;  %v3145_v1 = vpop.f32.mrb[139].mxu1  ;;  %v6899_v56 = vadd.f32 %v3336_v48, %v2631_v30  ;;  %v3338_v26 = vpop.f32.mrb[59].mxu0 }
 0x28e   : > { %v6903_v35 = vpop.f32.mrb[140].mxu1  ;;  %v3341_v40 = vpop.f32.mrb[60].mxu0 }
 0x28f   : > { %7479 = vst [vmem:[#allocation24_spill] sm:$0xff] %v6903_v35  ;;  %v3150_v7 = vpop.f32.mrb[141].mxu1  ;;  %v6907_v20 = vadd.f32 %v3341_v40, %v2636_v41  ;;  %v3343_v25 = vpop.f32.mrb[61].mxu0 }
 0x290   : > { %v6909_v33 = vpop.f32.mrb[142].mxu1  ;;  %v3344_v18 = vpop.f32.mrb[62].mxu0 }
 0x291   : > { %7480 = vst [vmem:[#allocation25_spill] sm:$0xff] %v6909_v33  ;;  %v3153_v1 = vpop.f32.mrb[143].mxu1  ;;  %v6911_v48 = vadd.f32 %v3344_v18, %v2639_v46  ;;  %v3346_v30 = vpop.f32.mrb[63].mxu0 }
 0x296   : > { %v6915_v26 = vpop.f32.mrb[144].mxu1  ;;  %v3349_v35 = vpop.f32.mrb[64].mxu0 }
 0x297   : > { %7481 = vst [vmem:[#allocation26_spill] sm:$0xff] %v6915_v26  ;;  %v3158_v7 = vpop.f32.mrb[145].mxu1  ;;  %v6919_v40 = vadd.f32 %v3349_v35, %v2644_v54  ;;  %v3351_v41 = vpop.f32.mrb[65].mxu0 }
 0x298   : > { %v6921_v25 = vpop.f32.mrb[146].mxu1  ;;  %v3352_v33 = vpop.f32.mrb[66].mxu0 }
 0x299   : > { %7482 = vst [vmem:[#allocation27_spill] sm:$0xff] %v6921_v25  ;;  %v3161_v1 = vpop.f32.mrb[147].mxu1  ;;  %v6923_v18 = vadd.f32 %v3352_v33, %v2647_v62  ;;  %v3354_v46 = vpop.f32.mrb[67].mxu0 }
 0x29e   : > { %v6927_v30 = vpop.f32.mrb[148].mxu1  ;;  %v3357_v26 = vpop.f32.mrb[68].mxu0 }
 0x29f   : > { %7483 = vst [vmem:[#allocation28_spill] sm:$0xff] %v6927_v30  ;;  %v3166_v7 = vpop.f32.mrb[149].mxu1  ;;  %v6931_v35 = vadd.f32 %v3357_v26, %v2652_v10  ;;  %v3359_v54 = vpop.f32.mrb[69].mxu0 }
 0x2a0   : > { %v6933_v41 = vpop.f32.mrb[150].mxu1  ;;  %v3360_v25 = vpop.f32.mrb[70].mxu0 }
 0x2a1   : > { %7484 = vst [vmem:[#allocation29_spill] sm:$0xff] %v6933_v41  ;;  %v3169_v1 = vpop.f32.mrb[151].mxu1  ;;  %v6935_v33 = vadd.f32 %v3360_v25, %v2655_v15  ;;  %v3362_v62 = vpop.f32.mrb[71].mxu0 }
 0x2a6   : > { %v6939_v46 = vpop.f32.mrb[152].mxu1  ;;  %v3365_v7 = vpop.f32.mrb[72].mxu0 }
 0x2a7   : > { %7485 = vst [vmem:[#allocation30_spill] sm:$0xff] %v6939_v46  ;;  %v3174_v30 = vpop.f32.mrb[153].mxu1  ;;  %v6943_v26 = vadd.f32 %v3365_v7, %v2660_v23  ;;  %v3367_v10 = vpop.f32.mrb[73].mxu0 }
 0x2a8   : > { %v6945_v54 = vpop.f32.mrb[154].mxu1  ;;  %v3368_v1 = vpop.f32.mrb[74].mxu0 }
 0x2a9   : > { %7486 = vst [vmem:[#allocation31_spill] sm:$0xff] %v6945_v54  ;;  %v3177_v25 = vpop.f32.mrb[155].mxu1  ;;  %v6947_v15 = vadd.f32 %v3368_v1, %v2663_v31  ;;  %v3370_v62 = vpop.f32.mrb[75].mxu0 }
 0x2ae   : > { %v6951_v41 = vpop.f32.mrb[156].mxu1  ;;  %v3373_v46 = vpop.f32.mrb[76].mxu0 }
 0x2af   : > { %7487 = vst [vmem:[#allocation32_spill] sm:$0xff] %v6951_v41  ;;  %v3182_v30 = vpop.f32.mrb[157].mxu1  ;;  %v6956_v23 = vadd.f32 %v3373_v46, %v2668_v39  ;;  %v3375_v7 = vpop.f32.mrb[77].mxu0 }
 0x2b0   : > { %v6958_v10 = vpop.f32.mrb[158].mxu1  ;;  %v3376_v25 = vpop.f32.mrb[78].mxu0 }
 0x2b1   : > { %v3185_v31 = vpop.f32.mrb[159].mxu1  ;;  %v6960_v1 = vadd.f32 %v3376_v25, %v2671_v47  ;;  %v3378_v62 = vpop.f32.mrb[79].mxu0 }
 0x2b6   : > { %v4898_v41 = vpop.f32.mrb[160].mxu1  ;;  %v3381_v30 = vpop.f32.mrb[80].mxu0 }
 0x2b7   : > { %v3583_v54 = vadd.f32 %v6705_v37, %v4898_v41  ;;  %v3574_v60 = vpop.f32.mrb[161].mxu1  ;;  %v6967_v46 = vadd.f32 %v3381_v30, %v2676_v57  ;;  %v3383_v39 = vpop.f32.mrb[81].mxu0  ;;  %v2687_v57 = vadd.f32 %v6682_v5, %v6597_v38  ;;  %v2692_v38 = vadd.f32 %v6682_v5, %v6602_v24 }
 0x2b8   : > { %v3575_v7 = vadd.f32 %v6691_v58, %v3574_v60  ;;  %v4899_v47 = vpop.f32.mrb[162].mxu1  ;;  %v3384_v11 = vpop.f32.mrb[82].mxu0  ;;  %v2684_v58 = vadd.f32 %v6682_v5, %v6594_v32 }
 0x2b9   : > { %3895 = vst [vmem:[%s6970_s12 + $0x10] sm:$0xff] %v3583_v54  ;;  %v3586_v37 = vadd.f32 %v6710_v21, %v4899_v47  ;;  %v3577_v41 = vpop.f32.mrb[163].mxu1  ;;  %v6975_v19 = vadd.f32 %v3384_v11, %v2679_v63  ;;  %v3386_v25 = vpop.f32.mrb[83].mxu0 }
 0x2ba   : > { %3893 = vst [vmem:[%s6970_s12] sm:$0xff] %v3575_v7  ;;  %v3578_v31 = vadd.f32 %v6696_v34, %v3577_v41 }
 0x2bb   : > { %3896 = vst [vmem:[%s6970_s12 + $0x18] sm:$0xff] %v3586_v37 }
 0x2bc   : > { %3894 = vst [vmem:[%s6970_s12 + $0x8] sm:$0xff] %v3578_v31  ;;  %v2695_v31 = vadd.f32 %v6682_v5, %v6605_v61  ;;  %v2700_v61 = vadd.f32 %v6682_v5, %v6611_v13 }
 0x2be   : > { %v4902_v60 = vpop.f32.mrb[164].mxu1  ;;  %v3389_v62 = vpop.f32.mrb[84].mxu0 }
 0x2bf   : > { %v3599_v54 = vadd.f32 %v6733_v16, %v4902_v60  ;;  %v3590_v21 = vpop.f32.mrb[165].mxu1  ;;  %v6985_v30 = vadd.f32 %v3389_v62, %v2684_v58  ;;  %v3391_v63 = vpop.f32.mrb[85].mxu0 }
 0x2c0   : > { %v3591_v34 = vadd.f32 %v6719_v53, %v3590_v21  ;;  %v4903_v39 = vpop.f32.mrb[166].mxu1  ;;  %v3392_v7 = vpop.f32.mrb[86].mxu0 }
 0x2c1   : > { %3899 = vst [vmem:[%s6970_s12 + $0x30] sm:$0xff] %v3599_v54  ;;  %v3602_v32 = vadd.f32 %v6738_v2, %v4903_v39  ;;  %v3593_v47 = vpop.f32.mrb[167].mxu1  ;;  %v6991_v11 = vadd.f32 %v3392_v7, %v2687_v57  ;;  %v3394_v16 = vpop.f32.mrb[87].mxu0  ;;  %v2703_v7 = vadd.f32 %v6682_v5, %v6614_v22  ;;  %v2708_v22 = vadd.f32 %v6682_v5, %v6621_v42 }
 0x2c2   : > { %3897 = vst [vmem:[%s6970_s12 + $0x20] sm:$0xff] %v3591_v34  ;;  %v3594_v37 = vadd.f32 %v6724_v8, %v3593_v47 }
 0x2c3   : > { %3900 = vst [vmem:[%s6970_s12 + $0x38] sm:$0xff] %v3602_v32 }
 0x2c4   : > { %3898 = vst [vmem:[%s6970_s12 + $0x28] sm:$0xff] %v3594_v37 }
 0x2c6   : > { %v4906_v53 = vpop.f32.mrb[168].mxu1  ;;  %v3397_v41 = vpop.f32.mrb[88].mxu0 }
 0x2c7   : > { %v3615_v25 = vadd.f32 %v6761_v43, %v4906_v53  ;;  %v3606_v2 = vpop.f32.mrb[169].mxu1  ;;  %v7001_v58 = vadd.f32 %v3397_v41, %v2692_v38  ;;  %v3399_v60 = vpop.f32.mrb[89].mxu0 }
 0x2c8   : > { %v3607_v8 = vadd.f32 %v6747_v36, %v3606_v2  ;;  %v4907_v62 = vpop.f32.mrb[170].mxu1  ;;  %v3400_v54 = vpop.f32.mrb[90].mxu0 }
 0x2c9   : > { %3903 = vst [vmem:[%s6970_s12 + $0x50] sm:$0xff] %v3615_v25  ;;  %v3618_v24 = vadd.f32 %v6766_v28, %v4907_v62  ;;  %v3609_v21 = vpop.f32.mrb[171].mxu1  ;;  %v7007_v57 = vadd.f32 %v3400_v54, %v2695_v31  ;;  %v3402_v43 = vpop.f32.mrb[91].mxu0  ;;  %v2711_v31 = vadd.f32 %v6682_v5, %v6624_v52  ;;  %v7489_v52 = vld [vmem:[#allocation3_spill] sm:$0xff] }
 0x2ca   : > { %3901 = vst [vmem:[%s6970_s12 + $0x40] sm:$0xff] %v3607_v8  ;;  %v3610_v63 = vadd.f32 %v6752_v27, %v3609_v21  ;;  %v7488_v43 = vld [vmem:[#allocation13_spill] sm:$0xff] }
 0x2cb   : > { %3904 = vst [vmem:[%s6970_s12 + $0x58] sm:$0xff] %v3618_v24 }
 0x2cc   : > { %3902 = vst [vmem:[%s6970_s12 + $0x48] sm:$0xff] %v3610_v63 }
 0x2ce   : > { %v4910_v36 = vpop.f32.mrb[172].mxu1  ;;  %v3405_v34 = vpop.f32.mrb[92].mxu0 }
 0x2cf   : > { %v3631_v39 = vadd.f32 %v6789_v59, %v4910_v36  ;;  %v3622_v28 = vpop.f32.mrb[173].mxu1  ;;  %v7017_v32 = vadd.f32 %v3405_v34, %v2700_v61  ;;  %v3407_v47 = vpop.f32.mrb[93].mxu0  ;;  %v2716_v61 = vadd.f32 %v6682_v5, %v7489_v52 }
 0x2d0   : > { %v3623_v27 = vadd.f32 %v6775_v51, %v3622_v28  ;;  %v4911_v16 = vpop.f32.mrb[174].mxu1  ;;  %v3408_v37 = vpop.f32.mrb[94].mxu0 }
 0x2d1   : > { %3907 = vst [vmem:[%s6970_s12 + $0x70] sm:$0xff] %v3631_v39  ;;  %v3634_v13 = vadd.f32 %v6794_v50, %v4911_v16  ;;  %v3625_v38 = vpop.f32.mrb[175].mxu1  ;;  %v7023_v53 = vadd.f32 %v3408_v37, %v2703_v7  ;;  %v3410_v59 = vpop.f32.mrb[95].mxu0  ;;  %v7490_v39 = vld [vmem:[#allocation4_spill] sm:$0xff] }
 0x2d2   : > { %3905 = vst [vmem:[%s6970_s12 + $0x60] sm:$0xff] %v3623_v27  ;;  %v3626_v41 = vadd.f32 %v6780_v44, %v3625_v38  ;;  %v2719_v28 = vadd.f32 %v6682_v5, %v7490_v39 }
 0x2d3   : > { %3908 = vst [vmem:[%s6970_s12 + $0x78] sm:$0xff] %v3634_v13 }
 0x2d4   : > { %3906 = vst [vmem:[%s6970_s12 + $0x68] sm:$0xff] %v3626_v41 }
 0x2d6   : > { %v4914_v51 = vpop.f32.mrb[176].mxu1  ;;  %v3413_v25 = vpop.f32.mrb[96].mxu0 }
 0x2d7   : > { %v3647_v2 = vadd.f32 %v6817_v12, %v4914_v51  ;;  %v3638_v50 = vpop.f32.mrb[177].mxu1  ;;  %v7033_v60 = vadd.f32 %v3413_v25, %v2708_v22  ;;  %v3415_v8 = vpop.f32.mrb[97].mxu0  ;;  %v7491_v22 = vld [vmem:[#allocation5_spill] sm:$0xff] }
 0x2d8   : > { %v3639_v44 = vadd.f32 %v6803_v4, %v3638_v50  ;;  %v4915_v62 = vpop.f32.mrb[178].mxu1  ;;  %v3416_v54 = vpop.f32.mrb[98].mxu0  ;;  %v2724_v51 = vadd.f32 %v6682_v5, %v7491_v22  ;;  %v7492_v50 = vld [vmem:[#allocation6_spill] sm:$0xff] }
 0x2d9   : > { %3911 = vst [vmem:[%s6970_s12 + $0x90] sm:$0xff] %v3647_v2  ;;  %v3650_v42 = vadd.f32 %v6822_v0, %v4915_v62  ;;  %v3641_v24 = vpop.f32.mrb[179].mxu1  ;;  %v7039_v21 = vadd.f32 %v3416_v54, %v2711_v31  ;;  %v3418_v12 = vpop.f32.mrb[99].mxu0  ;;  %v2727_v31 = vadd.f32 %v6682_v5, %v7492_v50 }
 0x2da   : > { %3909 = vst [vmem:[%s6970_s12 + $0x80] sm:$0xff] %v3639_v44  ;;  %v3642_v63 = vadd.f32 %v7488_v43, %v3641_v24 }
 0x2db   : > { %3912 = vst [vmem:[%s6970_s12 + $0x98] sm:$0xff] %v3650_v42 }
 0x2dc   : > { %3910 = vst [vmem:[%s6970_s12 + $0x88] sm:$0xff] %v3642_v63  ;;  %v7493_v63 = vld [vmem:[#allocation7_spill] sm:$0xff] }
 0x2dd   : > { %v2732_v52 = vadd.f32 %v6682_v5, %v7493_v63 }
 0x2de   : > { %v4918_v4 = vpop.f32.mrb[180].mxu1  ;;  %v3421_v36 = vpop.f32.mrb[100].mxu0 }
 0x2df   : > { %v3663_v34 = vadd.f32 %v6851_v17, %v4918_v4  ;;  %v3654_v0 = vpop.f32.mrb[181].mxu1  ;;  %v7049_v7 = vadd.f32 %v3421_v36, %v2716_v61  ;;  %v3423_v47 = vpop.f32.mrb[101].mxu0  ;;  %v7494_v36 = vld [vmem:[#allocation8_spill] sm:$0xff] }
 0x2e0   : > { %v3655_v27 = vadd.f32 %v6833_v29, %v3654_v0  ;;  %v4919_v16 = vpop.f32.mrb[182].mxu1  ;;  %v3424_v37 = vpop.f32.mrb[102].mxu0 }
 0x2e1   : > { %3915 = vst [vmem:[%s6970_s12 + $0xb0] sm:$0xff] %v3663_v34  ;;  %v3666_v13 = vadd.f32 %v6858_v3, %v4919_v16  ;;  %v3657_v38 = vpop.f32.mrb[183].mxu1  ;;  %v7055_v59 = vadd.f32 %v3424_v37, %v2719_v28  ;;  %v3426_v17 = vpop.f32.mrb[103].mxu0  ;;  %v2735_v34 = vadd.f32 %v6682_v5, %v7494_v36 }
 0x2e2   : > { %3913 = vst [vmem:[%s6970_s12 + $0xa0] sm:$0xff] %v3655_v27  ;;  %v3658_v41 = vadd.f32 %v6840_v55, %v3657_v38  ;;  %v7495_v38 = vld [vmem:[#allocation9_spill] sm:$0xff] }
 0x2e3   : > { %3916 = vst [vmem:[%s6970_s12 + $0xb8] sm:$0xff] %v3666_v13  ;;  %v2740_v17 = vadd.f32 %v6682_v5, %v7495_v38 }
 0x2e4   : > { %3914 = vst [vmem:[%s6970_s12 + $0xa8] sm:$0xff] %v3658_v41 }
 0x2e6   : > { %v4922_v29 = vpop.f32.mrb[184].mxu1  ;;  %v3429_v25 = vpop.f32.mrb[104].mxu0 }
 0x2e7   : > { %v3679_v2 = vadd.f32 %v6883_v45, %v4922_v29  ;;  %v3670_v3 = vpop.f32.mrb[185].mxu1  ;;  %v7065_v8 = vadd.f32 %v3429_v25, %v2724_v51  ;;  %v3431_v44 = vpop.f32.mrb[105].mxu0  ;;  %v7496_v51 = vld [vmem:[#allocation10_spill] sm:$0xff] }
 0x2e8   : > { %v3671_v55 = vadd.f32 %v6869_v6, %v3670_v3  ;;  %v4923_v62 = vpop.f32.mrb[186].mxu1  ;;  %v3432_v54 = vpop.f32.mrb[106].mxu0  ;;  %v2743_v29 = vadd.f32 %v6682_v5, %v7496_v51 }
 0x2e9   : > { %3919 = vst [vmem:[%s6970_s12 + $0xd0] sm:$0xff] %v3679_v2  ;;  %v3682_v42 = vadd.f32 %v6887_v9, %v4923_v62  ;;  %v3673_v24 = vpop.f32.mrb[187].mxu1  ;;  %v7071_v12 = vadd.f32 %v3432_v54, %v2727_v31  ;;  %v3434_v45 = vpop.f32.mrb[107].mxu0  ;;  %v7497_v54 = vld [vmem:[#allocation11_spill] sm:$0xff] }
 0x2ea   : > { %3917 = vst [vmem:[%s6970_s12 + $0xc0] sm:$0xff] %v3671_v55  ;;  %v3674_v43 = vadd.f32 %v6874_v49, %v3673_v24 }
 0x2eb   : > { %3920 = vst [vmem:[%s6970_s12 + $0xd8] sm:$0xff] %v3682_v42  ;;  %v2748_v42 = vadd.f32 %v6682_v5, %v7497_v54 }
 0x2ec   : > { %3918 = vst [vmem:[%s6970_s12 + $0xc8] sm:$0xff] %v3674_v43  ;;  %v7498_v43 = vld [vmem:[#allocation12_spill] sm:$0xff] }
 0x2ed   : > { %v2751_v63 = vadd.f32 %v6682_v5, %v7498_v43 }
 0x2ee   : > { %v4926_v6 = vpop.f32.mrb[188].mxu1  ;;  %v3437_v61 = vpop.f32.mrb[108].mxu0 }
 0x2ef   : > { %v3695_v4 = vadd.f32 %v6907_v20, %v4926_v6  ;;  %v3686_v9 = vpop.f32.mrb[189].mxu1  ;;  %v7081_v0 = vadd.f32 %v3437_v61, %v2732_v52  ;;  %v3439_v39 = vpop.f32.mrb[109].mxu0 }
 0x2f0   : > { %v3687_v49 = vadd.f32 %v6895_v14, %v3686_v9  ;;  %v4927_v28 = vpop.f32.mrb[190].mxu1  ;;  %v3440_v47 = vpop.f32.mrb[110].mxu0 }
 0x2f1   : > { %3923 = vst [vmem:[%s6970_s12 + $0xf0] sm:$0xff] %v3695_v4  ;;  %v3698_v27 = vadd.f32 %v6911_v48, %v4927_v28  ;;  %v3689_v16 = vpop.f32.mrb[191].mxu1  ;;  %v7087_v37 = vadd.f32 %v3440_v47, %v2735_v34  ;;  %v3442_v20 = vpop.f32.mrb[111].mxu0 }
 0x2f2   : > { %3921 = vst [vmem:[%s6970_s12 + $0xe0] sm:$0xff] %v3687_v49  ;;  %v3690_v13 = vadd.f32 %v6899_v56, %v3689_v16  ;;  %v7499_v49 = vld [vmem:[#allocation14_spill] sm:$0xff]  ;;  %v7130_v16 = vld [vmem:[%s7455_s2] ss:$0 sm:$0xff] }
 0x2f3   : > { %3924 = vst [vmem:[%s6970_s12 + $0xf8] sm:$0xff] %v3698_v27  ;;  %v5128_v28 = vadd.f32 %v6682_v5, %v7499_v49  ;;  %v7500_v20 = vld [vmem:[#allocation15_spill] sm:$0xff] }
 0x2f4   : > { %3922 = vst [vmem:[%s6970_s12 + $0xe8] sm:$0xff] %v3690_v13 }
 0x2f6   : > { %v4930_v14 = vpop.f32.mrb[192].mxu1  ;;  %v3445_v41 = vpop.f32.mrb[112].mxu0 }
 0x2f7   : > { %v3711_v22 = vadd.f32 %v6931_v35, %v4930_v14  ;;  %v3702_v48 = vpop.f32.mrb[193].mxu1  ;;  %v7097_v25 = vadd.f32 %v3445_v41, %v2740_v17  ;;  %v3447_v2 = vpop.f32.mrb[113].mxu0 }
 0x2f8   : > { %v3703_v56 = vadd.f32 %v6919_v40, %v3702_v48  ;;  %v4931_v3 = vpop.f32.mrb[194].mxu1  ;;  %v3448_v50 = vpop.f32.mrb[114].mxu0 }
 0x2f9   : > { %3927 = vst [vmem:[%s6970_s12 + $0x110] sm:$0xff] %v3711_v22  ;;  %v3714_v31 = vadd.f32 %v6935_v33, %v4931_v3  ;;  %v3705_v44 = vpop.f32.mrb[195].mxu1  ;;  %v7103_v55 = vadd.f32 %v3448_v50, %v2743_v29  ;;  %v3450_v35 = vpop.f32.mrb[115].mxu0  ;;  %v7501_v29 = vld [vmem:[#allocation16_spill] sm:$0xff]  ;;  %v7502_v50 = vld [vmem:[#allocation17_spill] sm:$0xff] }
 0x2fa   : > { %3925 = vst [vmem:[%s6970_s12 + $0x100] sm:$0xff] %v3703_v56  ;;  %v3706_v62 = vadd.f32 %v6923_v18, %v3705_v44  ;;  %v5132_v2 = vadd.f32 %v7130_v16, %v7501_v29 }
 0x2fb   : > { %3928 = vst [vmem:[%s6970_s12 + $0x118] sm:$0xff] %v3714_v31  ;;  %v5134_v31 = vadd.f32 %v7130_v16, %v7502_v50 }
 0x2fc   : > { %3926 = vst [vmem:[%s6970_s12 + $0x108] sm:$0xff] %v3706_v62 }
 0x2fe   : > { %v4934_v40 = vpop.f32.mrb[196].mxu1  ;;  %v3453_v24 = vpop.f32.mrb[116].mxu0 }
 0x2ff   : > { %v3727_v45 = vadd.f32 %v6956_v23, %v4934_v40  ;;  %v3718_v33 = vpop.f32.mrb[197].mxu1  ;;  %v7113_v52 = vadd.f32 %v3453_v24, %v2748_v42  ;;  %v3455_v6 = vpop.f32.mrb[117].mxu0 }
 0x300   : > { %v3719_v18 = vadd.f32 %v6943_v26, %v3718_v33  ;;  %v4935_v61 = vpop.f32.mrb[198].mxu1  ;;  %v3456_v4 = vpop.f32.mrb[118].mxu0  ;;  %v7503_v33 = vld [vmem:[#allocation18_spill] sm:$0xff] }
 0x301   : > { %3931 = vst [vmem:[%s6970_s12 + $0x130] sm:$0xff] %v3727_v45  ;;  %v3730_v9 = vadd.f32 %v6960_v1, %v4935_v61  ;;  %v3721_v36 = vpop.f32.mrb[199].mxu1  ;;  %v7119_v34 = vadd.f32 %v3456_v4, %v2751_v63  ;;  %v3458_v23 = vpop.f32.mrb[119].mxu0  ;;  %v5136_v43 = vadd.f32 %v7130_v16, %v7503_v33 }
 0x302   : > { %3929 = vst [vmem:[%s6970_s12 + $0x120] sm:$0xff] %v3719_v18  ;;  %v3722_v39 = vadd.f32 %v6947_v15, %v3721_v36  ;;  %v5130_v15 = vadd.f32 %v7130_v16, %v7500_v20  ;;  %v7504_v18 = vld [vmem:[#allocation19_spill] sm:$0xff] }
 0x303   : > { %3932 = vst [vmem:[%s6970_s12 + $0x138] sm:$0xff] %v3730_v9  ;;  %v5138_v61 = vadd.f32 %v7130_v16, %v7504_v18 }
 0x304   : > { %3930 = vst [vmem:[%s6970_s12 + $0x128] sm:$0xff] %v3722_v39 }
 0x306   : > { %v4938_v26 = vpop.f32.mrb[200].mxu1  ;;  %v3461_v47 = vpop.f32.mrb[120].mxu0 }
 0x307   : > { %v3743_v27 = vadd.f32 %v6985_v30, %v4938_v26  ;;  %v3734_v1 = vpop.f32.mrb[201].mxu1  ;;  %v7134_v13 = vadd.f32 %v5128_v28, %v3461_v47  ;;  %v3463_v38 = vpop.f32.mrb[121].mxu0  ;;  %v7505_v47 = vld [vmem:[#allocation20_spill] sm:$0xff] }
 0x308   : > { %v3735_v5 = vadd.f32 %v6967_v46, %v3734_v1  ;;  %v4939_v17 = vpop.f32.mrb[202].mxu1  ;;  %v3464_v14 = vpop.f32.mrb[122].mxu0 }
 0x309   : > { %3935 = vst [vmem:[%s6970_s12 + $0x150] sm:$0xff] %v3743_v27  ;;  %v3746_v30 = vadd.f32 %v6991_v11, %v4939_v17  ;;  %v3737_v41 = vpop.f32.mrb[203].mxu1  ;;  %v7140_v22 = vadd.f32 %v5130_v15, %v3464_v14  ;;  %v3466_v48 = vpop.f32.mrb[123].mxu0  ;;  %v5140_v27 = vadd.f32 %v7130_v16, %v7505_v47  ;;  %v7506_v15 = vld [vmem:[#allocation21_spill] sm:$0xff] }
 0x30a   : > { %3933 = vst [vmem:[%s6970_s12 + $0x140] sm:$0xff] %v3735_v5  ;;  %v3738_v51 = vadd.f32 %v6975_v19, %v3737_v41  ;;  %v5142_v38 = vadd.f32 %v7130_v16, %v7506_v15 }
 0x30b   : > { %3936 = vst [vmem:[%s6970_s12 + $0x158] sm:$0xff] %v3746_v30 }
 0x30c   : > { %3934 = vst [vmem:[%s6970_s12 + $0x148] sm:$0xff] %v3738_v51 }
 0x30e   : > { %v4942_v46 = vpop.f32.mrb[204].mxu1  ;;  %v3469_v56 = vpop.f32.mrb[124].mxu0 }
 0x30f   : > { %v3759_v3 = vadd.f32 %v7017_v32, %v4942_v46  ;;  %v3750_v11 = vpop.f32.mrb[205].mxu1  ;;  %v7150_v44 = vadd.f32 %v5132_v2, %v3469_v56  ;;  %v3471_v35 = vpop.f32.mrb[125].mxu0  ;;  %v7507_v2 = vld [vmem:[#allocation22_spill] sm:$0xff] }
 0x310   : > { %v3751_v19 = vadd.f32 %v7001_v58, %v3750_v11  ;;  %v4943_v62 = vpop.f32.mrb[206].mxu1  ;;  %v3472_v54 = vpop.f32.mrb[126].mxu0  ;;  %v5144_v46 = vadd.f32 %v7130_v16, %v7507_v2  ;;  %v7508_v11 = vld [vmem:[#allocation23_spill] sm:$0xff] }
 0x311   : > { %3939 = vst [vmem:[%s6970_s12 + $0x170] sm:$0xff] %v3759_v3  ;;  %v3762_v42 = vadd.f32 %v7023_v53, %v4943_v62  ;;  %v3753_v40 = vpop.f32.mrb[207].mxu1  ;;  %v7156_v24 = vadd.f32 %v5134_v31, %v3472_v54  ;;  %v3474_v32 = vpop.f32.mrb[127].mxu0  ;;  %v5146_v50 = vadd.f32 %v7130_v16, %v7508_v11 }
 0x312   : > { %3937 = vst [vmem:[%s6970_s12 + $0x160] sm:$0xff] %v3751_v19  ;;  %v3754_v45 = vadd.f32 %v7007_v57, %v3753_v40 }
 0x313   : > { %3940 = vst [vmem:[%s6970_s12 + $0x178] sm:$0xff] %v3762_v42 }
 0x314   : > { %3938 = vst [vmem:[%s6970_s12 + $0x168] sm:$0xff] %v3754_v45  ;;  %v7509_v45 = vld [vmem:[#allocation24_spill] sm:$0xff] }
 0x315   : > { %v5148_v33 = vadd.f32 %v7130_v16, %v7509_v45 }
 0x316   : > { %v4946_v58 = vpop.f32.mrb[208].mxu1  ;;  %v3477_v63 = vpop.f32.mrb[128].mxu0 }
 0x317   : > { %v3775_v6 = vadd.f32 %v7049_v7, %v4946_v58  ;;  %v3766_v53 = vpop.f32.mrb[209].mxu1  ;;  %v7166_v4 = vadd.f32 %v5136_v43, %v3477_v63  ;;  %v3479_v9 = vpop.f32.mrb[129].mxu0  ;;  %v7510_v63 = vld [vmem:[#allocation25_spill] sm:$0xff] }
 0x318   : > { %v3767_v57 = vadd.f32 %v7033_v60, %v3766_v53  ;;  %v4947_v36 = vpop.f32.mrb[210].mxu1  ;;  %v3480_v23 = vpop.f32.mrb[130].mxu0 }
 0x319   : > { %3943 = vst [vmem:[%s6970_s12 + $0x190] sm:$0xff] %v3775_v6  ;;  %v3778_v39 = vadd.f32 %v7055_v59, %v4947_v36  ;;  %v3769_v49 = vpop.f32.mrb[211].mxu1  ;;  %v7172_v28 = vadd.f32 %v5138_v61, %v3480_v23  ;;  %v3482_v7 = vpop.f32.mrb[131].mxu0  ;;  %v5150_v6 = vadd.f32 %v7130_v16, %v7510_v63 }
 0x31a   : > { %3941 = vst [vmem:[%s6970_s12 + $0x180] sm:$0xff] %v3767_v57  ;;  %v3770_v26 = vadd.f32 %v7039_v21, %v3769_v49  ;;  %v7511_v49 = vld [vmem:[#allocation26_spill] sm:$0xff] }
 0x31b   : > { %3944 = vst [vmem:[%s6970_s12 + $0x198] sm:$0xff] %v3778_v39  ;;  %v5152_v7 = vadd.f32 %v7130_v16, %v7511_v49 }
 0x31c   : > { %3942 = vst [vmem:[%s6970_s12 + $0x188] sm:$0xff] %v3770_v26 }
 0x31e   : > { %v4950_v60 = vpop.f32.mrb[212].mxu1  ;;  %v3485_v1 = vpop.f32.mrb[132].mxu0 }
 0x31f   : > { %v3791_v20 = vadd.f32 %v7081_v0, %v4950_v60  ;;  %v3782_v59 = vpop.f32.mrb[213].mxu1  ;;  %v5141_v5 = vadd.f32 %v5140_v27, %v3485_v1  ;;  %v3487_v17 = vpop.f32.mrb[133].mxu0 }
 0x320   : > { %v3783_v21 = vadd.f32 %v7065_v8, %v3782_v59  ;;  %v4951_v14 = vpop.f32.mrb[214].mxu1  ;;  %v3488_v30 = vpop.f32.mrb[134].mxu0 }
 0x321   : > { %3947 = vst [vmem:[%s6970_s12 + $0x1b0] sm:$0xff] %v3791_v20  ;;  %v3794_v41 = vadd.f32 %v7087_v37, %v4951_v14  ;;  %v3785_v48 = vpop.f32.mrb[215].mxu1  ;;  %v5143_v51 = vadd.f32 %v5142_v38, %v3488_v30  ;;  %v3490_v29 = vpop.f32.mrb[135].mxu0  ;;  %v7513_v30 = vld [vmem:[#allocation28_spill] sm:$0xff] }
 0x322   : > { %3945 = vst [vmem:[%s6970_s12 + $0x1a0] sm:$0xff] %v3783_v21  ;;  %v3786_v0 = vadd.f32 %v7071_v12, %v3785_v48 }
 0x323   : > { %3948 = vst [vmem:[%s6970_s12 + $0x1b8] sm:$0xff] %v3794_v41  ;;  %v5156_v41 = vadd.f32 %v7130_v16, %v7513_v30 }
 0x324   : > { %3946 = vst [vmem:[%s6970_s12 + $0x1a8] sm:$0xff] %v3786_v0 }
 0x326   : > { %v4954_v56 = vpop.f32.mrb[216].mxu1  ;;  %v3493_v8 = vpop.f32.mrb[136].mxu0 }
 0x327   : > { %v3807_v3 = vadd.f32 %v7113_v52, %v4954_v56  ;;  %v3798_v37 = vpop.f32.mrb[217].mxu1  ;;  %v5145_v31 = vadd.f32 %v5144_v46, %v3493_v8  ;;  %v3495_v35 = vpop.f32.mrb[137].mxu0 }
 0x328   : > { %v3799_v12 = vadd.f32 %v7097_v25, %v3798_v37  ;;  %v4955_v19 = vpop.f32.mrb[218].mxu1  ;;  %v3496_v62 = vpop.f32.mrb[138].mxu0 }
 0x329   : > { %3951 = vst [vmem:[%s6970_s12 + $0x1d0] sm:$0xff] %v3807_v3  ;;  %v3810_v54 = vadd.f32 %v7119_v34, %v4955_v19  ;;  %v3801_v42 = vpop.f32.mrb[219].mxu1  ;;  %v5147_v40 = vadd.f32 %v5146_v50, %v3496_v62  ;;  %v3498_v32 = vpop.f32.mrb[139].mxu0  ;;  %v7515_v19 = vld [vmem:[#allocation30_spill] sm:$0xff] }
 0x32a   : > { %3949 = vst [vmem:[%s6970_s12 + $0x1c0] sm:$0xff] %v3799_v12  ;;  %v3802_v52 = vadd.f32 %v7103_v55, %v3801_v42  ;;  %v5160_v62 = vadd.f32 %v7130_v16, %v7515_v19 }
 0x32b   : > { %3952 = vst [vmem:[%s6970_s12 + $0x1d8] sm:$0xff] %v3810_v54 }
 0x32c   : > { %3950 = vst [vmem:[%s6970_s12 + $0x1c8] sm:$0xff] %v3802_v52  ;;  %v7516_v52 = vld [vmem:[#allocation31_spill] sm:$0xff] }
 0x32d   : > { %v5162_v45 = vadd.f32 %v7130_v16, %v7516_v52 }
 0x32e   : > { %v4958_v43 = vpop.f32.mrb[220].mxu1  ;;  %v3501_v25 = vpop.f32.mrb[140].mxu0 }
 0x32f   : > { %v3823_v58 = vadd.f32 %v7150_v44, %v4958_v43  ;;  %v3814_v34 = vpop.f32.mrb[221].mxu1  ;;  %v5149_v53 = vadd.f32 %v5148_v33, %v3501_v25  ;;  %v3503_v18 = vpop.f32.mrb[141].mxu0 }
 0x330   : > { %v3815_v55 = vadd.f32 %v7134_v13, %v3814_v34  ;;  %v4959_v61 = vpop.f32.mrb[222].mxu1  ;;  %v3504_v9 = vpop.f32.mrb[142].mxu0 }
 0x331   : > { %3955 = vst [vmem:[%s6970_s12 + $0x1f0] sm:$0xff] %v3823_v58  ;;  %v3826_v57 = vadd.f32 %v7156_v24, %v4959_v61  ;;  %v3817_v36 = vpop.f32.mrb[223].mxu1  ;;  %v5151_v23 = vadd.f32 %v5150_v6, %v3504_v9  ;;  %v3506_v39 = vpop.f32.mrb[143].mxu0  ;;  %v7512_v24 = vld [vmem:[#allocation27_spill] sm:$0xff] }
 0x332   : > { %3953 = vst [vmem:[%s6970_s12 + $0x1e0] sm:$0xff] %v3815_v55  ;;  %v3818_v44 = vadd.f32 %v7140_v22, %v3817_v36  ;;  %v5154_v60 = vadd.f32 %v7130_v16, %v7512_v24  ;;  %v7517_v55 = vld [vmem:[#allocation32_spill] sm:$0xff] }
 0x333   : > { %3956 = vst [vmem:[%s6970_s12 + $0x1f8] sm:$0xff] %v3826_v57  ;;  %v5164_v61 = vadd.f32 %v7130_v16, %v7517_v55 }
 0x334   : > { %3954 = vst [vmem:[%s6970_s12 + $0x1e8] sm:$0xff] %v3818_v44 }
 0x336   : > { %v4962_v26 = vpop.f32.mrb[224].mxu1  ;;  %v3509_v13 = vpop.f32.mrb[144].mxu0 }
 0x337   : > { %v3839_v47 = vadd.f32 %v5141_v5, %v4962_v26  ;;  %v3830_v27 = vpop.f32.mrb[225].mxu1  ;;  %v5153_v1 = vadd.f32 %v5152_v7, %v3509_v13  ;;  %v3511_v20 = vpop.f32.mrb[145].mxu0 }
 0x338   : > { %v3831_v59 = vadd.f32 %v7166_v4, %v3830_v27  ;;  %v4963_v22 = vpop.f32.mrb[226].mxu1  ;;  %v3512_v15 = vpop.f32.mrb[146].mxu0 }
 0x339   : > { %3959 = vst [vmem:[%s6970_s12 + $0x210] sm:$0xff] %v3839_v47  ;;  %v3842_v38 = vadd.f32 %v5143_v51, %v4963_v22  ;;  %v3833_v17 = vpop.f32.mrb[227].mxu1  ;;  %v5155_v21 = vadd.f32 %v5154_v60, %v3512_v15  ;;  %v3514_v14 = vpop.f32.mrb[147].mxu0  ;;  %v7514_v51 = vld [vmem:[#allocation29_spill] sm:$0xff] }
 0x33a   : > { %3957 = vst [vmem:[%s6970_s12 + $0x200] sm:$0xff] %v3831_v59  ;;  %v3834_v5 = vadd.f32 %v7172_v28, %v3833_v17  ;;  %v5158_v2 = vadd.f32 %v7130_v16, %v7514_v51 }
 0x33b   : > { %3960 = vst [vmem:[%s6970_s12 + $0x218] sm:$0xff] %v3842_v38 }
 0x33c   : > { %3958 = vst [vmem:[%s6970_s12 + $0x208] sm:$0xff] %v3834_v5 }
 0x33e   : > { %v4966_v48 = vpop.f32.mrb[228].mxu1  ;;  %v3517_v29 = vpop.f32.mrb[148].mxu0 }
 0x33f   : > { %v3855_v4 = vadd.f32 %v5149_v53, %v4966_v48  ;;  %v3846_v0 = vpop.f32.mrb[229].mxu1  ;;  %v5157_v46 = vadd.f32 %v5156_v41, %v3517_v29  ;;  %v3519_v56 = vpop.f32.mrb[149].mxu0 }
 0x340   : > { %v3847_v8 = vadd.f32 %v5145_v31, %v3846_v0  ;;  %v4967_v3 = vpop.f32.mrb[230].mxu1  ;;  %v3520_v28 = vpop.f32.mrb[150].mxu0 }
 0x341   : > { %3963 = vst [vmem:[%s6970_s12 + $0x230] sm:$0xff] %v3855_v4  ;;  %v3858_v37 = vadd.f32 %v5151_v23, %v4967_v3  ;;  %v3849_v11 = vpop.f32.mrb[231].mxu1  ;;  %v5159_v50 = vadd.f32 %v5158_v2, %v3520_v28  ;;  %v3522_v35 = vpop.f32.mrb[151].mxu0  ;;  %v5166_v23 = vadd.f32 %v7130_v16, %v6958_v10 }
 0x342   : > { %3961 = vst [vmem:[%s6970_s12 + $0x220] sm:$0xff] %v3847_v8  ;;  %v3850_v12 = vadd.f32 %v5147_v40, %v3849_v11 }
 0x343   : > { %3964 = vst [vmem:[%s6970_s12 + $0x238] sm:$0xff] %v3858_v37 }
 0x344   : > { %3962 = vst [vmem:[%s6970_s12 + $0x228] sm:$0xff] %v3850_v12 }
 0x346   : > { %v4970_v54 = vpop.f32.mrb[232].mxu1  ;;  %v3525_v42 = vpop.f32.mrb[152].mxu0 }
 0x347   : > { %v3871_v31 = vadd.f32 %v5157_v46, %v4970_v54  ;;  %v3862_v32 = vpop.f32.mrb[233].mxu1  ;;  %v5161_v33 = vadd.f32 %v5160_v62, %v3525_v42  ;;  %v3527_v43 = vpop.f32.mrb[153].mxu0 }
 0x348   : > { %v3863_v25 = vadd.f32 %v5153_v1, %v3862_v32  ;;  %v4971_v58 = vpop.f32.mrb[234].mxu1  ;;  %v3528_v40 = vpop.f32.mrb[154].mxu0 }
 0x349   : > { %3967 = vst [vmem:[%s6970_s12 + $0x250] sm:$0xff] %v3871_v31  ;;  %v3874_v34 = vadd.f32 %v5159_v50, %v4971_v58  ;;  %v3865_v63 = vpop.f32.mrb[235].mxu1  ;;  %v5163_v6 = vadd.f32 %v5162_v45, %v3528_v40  ;;  %v3530_v53 = vpop.f32.mrb[155].mxu0 }
 0x34a   : > { %3965 = vst [vmem:[%s6970_s12 + $0x240] sm:$0xff] %v3863_v25  ;;  %v3866_v18 = vadd.f32 %v5155_v21, %v3865_v63 }
 0x34b   : > { %3968 = vst [vmem:[%s6970_s12 + $0x258] sm:$0xff] %v3874_v34 }
 0x34c   : > { %3966 = vst [vmem:[%s6970_s12 + $0x248] sm:$0xff] %v3866_v18 }
 0x34e   : > { %v4974_v9 = vpop.f32.mrb[236].mxu1  ;;  %v3533_v57 = vpop.f32.mrb[156].mxu0 }
 0x34f   : > { %v3878_v36 = vpop.f32.mrb[237].mxu1  ;;  %v5165_v39 = vadd.f32 %v5164_v61, %v3533_v57  ;;  %v3535_v44 = vpop.f32.mrb[157].mxu0  ;;  %3979 = sbr.rel (!%p6008_p4) target bundleno = 926 (0x39e), region = 36 }
 0x350   : > { %v3879_v49 = vadd.f32 %v5161_v33, %v3878_v36  ;;  %v4975_v7 = vpop.f32.mrb[238].mxu1  ;;  %v3536_v26 = vpop.f32.mrb[158].mxu0 }
 0x351   : > { %v3881_v13 = vpop.f32.mrb[239].mxu1  ;;  %v3887_v47 = vadd.f32 %v5165_v39, %v4974_v9  ;;  %v5167_v27 = vadd.f32 %v5166_v23, %v3536_v26  ;;  %v3538_v24 = vpop.f32.mrb[159].mxu0 }
 0x352   : > { %3969 = vst [vmem:[%s6970_s12 + $0x260] sm:$0xff] %v3879_v49  ;;  %v3882_v60 = vadd.f32 %v5163_v6, %v3881_v13 }
 0x353   : > { %3971 = vst [vmem:[%s6970_s12 + $0x270] sm:$0xff] %v3887_v47  ;;  %v3890_v1 = vadd.f32 %v5167_v27, %v4975_v7 }
 0x354   : > { %3970 = vst [vmem:[%s6970_s12 + $0x268] sm:$0xff] %v3882_v60 }
 0x355   : > { %3972 = vst [vmem:[%s6970_s12 + $0x278] sm:$0xff] %v3890_v1 }
 0x356   : > { %s7527_s23 = smov (!%p3982_p8, %s3981_s23), 80 }
 0x357   : > { %s4820_s28 = sshll.u32 %s7527_s23, 7 }
 0x358   : > { %p4823_p9 = scmp.eq.s32.totalorder %s4820_s28, 0 }
 0x359   : > { %s7260_s29 = sshrl.u32 (!%p4823_p9), %s7527_s23, 6 }
 0x35a   : > { %3990 = sbr.rel (%p4823_p9) target bundleno = 926 (0x39e), region = 40  ;;  %p4824_p10 = scmp.le.s32.totalorder (!%p4823_p9), %s7260_s29, 0 }
 0x361   : > { %4396 = sbr.rel (%p4824_p10) target bundleno = 905 (0x389), region = 116  ;;  %s7518_s15 = smov (!%p4824_p10), %s7254_s27 }
 0x362   : > { %s7519_s20 = smov (!%p4824_p10), %s6970_s12  ;;  %s7269_s14 = smov (!%p4824_p10), 0  }
 0x363   : > { %s7271_s30 = smov (!%p4824_p10), 0  }
 0x368 LB: >> { %v4178_v10 = vld [vmem:[%s5936_s20] sm:$0xff]  ;;  %v4180_v16 = vld [vmem:[%s5936_s20 + $0x8] sm:$0xff]  ;;  %v4182_v20 = vld [vmem:[%s5936_s20 + $0x10] sm:$0xff]  ;;  %s4306_s4 = sadd.s32 1, %s5940_s14  ;;  %s4172_s30 = sadd.s32 1, %s5944_s30   ;;  %s5944_s30 = sphi %s7271_s30, %s4172_s30   ;;  %s5940_s14 = sphi %s7269_s14, %s7522_s14   ;;  %s5936_s20 = sphi %s7519_s20, %s7521_s20   ;;  %s5932_s15 = sphi %s7518_s15, %s7520_s15  }
 0x369   : >> { %4179 = vst [vmem:[%s5932_s15] sm:$0xff] %v4178_v10  ;;  %4181 = vst [vmem:[%s5932_s15 + $0x8] sm:$0xff] %v4180_v16  ;;  %v4184_v59 = vld [vmem:[%s5936_s20 + $0x18] sm:$0xff]  ;;  %v4186_v22 = vld [vmem:[%s5936_s20 + $0x20] sm:$0xff]  ;;  %p4307_p11 = scmp.ge.s32.totalorder %s4306_s4, %s7260_s29  ;;  %p4171_p12 = scmp.ge.s32.totalorder %s4172_s30, %s7260_s29 }
 0x36a   : >> { %4183 = vst [vmem:[%s5932_s15 + $0x10] sm:$0xff] %v4182_v20  ;;  %v4188_v15 = vld [vmem:[%s5936_s20 + $0x28] sm:$0xff]  ;;  %4185 = vst [vmem:[%s5932_s15 + $0x18] sm:$0xff] %v4184_v59  ;;  %v4190_v38 = vld [vmem:[%s5936_s20 + $0x30] sm:$0xff] }
 0x36b   : >> { %4187 = vst [vmem:[%s5932_s15 + $0x20] sm:$0xff] %v4186_v22  ;;  %4189 = vst [vmem:[%s5932_s15 + $0x28] sm:$0xff] %v4188_v15  ;;  %v4192_v17 = vld [vmem:[%s5936_s20 + $0x38] sm:$0xff]  ;;  %v4194_v21 = vld [vmem:[%s5936_s20 + $0x40] sm:$0xff]  ;;  %s7529_s4 = smov (%p4307_p11, %s4306_s4), 0 }
 0x36c   : >> { %4191 = vst [vmem:[%s5932_s15 + $0x30] sm:$0xff] %v4190_v38  ;;  %4193 = vst [vmem:[%s5932_s15 + $0x38] sm:$0xff] %v4192_v17  ;;  %v4196_v14 = vld [vmem:[%s5936_s20 + $0x48] sm:$0xff]  ;;  %v4198_v5 = vld [vmem:[%s5936_s20 + $0x50] sm:$0xff]  ;;  %s4825_s5 = sshll.u32 %s7529_s4, 9  ;;  %s7522_s14 = smov %s7529_s4 }
 0x36d   : >> { %4195 = vst [vmem:[%s5932_s15 + $0x40] sm:$0xff] %v4194_v21  ;;  %v4200_v30 = vld [vmem:[%s5936_s20 + $0x58] sm:$0xff]  ;;  %4197 = vst [vmem:[%s5932_s15 + $0x48] sm:$0xff] %v4196_v14  ;;  %v4202_v41 = vld [vmem:[%s5936_s20 + $0x60] sm:$0xff]  ;;  %s7327_s6 = scalar_lea.vmem %s6970_s12, %s4825_s5 [#allocation2]   ;;  %s7330_s7 = scalar_lea.vmem %s7254_s27, %s4825_s5  }
 0x36e   : >> { %4199 = vst [vmem:[%s5932_s15 + $0x50] sm:$0xff] %v4198_v5  ;;  %4201 = vst [vmem:[%s5932_s15 + $0x58] sm:$0xff] %v4200_v30  ;;  %v4204_v48 = vld [vmem:[%s5936_s20 + $0x68] sm:$0xff]  ;;  %v4206_v29 = vld [vmem:[%s5936_s20 + $0x70] sm:$0xff] }
 0x36f   : >> { %4203 = vst [vmem:[%s5932_s15 + $0x60] sm:$0xff] %v4202_v41  ;;  %4205 = vst [vmem:[%s5932_s15 + $0x68] sm:$0xff] %v4204_v48  ;;  %v4208_v4 = vld [vmem:[%s5936_s20 + $0x78] sm:$0xff]  ;;  %v4210_v0 = vld [vmem:[%s5936_s20 + $0x80] sm:$0xff] }
 0x370   : >> { %4207 = vst [vmem:[%s5932_s15 + $0x70] sm:$0xff] %v4206_v29  ;;  %v4212_v51 = vld [vmem:[%s5936_s20 + $0x88] sm:$0xff]  ;;  %4209 = vst [vmem:[%s5932_s15 + $0x78] sm:$0xff] %v4208_v4  ;;  %v4214_v2 = vld [vmem:[%s5936_s20 + $0x90] sm:$0xff] }
 0x371   : >> { %4211 = vst [vmem:[%s5932_s15 + $0x80] sm:$0xff] %v4210_v0  ;;  %4213 = vst [vmem:[%s5932_s15 + $0x88] sm:$0xff] %v4212_v51  ;;  %v4216_v46 = vld [vmem:[%s5936_s20 + $0x98] sm:$0xff]  ;;  %v4218_v56 = vld [vmem:[%s5936_s20 + $0xa0] sm:$0xff] }
 0x372   : >> { %4215 = vst [vmem:[%s5932_s15 + $0x90] sm:$0xff] %v4214_v2  ;;  %4217 = vst [vmem:[%s5932_s15 + $0x98] sm:$0xff] %v4216_v46  ;;  %v4220_v8 = vld [vmem:[%s5936_s20 + $0xa8] sm:$0xff]  ;;  %v4222_v3 = vld [vmem:[%s5936_s20 + $0xb0] sm:$0xff] }
 0x373   : >> { %4219 = vst [vmem:[%s5932_s15 + $0xa0] sm:$0xff] %v4218_v56  ;;  %v4224_v28 = vld [vmem:[%s5936_s20 + $0xb8] sm:$0xff]  ;;  %4221 = vst [vmem:[%s5932_s15 + $0xa8] sm:$0xff] %v4220_v8  ;;  %v4226_v37 = vld [vmem:[%s5936_s20 + $0xc0] sm:$0xff] }
 0x374   : >> { %4223 = vst [vmem:[%s5932_s15 + $0xb0] sm:$0xff] %v4222_v3  ;;  %4225 = vst [vmem:[%s5932_s15 + $0xb8] sm:$0xff] %v4224_v28  ;;  %v4228_v11 = vld [vmem:[%s5936_s20 + $0xc8] sm:$0xff]  ;;  %v4230_v50 = vld [vmem:[%s5936_s20 + $0xd0] sm:$0xff] }
 0x375   : >> { %4227 = vst [vmem:[%s5932_s15 + $0xc0] sm:$0xff] %v4226_v37  ;;  %4229 = vst [vmem:[%s5932_s15 + $0xc8] sm:$0xff] %v4228_v11  ;;  %v4232_v35 = vld [vmem:[%s5936_s20 + $0xd8] sm:$0xff]  ;;  %v4234_v12 = vld [vmem:[%s5936_s20 + $0xe0] sm:$0xff] }
 0x376   : >> { %4231 = vst [vmem:[%s5932_s15 + $0xd0] sm:$0xff] %v4230_v50  ;;  %v4236_v19 = vld [vmem:[%s5936_s20 + $0xe8] sm:$0xff]  ;;  %4233 = vst [vmem:[%s5932_s15 + $0xd8] sm:$0xff] %v4232_v35  ;;  %v4238_v62 = vld [vmem:[%s5936_s20 + $0xf0] sm:$0xff] }
 0x377   : >> { %4235 = vst [vmem:[%s5932_s15 + $0xe0] sm:$0xff] %v4234_v12  ;;  %4237 = vst [vmem:[%s5932_s15 + $0xe8] sm:$0xff] %v4236_v19  ;;  %v4240_v54 = vld [vmem:[%s5936_s20 + $0xf8] sm:$0xff]  ;;  %v4242_v42 = vld [vmem:[%s5936_s20 + $0x100] sm:$0xff] }
 0x378   : >> { %4239 = vst [vmem:[%s5932_s15 + $0xf0] sm:$0xff] %v4238_v62  ;;  %4241 = vst [vmem:[%s5932_s15 + $0xf8] sm:$0xff] %v4240_v54  ;;  %v4244_v31 = vld [vmem:[%s5936_s20 + $0x108] sm:$0xff]  ;;  %v4246_v32 = vld [vmem:[%s5936_s20 + $0x110] sm:$0xff] }
 0x379   : >> { %4243 = vst [vmem:[%s5932_s15 + $0x100] sm:$0xff] %v4242_v42  ;;  %v4248_v52 = vld [vmem:[%s5936_s20 + $0x118] sm:$0xff]  ;;  %4245 = vst [vmem:[%s5932_s15 + $0x108] sm:$0xff] %v4244_v31  ;;  %v4250_v45 = vld [vmem:[%s5936_s20 + $0x120] sm:$0xff] }
 0x37a   : >> { %4247 = vst [vmem:[%s5932_s15 + $0x110] sm:$0xff] %v4246_v32  ;;  %4249 = vst [vmem:[%s5932_s15 + $0x118] sm:$0xff] %v4248_v52  ;;  %v4252_v33 = vld [vmem:[%s5936_s20 + $0x128] sm:$0xff]  ;;  %v4254_v43 = vld [vmem:[%s5936_s20 + $0x130] sm:$0xff] }
 0x37b   : >> { %4251 = vst [vmem:[%s5932_s15 + $0x120] sm:$0xff] %v4250_v45  ;;  %4253 = vst [vmem:[%s5932_s15 + $0x128] sm:$0xff] %v4252_v33  ;;  %v4256_v25 = vld [vmem:[%s5936_s20 + $0x138] sm:$0xff]  ;;  %v4258_v58 = vld [vmem:[%s5936_s20 + $0x140] sm:$0xff] }
 0x37c   : >> { %4255 = vst [vmem:[%s5932_s15 + $0x130] sm:$0xff] %v4254_v43  ;;  %v4260_v40 = vld [vmem:[%s5936_s20 + $0x148] sm:$0xff]  ;;  %4257 = vst [vmem:[%s5932_s15 + $0x138] sm:$0xff] %v4256_v25  ;;  %v4262_v34 = vld [vmem:[%s5936_s20 + $0x150] sm:$0xff] }
 0x37d   : >> { %4259 = vst [vmem:[%s5932_s15 + $0x140] sm:$0xff] %v4258_v58  ;;  %4261 = vst [vmem:[%s5932_s15 + $0x148] sm:$0xff] %v4260_v40  ;;  %v4264_v63 = vld [vmem:[%s5936_s20 + $0x158] sm:$0xff]  ;;  %v4266_v6 = vld [vmem:[%s5936_s20 + $0x160] sm:$0xff] }
 0x37e   : >> { %4263 = vst [vmem:[%s5932_s15 + $0x150] sm:$0xff] %v4262_v34  ;;  %4265 = vst [vmem:[%s5932_s15 + $0x158] sm:$0xff] %v4264_v63  ;;  %v4268_v53 = vld [vmem:[%s5936_s20 + $0x168] sm:$0xff]  ;;  %v4270_v18 = vld [vmem:[%s5936_s20 + $0x170] sm:$0xff] }
 0x37f   : >> { %4267 = vst [vmem:[%s5932_s15 + $0x160] sm:$0xff] %v4266_v6  ;;  %v4272_v55 = vld [vmem:[%s5936_s20 + $0x178] sm:$0xff]  ;;  %4269 = vst [vmem:[%s5932_s15 + $0x168] sm:$0xff] %v4268_v53  ;;  %v4274_v61 = vld [vmem:[%s5936_s20 + $0x180] sm:$0xff] }
 0x380   : >> { %4271 = vst [vmem:[%s5932_s15 + $0x170] sm:$0xff] %v4270_v18  ;;  %4273 = vst [vmem:[%s5932_s15 + $0x178] sm:$0xff] %v4272_v55  ;;  %v4276_v9 = vld [vmem:[%s5936_s20 + $0x188] sm:$0xff]  ;;  %v4278_v57 = vld [vmem:[%s5936_s20 + $0x190] sm:$0xff] }
 0x381   : >> { %4275 = vst [vmem:[%s5932_s15 + $0x180] sm:$0xff] %v4274_v61  ;;  %4277 = vst [vmem:[%s5932_s15 + $0x188] sm:$0xff] %v4276_v9  ;;  %v4280_v36 = vld [vmem:[%s5936_s20 + $0x198] sm:$0xff]  ;;  %v4282_v23 = vld [vmem:[%s5936_s20 + $0x1a0] sm:$0xff] }
 0x382   : >> { %4279 = vst [vmem:[%s5932_s15 + $0x190] sm:$0xff] %v4278_v57  ;;  %v4284_v39 = vld [vmem:[%s5936_s20 + $0x1a8] sm:$0xff]  ;;  %4281 = vst [vmem:[%s5932_s15 + $0x198] sm:$0xff] %v4280_v36  ;;  %v4286_v44 = vld [vmem:[%s5936_s20 + $0x1b0] sm:$0xff]  ;;  %4174 = sbr.rel (!%p4171_p12) target bundleno = 872 (0x368), region = 122 }
 0x383   : >> { %4283 = vst [vmem:[%s5932_s15 + $0x1a0] sm:$0xff] %v4282_v23  ;;  %4285 = vst [vmem:[%s5932_s15 + $0x1a8] sm:$0xff] %v4284_v39  ;;  %v4288_v49 = vld [vmem:[%s5936_s20 + $0x1b8] sm:$0xff]  ;;  %v4290_v7 = vld [vmem:[%s5936_s20 + $0x1c0] sm:$0xff] }
 0x384   : >> { %4287 = vst [vmem:[%s5932_s15 + $0x1b0] sm:$0xff] %v4286_v44  ;;  %4289 = vst [vmem:[%s5932_s15 + $0x1b8] sm:$0xff] %v4288_v49  ;;  %v4292_v26 = vld [vmem:[%s5936_s20 + $0x1c8] sm:$0xff]  ;;  %v4294_v13 = vld [vmem:[%s5936_s20 + $0x1d0] sm:$0xff] }
 0x385   : >> { %4291 = vst [vmem:[%s5932_s15 + $0x1c0] sm:$0xff] %v4290_v7  ;;  %v4296_v47 = vld [vmem:[%s5936_s20 + $0x1d8] sm:$0xff]  ;;  %4293 = vst [vmem:[%s5932_s15 + $0x1c8] sm:$0xff] %v4292_v26  ;;  %v4298_v27 = vld [vmem:[%s5936_s20 + $0x1e0] sm:$0xff] }
 0x386   : >> { %4295 = vst [vmem:[%s5932_s15 + $0x1d0] sm:$0xff] %v4294_v13  ;;  %4297 = vst [vmem:[%s5932_s15 + $0x1d8] sm:$0xff] %v4296_v47  ;;  %v4300_v24 = vld [vmem:[%s5936_s20 + $0x1e8] sm:$0xff]  ;;  %v4302_v60 = vld [vmem:[%s5936_s20 + $0x1f0] sm:$0xff] }
 0x387   : >> { %4299 = vst [vmem:[%s5932_s15 + $0x1e0] sm:$0xff] %v4298_v27  ;;  %4301 = vst [vmem:[%s5932_s15 + $0x1e8] sm:$0xff] %v4300_v24  ;;  %v4304_v1 = vld [vmem:[%s5936_s20 + $0x1f8] sm:$0xff]  ;;  %s7521_s20 = smov %s7327_s6 }
 0x388   : >> { %4303 = vst [vmem:[%s5932_s15 + $0x1f0] sm:$0xff] %v4302_v60  ;;  %4305 = vst [vmem:[%s5932_s15 + $0x1f8] sm:$0xff] %v4304_v1  ;;  %s7520_s15 = smov %s7330_s7 }
 0x389 PF: > { %s7435_s8 = sand.u32 63, %s7527_s23   ;;  %s4836_s9 = sshll.u32 %s7260_s29, 9 }
 0x38a   : > { %s4317_s10 = scalar_lea.vmem %s6970_s12, %s4836_s9 [#allocation2]   ;;  %s4319_s11 = scalar_lea.vmem %s7254_s27, %s4836_s9  }
 0x38b   : > { %p4830_p13 = scmp.le.s32.totalorder %s7435_s8, 0 }
 0x38c   : > { %s5946_s17 = smov (!%p4830_p13), %s4319_s11   ;;  %s5950_s18 = smov (!%p4830_p13), %s4317_s10  }
 0x38d   : > { %4410 = sbr.rel (%p4830_p13) target bundleno = 926 (0x39e), region = 127  ;;  %s5954_s21 = smov (!%p4830_p13), 0  }
 0x38e   : > { %s5958_s22 = smov (!%p4830_p13), 0  }
 0x394 LB: >> { %v4329_v10 = vld [vmem:[%s5952_s18] sm:$0xff]  ;;  %s4331_s23 = sadd.s32 1, %s5956_s21  ;;  %s4323_s22 = sadd.s32 1, %s5960_s22   ;;  %s5960_s22 = sphi %s5958_s22, %s4323_s22   ;;  %s5956_s21 = sphi %s5954_s21, %s5955_s21   ;;  %s5952_s18 = sphi %s5950_s18, %s4336_s18   ;;  %s5948_s17 = sphi %s5946_s17, %s4337_s17  }
 0x395   : >> { %4330 = vst [vmem:[%s5948_s17] sm:$0xff] %v4329_v10  ;;  %p4332_p0 = scmp.ge.s32.totalorder %s4331_s23, %s7435_s8  ;;  %p4322_p1 = scmp.ge.s32.totalorder %s4323_s22, %s7435_s8 }
 0x397   : >> { %s7531_s23 = smov (%p4332_p0, %s4331_s23), 0  ;;  %4325 = sbr.rel (!%p4322_p1) target bundleno = 916 (0x394), region = 133 }
 0x398   : >> { %s4831_s12 = sshll.u32 %s7531_s23, 3  ;;  %s5955_s21 = smov %s7531_s23  }
 0x399   : >> { %s4336_s18 = scalar_lea.vmem %s4317_s10, %s4831_s12 [#allocation2]   ;;  %s4337_s17 = scalar_lea.vmem %s4319_s11, %s4831_s12  }
 0x39e PF: > { %p10_p2 = scmp.ge.s32.totalorder %s5998_s16, 4   ;;  %s7523_s12 = smov %s5924_s13 }
 0x39f   : > { %s7524_s13 = smov %s6006_s19  ;;  %s7525_s14 = smov %s5998_s16 }
 0x3a0   :  { %12 = sbr.rel (!%p10_p2) target bundleno = 2 (0x2), region = 144 }

</bundles_post_ra>
